<compile_context>
chip_gen: v6e
topology: v6e:2x2x1
jax: 0.10.0
libtpu: 0.0.40
codegen_flags: <defaults>
</compile_context>

<pallas_src>
import jax
import jax.numpy as jnp
from jax import lax
from jax.experimental import pallas as pl
from jax.experimental.pallas import tpu as pltpu


def _round_up(v, m):
    return -(-v // m) * m


def _sigmoid(x):
    # sigmoid(x) == 0.5*(tanh(0.5*x)+1): one EUP push (tanh) + cheap VPU ops instead
    # of exp + reciprocal (2 EUP pushes). The serial recurrence is EUP-limited.
    return 0.5 * jnp.tanh(0.5 * x) + 0.5


# ----------------------------------------------------------------------------
# Stages 1 & 3: K-blocked tiled GEMM + bias (both M/N grid axes "parallel")
# ----------------------------------------------------------------------------
def _matmul_bias_kernel(x_ref, w_ref, b_ref, o_ref, acc_ref):
    k = pl.program_id(2)

    @pl.when(k == 0)
    def _():
        acc_ref[...] = jnp.zeros_like(acc_ref)

    acc_ref[...] += jnp.dot(x_ref[...].astype(w_ref.dtype), w_ref[...],
                            preferred_element_type=jnp.float32)

    @pl.when(k == pl.num_programs(2) - 1)
    def _():
        o_ref[...] = (acc_ref[...] + b_ref[...]).astype(o_ref.dtype)


def _matmul_bias(x2d, w, b, *, tm=256, tn=512, tk=512, out_dtype=jnp.float32):
    """(M, K) @ (K, N) + (1, N), tiled on M, N and K. Ragged edges are zero-padded
    in the wrapper (zeros are neutral for the accumulation) and sliced off after."""
    M, K = x2d.shape
    _, N = w.shape
    tm = min(tm, _round_up(M, 8))
    tn = min(tn, _round_up(N, 128))
    tk = min(tk, _round_up(K, 128))
    Mp, Np, Kp = _round_up(M, tm), _round_up(N, tn), _round_up(K, tk)
    if (Mp, Kp) != (M, K):
        x2d = jnp.pad(x2d, ((0, Mp - M), (0, Kp - K)))
    if (Kp, Np) != (K, N):
        w = jnp.pad(w, ((0, Kp - K), (0, Np - N)))
    if Np != N:
        b = jnp.pad(b, ((0, 0), (0, Np - N)))

    out = pl.pallas_call(
        _matmul_bias_kernel,
        out_shape=jax.ShapeDtypeStruct((Mp, Np), out_dtype),
        grid_spec=pltpu.PrefetchScalarGridSpec(
            num_scalar_prefetch=0,
            grid=(Mp // tm, Np // tn, Kp // tk),
            in_specs=[
                pl.BlockSpec((tm, tk), lambda i, j, k: (i, k)),
                pl.BlockSpec((tk, tn), lambda i, j, k: (k, j)),
                pl.BlockSpec((1, tn), lambda i, j, k: (0, j)),
            ],
            out_specs=pl.BlockSpec((tm, tn), lambda i, j, k: (i, j)),
            scratch_shapes=[pltpu.VMEM((tm, tn), jnp.float32)],
        ),
        compiler_params=pltpu.CompilerParams(
            dimension_semantics=("parallel", "parallel", "arbitrary")),
    )(x2d, w, b)
    if (Mp, Np) != (M, N):
        out = out[:M, :N]
    return out


# ----------------------------------------------------------------------------
# Stage 2: sequential recurrence. Only W_hh^T (H, 4H) is resident; each grid
# step consumes t_blk precomputed gate blocks and emits t_blk hidden states.
# h/c live in vreg carries inside the block; VMEM scratch only carries them
# across grid steps (and feeds hn/cn at the end).
# ----------------------------------------------------------------------------
def _make_recurrent_kernel(hidden_size, t_blk, seq_len, needs_mask, unroll):
    H = hidden_size

    def kernel(gx_ref, whh_ref, hseq_ref, hn_ref, cn_ref, h_scr, c_scr):
        blk = pl.program_id(1)  # time-block index (inner, "arbitrary")

        # zero initial state per batch shard (states_0=None in the PyTorch forward)
        @pl.when(blk == 0)
        def _():
            h_scr[...] = jnp.zeros_like(h_scr)
            c_scr[...] = jnp.zeros_like(c_scr)

        whh = whh_ref[...]           # resident weight, loaded once per block
        t0 = blk * t_blk

        def step(s, carry):
            h, c = carry
            # gates = (x_t @ W_ih^T + b) [precomputed]  +  h_{t-1} @ W_hh^T
            gates = gx_ref[s] + jnp.dot(h.astype(whh.dtype), whh,
                                        preferred_element_type=jnp.float32)
            # gate order matches PyTorch: i, f, g, o
            i_g = _sigmoid(gates[:, 0 * H:1 * H])
            f_g = _sigmoid(gates[:, 1 * H:2 * H])
            g_g = jnp.tanh(gates[:, 2 * H:3 * H])
            o_g = _sigmoid(gates[:, 3 * H:4 * H])
            c_new = f_g * c + i_g * g_g
            h_new = o_g * jnp.tanh(c_new)
            if needs_mask:  # only compiled in when S was padded up to a t_blk multiple
                valid = (t0 + s) < seq_len
                h_new = jnp.where(valid, h_new, h)
                c_new = jnp.where(valid, c_new, c)
            hseq_ref[s] = h_new.astype(hseq_ref.dtype)
            return (h_new, c_new)

        h, c = lax.fori_loop(0, t_blk, step, (h_scr[...], c_scr[...]),
                             unroll=unroll)
        # carry state to the next grid step via scratch (once per block, not per step)
        h_scr[...] = h
        c_scr[...] = c

        # final states (hn, cn) written once, on the last time block
        @pl.when(blk == pl.num_programs(1) - 1)
        def _():
            hn_ref[0] = h.astype(hn_ref.dtype)
            cn_ref[0] = c.astype(cn_ref.dtype)

    return kernel


def lstm_model_forward(x, params, *, t_blk=32, unroll=4, batch_shards=1,
                       param_dtype=jnp.bfloat16):
    """x: (seq, batch, vocab) f32. Returns (scores, (hn, cn)).

    param_dtype=bfloat16 halves weight residency / HBM traffic (f32 accumulation and
    f32 gate math preserved). batch_shards>1 adds a leading "parallel" grid axis to
    the recurrence so the two v7x TensorCores each run an independent batch shard
    (requires B % batch_shards == 0 and B//batch_shards a multiple of 8).
    """
    S, B, V = x.shape
    w_ih, w_hh, b_ih, b_hh, w_lin, b_lin = (
        params["w_ih"], params["w_hh"], params["b_ih"],
        params["b_hh"], params["w_lin"], params["b_lin"])
    H = w_hh.shape[1]
    assert B % batch_shards == 0
    Bs = B // batch_shards

    # glue (not hot path): pre-transpose / pre-combine, optional dtype cast
    wih_t = w_ih.T.astype(param_dtype)                        # (V, 4H)
    whh_t = w_hh.T.astype(param_dtype)                        # (H, 4H)
    b = (b_ih + b_hh).reshape(1, 4 * H).astype(jnp.float32)   # (1, 4H)
    wlin_t = w_lin.T.astype(param_dtype)                      # (H, V)
    blin = b_lin.reshape(1, V).astype(jnp.float32)            # (1, V)

    # Large time blocks amortize per-grid-step overhead on the only serial stage.
    # Instead of shrinking t_blk to a divisor of S, pad S and mask the tail steps.
    t_blk = max(1, min(t_blk, S))
    S_pad = _round_up(S, t_blk)
    needs_mask = S_pad != S
    unroll = max(1, min(unroll, t_blk))
    while t_blk % unroll:
        unroll -= 1

    # ---- Stage 1: time-parallel input projection (K-blocked GEMM) ----------
    gates_x = _matmul_bias(x.reshape(S * B, V).astype(param_dtype), wih_t, b,
                           out_dtype=jnp.float32).reshape(S, B, 4 * H)
    if needs_mask:
        gates_x = jnp.pad(gates_x, ((0, S_pad - S), (0, 0), (0, 0)))

    # ---- Stage 2: sequential recurrence -------------------------------------
    out_shapes = (
        jax.ShapeDtypeStruct((S_pad, B, H), param_dtype),   # h_seq (fed to Stage 3)
        jax.ShapeDtypeStruct((1, B, H), jnp.float32),       # hn
        jax.ShapeDtypeStruct((1, B, H), jnp.float32),       # cn
    )
    grid_spec = pltpu.PrefetchScalarGridSpec(
        num_scalar_prefetch=0,
        grid=(batch_shards, S_pad // t_blk),
        in_specs=[
            pl.BlockSpec((t_blk, Bs, 4 * H), lambda bs, i: (i, bs, 0)),  # gates_x
            pl.BlockSpec((H, 4 * H), lambda bs, i: (0, 0)),              # W_hh^T resident
        ],
        out_specs=[
            pl.BlockSpec((t_blk, Bs, H), lambda bs, i: (i, bs, 0)),      # h_seq block
            pl.BlockSpec((1, Bs, H), lambda bs, i: (0, bs, 0)),          # hn
            pl.BlockSpec((1, Bs, H), lambda bs, i: (0, bs, 0)),          # cn
        ],
        scratch_shapes=[
            pltpu.VMEM((Bs, H), jnp.float32),   # h carry across time blocks
            pltpu.VMEM((Bs, H), jnp.float32),   # c carry across time blocks
        ],
    )
    h_seq, hn, cn = pl.pallas_call(
        _make_recurrent_kernel(H, t_blk, S, needs_mask, unroll),
        out_shape=out_shapes,
        grid_spec=grid_spec,
        compiler_params=pltpu.CompilerParams(
            dimension_semantics=("parallel", "arbitrary")),
    )(gates_x, whh_t)
    if needs_mask:
        h_seq = h_seq[:S]

    # ---- Stage 3: time-parallel Linear head (h_seq already in param_dtype) --
    scores = _matmul_bias(h_seq.reshape(S * B, H), wlin_t, blin,
                          out_dtype=jnp.float32).reshape(S, B, V)
    return scores, (hn, cn)


# ----------------------------------------------------------------------------
# Pure-JAX reference (lax.scan) matching PyTorch LSTM + Linear semantics
# ----------------------------------------------------------------------------
def reference_forward(x, params):
    w_ih, w_hh, b_ih, b_hh, w_lin, b_lin = (
        params["w_ih"], params["w_hh"], params["b_ih"],
        params["b_hh"], params["w_lin"], params["b_lin"])
    H = w_hh.shape[1]
    B = x.shape[1]

    def step(carry, x_t):
        h, c = carry
        gates = x_t @ w_ih.T + h @ w_hh.T + b_ih + b_hh
        i = jax.nn.sigmoid(gates[:, 0 * H:1 * H])
        f = jax.nn.sigmoid(gates[:, 1 * H:2 * H])
        g = jnp.tanh(gates[:, 2 * H:3 * H])
        o = jax.nn.sigmoid(gates[:, 3 * H:4 * H])
        c = f * c + i * g
        h = o * jnp.tanh(c)
        return (h, c), h

    h0 = jnp.zeros((B, H), jnp.float32)
    c0 = jnp.zeros((B, H), jnp.float32)
    (hn, cn), hs = lax.scan(step, (h0, c0), x)
    scores = hs @ w_lin.T + b_lin
    return scores, (hn[None], cn[None])


def init_params(key, vocab_size, hidden_size):
    """Deterministic init matching nn.LSTM / nn.Linear parameter shapes."""
    H, V = hidden_size, vocab_size
    k = 1.0 / jnp.sqrt(jnp.float32(H))
    keys = jax.random.split(key, 6)
    u = lambda kk, shape: jax.random.uniform(kk, shape, jnp.float32, -k, k)
    return {
        "w_ih": u(keys[0], (4 * H, V)),
        "w_hh": u(keys[1], (4 * H, H)),
        "b_ih": u(keys[2], (4 * H,)),
        "b_hh": u(keys[3], (4 * H,)),
        "w_lin": u(keys[4], (V, H)),
        "b_lin": u(keys[5], (V,)),
    }


# TODO(synk): CustomDataset / generate_sample (host-side sampling loop) are not part
# of Model.forward and are intentionally not translated to Pallas.

if __name__ == "__main__":
    # consistent precision for the scan reference vs. in-kernel matmuls
    jax.config.update("jax_default_matmul_precision", "highest")

    # Small shapes consistent with the module's forward (seq, batch, vocab),
    # padded to TPU-friendly sizes: B >= 8 (sublane), H/V multiples of 128 (lane).
    SEQ, BATCH, VOCAB, HIDDEN = 16, 8, 128, 128

    key = jax.random.PRNGKey(0)
    kx, kp = jax.random.split(key)
    x = jax.random.normal(kx, (SEQ, BATCH, VOCAB), jnp.float32)
    params = init_params(kp, VOCAB, HIDDEN)

    ref_scores, (ref_hn, ref_cn) = reference_forward(x, params)

    # 1) f32-weight path: tight numerical check against the lax.scan reference.
    scores, (hn, cn) = lstm_model_forward(x, params, param_dtype=jnp.float32)
    jax.block_until_ready((scores, hn, cn))
    assert scores.shape == (SEQ, BATCH, VOCAB)
    assert hn.shape == (1, BATCH, HIDDEN) and cn.shape == (1, BATCH, HIDDEN)
    assert jnp.allclose(scores, ref_scores, atol=1e-3, rtol=1e-3)
    assert jnp.allclose(hn, ref_hn, atol=1e-3, rtol=1e-3)
    assert jnp.allclose(cn, ref_cn, atol=1e-3, rtol=1e-3)

    # 2) default bf16-weight perf path: loose sanity check against the f32 reference.
    scores_bf, (hn_bf, cn_bf) = lstm_model_forward(x, params)
    jax.block_until_ready((scores_bf, hn_bf, cn_bf))
    assert bool(jnp.all(jnp.isfinite(scores_bf)))
    assert float(jnp.max(jnp.abs(scores_bf - ref_scores))) < 0.25
    assert float(jnp.max(jnp.abs(hn_bf - ref_hn))) < 0.25
    assert float(jnp.max(jnp.abs(cn_bf - ref_cn))) < 0.25

    print("KERNEL_OK")
</pallas_src>

<mosaic_0001>
module attributes {stable_mosaic.version = 11 : i64} {
  func.func @_matmul_bias_kernel(%arg0: i32, %arg1: i32, %arg2: i32, %arg3: memref<128x128xf32, #tpu.memory_space<vmem>>, %arg4: memref<128x512xf32, #tpu.memory_space<vmem>>, %arg5: memref<1x512xf32, #tpu.memory_space<vmem>>, %arg6: memref<128x512xf32, #tpu.memory_space<vmem>>, %arg7: memref<128x512xf32, #tpu.memory_space<vmem>>) attributes {dimension_semantics = [#tpu.dimension_semantics<parallel>, #tpu.dimension_semantics<parallel>, #tpu.dimension_semantics<arbitrary>], iteration_bounds = array<i64: 1, 1, 1>, scalar_prefetch = 0 : i64, scratch_operands = 1 : i64, tpu.core_type = #tpu.core_type<tc>, window_params = [{transform_indices = @transform_0, window_bounds = array<i64: 128, 128>}, {transform_indices = @transform_1, window_bounds = array<i64: 128, 512>}, {transform_indices = @transform_2, window_bounds = array<i64: 1, 512>}, {transform_indices = @transform_3, window_bounds = array<i64: 128, 512>}]} {
    %c0_i32 = arith.constant 0 : i32
    %0 = arith.cmpi eq, %arg2, %c0_i32 : i32
    %1 = arith.extui %0 : i1 to i32
    %c0_i32_0 = arith.constant 0 : i32
    %2 = arith.cmpi ne, %1, %c0_i32_0 : i32
    scf.if %2 {
      %cst_10 = arith.constant 0.000000e+00 : f32
      %12 = vector.broadcast %cst_10 : f32 to vector<128x512xf32>
      %c0_11 = arith.constant 0 : index
      %c0_12 = arith.constant 0 : index
      %13 = vector.load %arg7[%c0_11, %c0_12] : memref<128x512xf32, #tpu.memory_space<vmem>>, vector<128x512xf32>
      tpu.vector_store %arg7[%c0_11, %c0_12], %12 {strides = array<i32>} : memref<128x512xf32, #tpu.memory_space<vmem>>, vector<128x512xf32>,
    } else {
    }
    %c0 = arith.constant 0 : index
    %c0_1 = arith.constant 0 : index
    %3 = vector.load %arg7[%c0, %c0_1] : memref<128x512xf32, #tpu.memory_space<vmem>>, vector<128x512xf32>
    %c0_2 = arith.constant 0 : index
    %c0_3 = arith.constant 0 : index
    %4 = vector.load %arg3[%c0_2, %c0_3] : memref<128x128xf32, #tpu.memory_space<vmem>>, vector<128x128xf32>
    %c0_4 = arith.constant 0 : index
    %c0_5 = arith.constant 0 : index
    %5 = vector.load %arg4[%c0_4, %c0_5] : memref<128x512xf32, #tpu.memory_space<vmem>>, vector<128x512xf32>
    %cst = arith.constant dense<0.000000e+00> : vector<128x512xf32>
    %6 = tpu.matmul %4, %5, %cst {dimension_numbers = #tpu.dot_dimension_numbers<[1], [0], [0], [1], [0, 0, 1, 1], [], []>, precision = #tpu.contract_precision<fp32>} : vector<128x128xf32>, vector<128x512xf32>, vector<128x512xf32> -> vector<128x512xf32>
    %7 = arith.addf %3, %6 : vector<128x512xf32>
    %c0_6 = arith.constant 0 : index
    %c0_7 = arith.constant 0 : index
    %8 = vector.load %arg7[%c0_6, %c0_7] : memref<128x512xf32, #tpu.memory_space<vmem>>, vector<128x512xf32>
    tpu.vector_store %arg7[%c0_6, %c0_7], %7 {strides = array<i32>} : memref<128x512xf32, #tpu.memory_space<vmem>>, vector<128x512xf32>,
    %c0_i32_8 = arith.constant 0 : i32
    %9 = arith.cmpi eq, %arg2, %c0_i32_8 : i32
    %10 = arith.extui %9 : i1 to i32
    %c0_i32_9 = arith.constant 0 : i32
    %11 = arith.cmpi ne, %10, %c0_i32_9 : i32
    scf.if %11 {
      %c0_10 = arith.constant 0 : index
      %c0_11 = arith.constant 0 : index
      %12 = vector.load %arg7[%c0_10, %c0_11] : memref<128x512xf32, #tpu.memory_space<vmem>>, vector<128x512xf32>
      %c0_12 = arith.constant 0 : index
      %c0_13 = arith.constant 0 : index
      %13 = vector.load %arg5[%c0_12, %c0_13] : memref<1x512xf32, #tpu.memory_space<vmem>>, vector<1x512xf32>
      %14 = vector.broadcast %13 : vector<1x512xf32> to vector<128x512xf32>
      %15 = arith.addf %12, %14 : vector<128x512xf32>
      %c0_14 = arith.constant 0 : index
      %c0_15 = arith.constant 0 : index
      %16 = vector.load %arg6[%c0_14, %c0_15] : memref<128x512xf32, #tpu.memory_space<vmem>>, vector<128x512xf32>
      tpu.vector_store %arg6[%c0_14, %c0_15], %15 {strides = array<i32>} : memref<128x512xf32, #tpu.memory_space<vmem>>, vector<128x512xf32>,
    } else {
    }
    return
  }
  func.func @transform_0(%arg0: i32, %arg1: i32, %arg2: i32) -> (i32, i32) {
    %c0_i32 = arith.constant 0 : i32
    return %arg0, %arg2 : i32, i32
  }
  func.func @transform_1(%arg0: i32, %arg1: i32, %arg2: i32) -> (i32, i32) {
    %c0_i32 = arith.constant 0 : i32
    return %arg2, %arg1 : i32, i32
  }
  func.func @transform_2(%arg0: i32, %arg1: i32, %arg2: i32) -> (i32, i32) {
    %c0_i32 = arith.constant 0 : i32
    %c0_i32_0 = arith.constant 0 : i32
    return %c0_i32, %arg1 : i32, i32
  }
  func.func @transform_3(%arg0: i32, %arg1: i32, %arg2: i32) -> (i32, i32) {
    %c0_i32 = arith.constant 0 : i32
    return %arg0, %arg1 : i32, i32
  }
}

</mosaic_0001>

<bundles_post_ra>
// kernel: tpu_custom_call.1
= control target key start
LH: loop header
LB: loop body
LE: loop exit
PB: predicated region body
PF: predicated region fallthrough
CT: control target
= control target key end

     0   :  { %8 = vsyncpa [#allocation4], 0  ;;  %s6239_s0 = inlined_call_operand.hbm [shape: f32[128,128], index: 0, kind: input, shape index: {}]   ;;  %s6240_s1 = inlined_call_operand.hbm [shape: f32[128,512], index: 1, kind: input, shape index: {}]   ;;  %s6241_s2 = inlined_call_operand.hbm [shape: f32[1,512], index: 2, kind: input, shape index: {}]   ;;  %s6242_s3 = inlined_call_operand.hbm [shape: f32[128,512], index: 3, kind: output, shape index: {}]  }
   0x1   :  { %9 = vsyncpa [#allocation7], 0 }
   0x2   :  { %10 = vsyncpa [#allocation5], 0  ;;  %s3904_s12 = smov [#allocation6]  }
   0x3   :  { %s28_s13 = sshll.u32 %s3904_s12, 4  ;;  %s29_s13 = int_to_ptr.vmem [resolvable:$true] %s28_s13 }
   0x4   :  { %s3826_s14 = scalar_lea.vmem %s29_s13, 8192  ;;  %p3831_p1 = scmp.lt.s32.totalorder %s29_s13, %s29_s13 }
   0x5   :  { %p3827_p0 = scmp.ne.s32.totalorder %s29_s13, %s3826_s14  ;;  %p3832_p2 = scmp.lt.s32.totalorder %s3826_s14, %s3826_s14 }
   0x7   :  { %p3833_p3 = por %p3832_p2, %p3831_p1 }
   0x9   :  { %p3834_p4 = pnand %p3833_p3, %p3827_p0 }
   0xb   :  { %3837 = shalt.err (!%p3834_p4)
}
   0xc   :  { %s3905_s15 = smov 512   ;;  %s3906_s16 = smov 32  }
   0xd   :  { %34 = dma.hbm_to_vmem [thread:$0]  %s6240_s1, 8192, %s29_s13, [#allocation7], %s3905_s15, %s3905_s15, %s3906_s16  }
   0xe   :  { %s3907_s19 = smov [#allocation3]  }
   0xf   :  { %s16_s20 = sshll.u32 %s3907_s19, 4  ;;  %s17_s20 = int_to_ptr.vmem [resolvable:$true] %s16_s20 }
  0x10   :  { %s3846_s21 = scalar_lea.vmem %s17_s20, 2048  ;;  %p3851_p6 = scmp.lt.s32.totalorder %s17_s20, %s17_s20 }
  0x11   :  { %p3847_p5 = scmp.ne.s32.totalorder %s17_s20, %s3846_s21  ;;  %p3852_p7 = scmp.lt.s32.totalorder %s3846_s21, %s3846_s21 }
  0x13   :  { %p3853_p8 = por %p3852_p7, %p3851_p6 }
  0x15   :  { %p3854_p9 = pnand %p3853_p8, %p3847_p5 }
  0x17   :  { %3857 = shalt.err (!%p3854_p9)
}
  0x18   :  { %s3908_s22 = smov 128   ;;  %s3909_s23 = smov 8  }
  0x19   :  { %22 = dma.hbm_to_vmem [thread:$0]  %s6239_s0, 2048, %s17_s20, [#allocation4], %s3908_s22, %s3908_s22, %s3909_s23  }
  0x1a   :  { %s3910_s26 = smov [#allocation8]  }
  0x1b   :  { %s41_s27 = sshll.u32 %s3910_s26, 4  ;;  %s42_s27 = int_to_ptr.vmem [resolvable:$true] %s41_s27 }
  0x1c   :  { %s3866_s1 = scalar_lea.vmem %s42_s27, 64  ;;  %p3871_p11 = scmp.lt.s32.totalorder %s42_s27, %s42_s27 }
  0x1d   :  { %p3867_p10 = scmp.ne.s32.totalorder %s42_s27, %s3866_s1  ;;  %p3872_p12 = scmp.lt.s32.totalorder %s3866_s1, %s3866_s1 }
  0x1f   :  { %p3873_p13 = por %p3872_p12, %p3871_p11 }
  0x21   :  { %p3874_p0 = pnand %p3873_p13, %p3867_p10 }
  0x23   :  { %3877 = shalt.err (!%p3874_p0)
}
  0x24   :  { %44 = dma.hbm_to_vmem [thread:$0]  %s6241_s2, 64, %s42_s27, [#allocation7]  }
  0x25   :  { %3898 = dma.done.wait [#allocation4], 2048  }
  0x26   :  { %3899 = vsyncadd [#allocation4], 4294965248 }
  0x27   :  { %3900 = dma.done.wait [#allocation7], 8256  }
  0x28   :  { %3901 = vsyncadd [#allocation7], 4294959040  ;;  %v6257_v0 = vmov 0.0   ;;  %v263_v1 = vld [vmem:[#allocation6 + $0x1e8] sm:$0xff]  ;;  %v262_v2 = vld [vmem:[#allocation6 + $0x1e0] sm:$0xff]  ;;  %s3912_s0 = smov [#allocation9]  }
  0x29   :  { %362 = vmatprep.mubr.f32.mxu0 %v6257_v0  ;;  %763 = vmatprep.mubr.f32.mxu1 %v6257_v0  ;;  %v259_v3 = vld [vmem:[#allocation6 + $0x1c8] sm:$0xff]  ;;  %v3947_v4 = vand.u32 4294901760, %v263_v1  ;;  %v3949_v5 = vand.u32 4294901760, %v262_v2  ;;  %v258_v7 = vld [vmem:[#allocation6 + $0x1c0] sm:$0xff]  ;;  %s3796_s2 = sshll.u32 %s3912_s0, 4  ;;  %s3797_s2 = int_to_ptr.vmem [resolvable:$true] %s3796_s2 }
  0x2a   :  { %v3951_v6 = vand.u32 4294901760, %v259_v3  ;;  %v255_v8 = vld [vmem:[#allocation6 + $0x1a8] sm:$0xff]  ;;  %v254_v9 = vld [vmem:[#allocation6 + $0x1a0] sm:$0xff]  ;;  %v3953_v10 = vand.u32 4294901760, %v258_v7  ;;  %s3878_s30 = scalar_lea.vmem %s3797_s2, 8192  ;;  %p3883_p2 = scmp.lt.s32.totalorder %s3797_s2, %s3797_s2 }
  0x2b   :  { %v3955_v11 = vand.u32 4294901760, %v255_v8  ;;  %v3957_v12 = vand.u32 4294901760, %v254_v9  ;;  %v251_v13 = vld [vmem:[#allocation6 + $0x188] sm:$0xff]  ;;  %v250_v14 = vld [vmem:[#allocation6 + $0x180] sm:$0xff]  ;;  %267 = vmatprep.subr.mxu0 %v3947_v4  ;;  %v3967_v19 = vsub.f32 %v263_v1, %v3947_v4  ;;  %v3980_v24 = vsub.f32 %v262_v2, %v3949_v5  ;;  %p3879_p1 = scmp.ne.s32.totalorder %s3797_s2, %s3878_s30  ;;  %p3884_p3 = scmp.lt.s32.totalorder %s3878_s30, %s3878_s30 }
  0x2c   :  { %v247_v15 = vld [vmem:[#allocation6 + $0x168] sm:$0xff]  ;;  %v3960_v16 = vand.u32 4294901760, %v251_v13  ;;  %v3962_v17 = vand.u32 4294901760, %v250_v14  ;;  %v3969_v20 = vld [vmem:[#allocation6 + $0x160] sm:$0xff]  ;;  %269 = vmatpush1.msra.mxu0 %v3949_v5  ;;  %v3986_v26 = vsub.f32 %v259_v3, %v3951_v6  ;;  %v4000_v32 = vsub.f32 %v258_v7, %v3953_v10 }
  0x2d   :  { %v3964_v18 = vand.u32 4294901760, %v247_v15  ;;  %6502 = vst [vmem:[#allocation13_spill] sm:$0xff] %v3967_v19  ;;  %v3971_v21 = vld [vmem:[#allocation6 + $0x148] sm:$0xff]  ;;  %v3973_v22 = vld [vmem:[#allocation6 + $0x140] sm:$0xff]  ;;  %v3977_v23 = vand.u32 4294901760, %v3969_v20  ;;  %271 = vmatprep.subr.mxu0 %v3951_v6  ;;  %v6255_v30 = vand.u32 4294901760, %v3967_v19  ;;  %v4009_v36 = vsub.f32 %v255_v8, %v3955_v11  ;;  %p3885_p4 = por %p3884_p3, %p3883_p2 }
  0x2e   :  { %v3983_v25 = vand.u32 4294901760, %v3971_v21  ;;  %6503 = vst [vmem:[#allocation14_spill] sm:$0xff] %v3986_v26  ;;  %v3988_v27 = vld [vmem:[#allocation6 + $0x128] sm:$0xff]  ;;  %v3990_v28 = vld [vmem:[#allocation6 + $0x120] sm:$0xff]  ;;  %v3997_v31 = vand.u32 4294901760, %v3973_v22  ;;  %273 = vmatpush1.msra.mxu0 %v3953_v10  ;;  %v6254_v34 = vand.u32 4294901760, %v3980_v24  ;;  %v4022_v41 = vsub.f32 %v254_v9, %v3957_v12 }
  0x2f   :  { %v3992_v29 = vld [vmem:[#allocation6 + $0x108] sm:$0xff]  ;;  %v4003_v33 = vand.u32 4294901760, %v3988_v27  ;;  %v6252_v35 = vand.u32 4294901760, %v3986_v26  ;;  %v4012_v37 = vand.u32 4294901760, %v3990_v28  ;;  %v4014_v38 = vld [vmem:[#allocation6 + $0x100] sm:$0xff]  ;;  %275 = vmatprep.subr.mxu0 %v3955_v11  ;;  %v542_v39 = vsub.f32 %v3967_v19, %v6255_v30  ;;  %p3886_p5 = pnand %p3885_p4, %p3879_p1 }
  0x30   :  { %v6250_v40 = vand.u32 4294901760, %v4000_v32  ;;  %v4025_v42 = vand.u32 4294901760, %v3992_v29  ;;  %277 = vmatpush1.msra.mxu0 %v3957_v12  ;;  %v548_v43 = vsub.f32 %v3980_v24, %v6254_v34  ;;  %v6249_v45 = vand.u32 4294901760, %v4009_v36  ;;  %v4038_v47 = vld [vmem:[#allocation6 + $0xe8] sm:$0xff]  ;;  %v4048_v52 = vld [vmem:[#allocation6 + $0xe0] sm:$0xff] }
  0x31   :  { %6504 = vst [vmem:[#allocation15_spill] sm:$0xff] %v4012_v37  ;;  %v554_v44 = vsub.f32 %v3986_v26, %v6252_v35  ;;  %v4036_v46 = vsub.f32 %v251_v13, %v3960_v16  ;;  %279 = vmatprep.subr.mxu0 %v3960_v16  ;;  %v543_v48 = vand.u32 4294901760, %v542_v39  ;;  %v6247_v50 = vand.u32 4294901760, %v4022_v41  ;;  %v4055_v57 = vld [vmem:[#allocation6 + $0xc8] sm:$0xff]  ;;  %v4067_v62 = vld [vmem:[#allocation6 + $0xc0] sm:$0xff] }
  0x32   :  { %6505 = vst [vmem:[#allocation16_spill] sm:$0xff] %v4025_v42  ;;  %v560_v49 = vsub.f32 %v4000_v32, %v6250_v40  ;;  %v4046_v51 = vand.u32 4294901760, %v4014_v38  ;;  %281 = vmatpush1.msra.mxu0 %v3962_v17  ;;  %v549_v53 = vand.u32 4294901760, %v548_v43  ;;  %v566_v55 = vsub.f32 %v4009_v36, %v6249_v45  ;;  %v4079_v7 = vld [vmem:[#allocation6 + $0xa8] sm:$0xff]  ;;  %v4157_v45 = vld [vmem:[#allocation6 + $0x60] sm:$0xff] }
  0x33   :  { %v555_v54 = vand.u32 4294901760, %v554_v44  ;;  %v6245_v56 = vand.u32 4294901760, %v4036_v46  ;;  %283 = vmatprep.subr.mxu0 %v3964_v18  ;;  %544 = vmatprep.subr.mxu1 %v543_v48  ;;  %v572_v59 = vsub.f32 %v4022_v41, %v6247_v50  ;;  %v4062_v60 = vsub.f32 %v250_v14, %v3962_v17  ;;  %v4170_v35 = vld [vmem:[#allocation6 + $0x48] sm:$0xff]  ;;  %v4180_v34 = vld [vmem:[#allocation6 + $0x40] sm:$0xff] }
  0x34   :  { %6506 = vst [vmem:[#allocation17_spill] sm:$0xff] %v4046_v51  ;;  %v561_v58 = vand.u32 4294901760, %v560_v49  ;;  %v4065_v61 = vand.u32 4294901760, %v4038_v47  ;;  %285 = vmatpush1.msra.mxu0 %v3977_v23  ;;  %550 = vmatpush1.msra.mxu1 %v549_v53  ;;  %v567_v63 = vand.u32 4294901760, %v566_v55  ;;  %v4074_v2 = vsub.f32 %v247_v15, %v3964_v18  ;;  %v4090_v15 = vld [vmem:[#allocation6 + $0xa0] sm:$0xff] }
  0x35   :  { %v578_v1 = vsub.f32 %v4036_v46, %v6245_v56  ;;  %v4077_v3 = vand.u32 4294901760, %v4048_v52  ;;  %287 = vmatprep.subr.mxu0 %v3983_v25  ;;  %556 = vmatprep.subr.mxu1 %v555_v54  ;;  %v573_v8 = vand.u32 4294901760, %v572_v59  ;;  %v6244_v9 = vand.u32 4294901760, %v4062_v60 }
  0x36   :  { %6507 = vst [vmem:[#allocation18_spill] sm:$0xff] %v4065_v61  ;;  %v4085_v13 = vsub.f32 %v3969_v20, %v3977_v23  ;;  %v4088_v14 = vand.u32 4294901760, %v4055_v57  ;;  %289 = vmatpush1.msra.mxu0 %v3997_v31  ;;  %562 = vmatpush1.msra.mxu1 %v561_v58  ;;  %v6243_v43 = vand.u32 4294901760, %v4074_v2  ;;  %v4096_v44 = vsub.f32 %v3971_v21, %v3983_v25  ;;  %v4113_v21 = vld [vmem:[#allocation6 + $0x88] sm:$0xff] }
  0x37   :  { %6508 = vst [vmem:[#allocation19_spill] sm:$0xff] %v4077_v3  ;;  %v579_v39 = vand.u32 4294901760, %v578_v1  ;;  %v4099_v48 = vand.u32 4294901760, %v4067_v62  ;;  %291 = vmatprep.subr.mxu0 %v4003_v33  ;;  %568 = vmatprep.subr.mxu1 %v567_v63  ;;  %v584_v20 = vsub.f32 %v4062_v60, %v6244_v9  ;;  %v4108_v53 = vsub.f32 %v3973_v22, %v3997_v31  ;;  %v4136_v9 = vld [vmem:[#allocation6 + $0x80] sm:$0xff] }
  0x38   :  { %6509 = vst [vmem:[#allocation20_spill] sm:$0xff] %v4088_v14  ;;  %v6246_v49 = vand.u32 4294901760, %v4085_v13  ;;  %v4111_v54 = vand.u32 4294901760, %v4079_v7  ;;  %293 = vmatpush1.msra.mxu0 %v4012_v37  ;;  %574 = vmatpush1.msra.mxu1 %v573_v8  ;;  %v590_v55 = vsub.f32 %v4074_v2, %v6243_v43  ;;  %v6248_v58 = vand.u32 4294901760, %v4096_v44 }
  0x39   :  { %6510 = vst [vmem:[#allocation21_spill] sm:$0xff] %v4099_v48  ;;  %v4122_v59 = vsub.f32 %v3988_v27, %v4003_v33  ;;  %v4125_v22 = vand.u32 4294901760, %v4090_v15  ;;  %295 = vmatprep.subr.mxu0 %v4025_v42  ;;  %580 = vmatprep.subr.mxu1 %v579_v39  ;;  %v585_v63 = vand.u32 4294901760, %v584_v20  ;;  %v6251_v8 = vand.u32 4294901760, %v4108_v53 }
  0x3a   :  { %6511 = vst [vmem:[#allocation22_spill] sm:$0xff] %v4111_v54  ;;  %v596_v1 = vsub.f32 %v4085_v13, %v6246_v49  ;;  %v4134_v43 = vsub.f32 %v3990_v28, %v4012_v37  ;;  %297 = vmatpush1.msra.mxu0 %v4046_v51  ;;  %v591_v27 = vand.u32 4294901760, %v590_v55  ;;  %v602_v39 = vsub.f32 %v4096_v44, %v6248_v58  ;;  %v4146_v49 = vld [vmem:[#allocation6 + $0x68] sm:$0xff]  ;;  %v186_v37 = vld [vmem:[#allocation3] sm:$0xff] }
  0x3b   :  { %6512 = vst [vmem:[#allocation23_spill] sm:$0xff] %v4125_v22  ;;  %v6253_v20 = vand.u32 4294901760, %v4122_v59  ;;  %v4144_v56 = vand.u32 4294901760, %v4113_v21  ;;  %586 = vmatpush1.msra.mxu1 %v585_v63  ;;  %299 = vmatprep.subr.mxu0 %v4065_v61  ;;  %v608_v50 = vsub.f32 %v4108_v53, %v6251_v8  ;;  %v4155_v58 = vsub.f32 %v3992_v29, %v4025_v42 }
  0x3c   :  { %v597_v28 = vand.u32 4294901760, %v596_v1  ;;  %v6256_v55 = vand.u32 4294901760, %v4134_v43  ;;  %592 = vmatprep.subr.mxu1 %v591_v27  ;;  %301 = vmatpush1.msra.mxu0 %v4077_v3  ;;  %v603_v40 = vand.u32 4294901760, %v602_v39  ;;  %v4164_v1 = vand.u32 4294901760, %v4136_v9 }
  0x3d   :  { %6513 = vst [vmem:[#allocation24_spill] sm:$0xff] %v4144_v56  ;;  %v614_v63 = vsub.f32 %v4122_v59, %v6253_v20  ;;  %v4168_v8 = vsub.f32 %v4014_v38, %v4046_v51  ;;  %303 = vmatprep.subr.mxu0 %v4088_v14  ;;  %v609_v29 = vand.u32 4294901760, %v608_v50  ;;  %v6261_v39 = vand.u32 4294901760, %v4155_v58 }
  0x3e   :  { %6514 = vst [vmem:[#allocation25_spill] sm:$0xff] %v4164_v1  ;;  %598 = vmatpush1.msra.mxu1 %v597_v28  ;;  %v620_v27 = vsub.f32 %v4134_v43, %v6256_v55  ;;  %v4178_v20 = vand.u32 4294901760, %v4146_v49  ;;  %305 = vmatpush1.msra.mxu0 %v4099_v48  ;;  %v4186_v50 = vsub.f32 %v4038_v47, %v4065_v61  ;;  %v4189_v30 = vand.u32 4294901760, %v4157_v45  ;;  %v4191_v55 = vld [vmem:[#allocation6 + $0x28] sm:$0xff] }
  0x3f   :  { %6515 = vst [vmem:[#allocation26_spill] sm:$0xff] %v4168_v8  ;;  %604 = vmatprep.subr.mxu1 %v603_v40  ;;  %v615_v38 = vand.u32 4294901760, %v614_v63  ;;  %v6264_v28 = vand.u32 4294901760, %v4168_v8  ;;  %307 = vmatprep.subr.mxu0 %v4111_v54  ;;  %v626_v40 = vsub.f32 %v4155_v58, %v6261_v39  ;;  %v4199_v63 = vsub.f32 %v4048_v52, %v4077_v3  ;;  %v4216_v52 = vld [vmem:[#allocation6 + $0x20] sm:$0xff] }
  0x40   :  { %6516 = vst [vmem:[#allocation27_spill] sm:$0xff] %v4178_v20  ;;  %6517 = vst [vmem:[#allocation28_spill] sm:$0xff] %v4186_v50  ;;  %610 = vmatpush1.msra.mxu1 %v609_v29  ;;  %v621_v0 = vand.u32 4294901760, %v620_v27  ;;  %v4202_v47 = vand.u32 4294901760, %v4170_v35  ;;  %309 = vmatpush1.msra.mxu0 %v4125_v22  ;;  %v4211_v61 = vsub.f32 %v4055_v57, %v4088_v14  ;;  %v4214_v39 = vand.u32 4294901760, %v4180_v34  ;;  %v4227_v57 = vld [vmem:[#allocation6 + $0x8] sm:$0xff] }
  0x41   :  { %6518 = vst [vmem:[#allocation29_spill] sm:$0xff] %v4189_v30  ;;  %6519 = vst [vmem:[#allocation30_spill] sm:$0xff] %v4199_v63  ;;  %616 = vmatprep.subr.mxu1 %v615_v38  ;;  %v632_v29 = vsub.f32 %v4168_v8, %v6264_v28  ;;  %311 = vmatprep.subr.mxu0 %v4144_v56  ;;  %v627_v38 = vand.u32 4294901760, %v626_v40  ;;  %v4222_v28 = vsub.f32 %v4067_v62, %v4099_v48  ;;  %v4250_v40 = vld [vmem:[#allocation6] sm:$0xff] }
  0x42   :  { %6520 = vst [vmem:[#allocation31_spill] sm:$0xff] %v4202_v47  ;;  %6521 = vst [vmem:[#allocation32_spill] sm:$0xff] %v4211_v61  ;;  %622 = vmatpush1.msra.mxu1 %v621_v0  ;;  %v4225_v27 = vand.u32 4294901760, %v4191_v55  ;;  %313 = vmatpush1.msra.mxu0 %v4164_v1  ;;  %v6525_v51 = vand.u32 4294901760, %v4186_v50  ;;  %v4236_v3 = vsub.f32 %v4079_v7, %v4111_v54  ;;  %v6527_v62 = vand.u32 4294901760, %v4199_v63 }
  0x43   :  { %6522 = vst [vmem:[#allocation33_spill] sm:$0xff] %v4214_v39  ;;  %6523 = vst [vmem:[#allocation34_spill] sm:$0xff] %v4222_v28  ;;  %v633_v14 = vand.u32 4294901760, %v632_v29  ;;  %628 = vmatprep.subr.mxu1 %v627_v38  ;;  %315 = vmatprep.subr.mxu0 %v4178_v20  ;;  %v4244_v29 = vand.u32 4294901760, %v4216_v52  ;;  %v6529_v38 = vand.u32 4294901760, %v4211_v61  ;;  %v4258_v42 = vand.u32 4294901760, %v4227_v57 }
  0x44   :  { %6524 = vst [vmem:[#allocation35_spill] sm:$0xff] %v4225_v27  ;;  %v638_v0 = vsub.f32 %v4186_v50, %v6525_v51  ;;  %6526 = vst [vmem:[#allocation36_spill] sm:$0xff] %v4236_v3  ;;  %v644_v48 = vsub.f32 %v4199_v63, %v6527_v62  ;;  %v4248_v51 = vsub.f32 %v4090_v15, %v4125_v22  ;;  %317 = vmatpush1.msra.mxu0 %v4189_v30 }
  0x45   :  { %6528 = vst [vmem:[#allocation37_spill] sm:$0xff] %v4244_v29  ;;  %634 = vmatpush1.msra.mxu1 %v633_v14  ;;  %v650_v54 = vsub.f32 %v4211_v61, %v6529_v38  ;;  %v6285_v62 = vand.u32 4294901760, %v4236_v3  ;;  %6530 = vst [vmem:[#allocation38_spill] sm:$0xff] %v4258_v42  ;;  %319 = vmatprep.subr.mxu0 %v4202_v47  ;;  %v6531_v15 = vand.u32 4294901760, %v4222_v28  ;;  %v4274_v61 = vand.u32 4294901760, %v4250_v40 }
  0x46   :  { %v639_v7 = vand.u32 4294901760, %v638_v0  ;;  %v645_v63 = vand.u32 4294901760, %v644_v48  ;;  %v4267_v22 = vsub.f32 %v4113_v21, %v4144_v56  ;;  %321 = vmatpush1.msra.mxu0 %v4214_v39  ;;  %v6533_v21 = vand.u32 4294901760, %v4248_v51 }
  0x47   :  { %v656_v14 = vsub.f32 %v4222_v28, %v6531_v15  ;;  %v651_v38 = vand.u32 4294901760, %v650_v54  ;;  %v662_v48 = vsub.f32 %v4236_v3, %v6285_v62  ;;  %6532 = vst [vmem:[#allocation39_spill] sm:$0xff] %v4274_v61  ;;  %v4278_v15 = vsub.f32 %v4136_v9, %v4164_v1  ;;  %323 = vmatprep.subr.mxu0 %v4225_v27 }
  0x48   :  { %640 = vmatprep.subr.mxu1 %v639_v7  ;;  %v668_v54 = vsub.f32 %v4248_v51, %v6533_v21  ;;  %v6288_v7 = vand.u32 4294901760, %v4267_v22  ;;  %v4285_v56 = vand.u32 4294901760, %v186_v37  ;;  %325 = vmatpush1.msra.mxu0 %v4244_v29  ;;  %v4291_v9 = vsub.f32 %v4146_v49, %v4178_v20 }
  0x49   :  { %646 = vmatpush1.msra.mxu1 %v645_v63  ;;  %v657_v0 = vand.u32 4294901760, %v656_v14  ;;  %v663_v62 = vand.u32 4294901760, %v662_v48  ;;  %v6291_v3 = vand.u32 4294901760, %v4278_v15  ;;  %v4295_v63 = vsub.f32 %v4157_v45, %v4189_v30  ;;  %v187_v14 = vld [vmem:[#allocation3 + $0x8] sm:$0xff]  ;;  %327 = vmatprep.subr.mxu0 %v4258_v42 }
  0x4a   :  { %6534 = vst [vmem:[#allocation40_spill] sm:$0xff] %v4285_v56  ;;  %652 = vmatprep.subr.mxu1 %v651_v38  ;;  %v669_v21 = vand.u32 4294901760, %v668_v54  ;;  %v674_v38 = vsub.f32 %v4267_v22, %v6288_v7  ;;  %v4302_v48 = vsub.f32 %v186_v37, %v4285_v56  ;;  %v4306_v49 = vsub.f32 %v4170_v35, %v4202_v47 }
  0x4b   :  { %658 = vmatpush1.msra.mxu1 %v657_v0  ;;  %329 = vmatpush1.msra.mxu0 %v4274_v61  ;;  %v680_v45 = vsub.f32 %v4278_v15, %v6291_v3  ;;  %v6296_v0 = vand.u32 4294901760, %v4291_v9  ;;  %v4316_v7 = vsub.f32 %v4180_v34, %v4214_v39  ;;  %v4322_v47 = vand.u32 4294901760, %v187_v14 }
  0x4c   :  { %6535 = vst [vmem:[#allocation41_spill] sm:$0xff] %v4302_v48  ;;  %664 = vmatprep.subr.mxu1 %v663_v62  ;;  %v675_v37 = vand.u32 4294901760, %v674_v38  ;;  %v4319_v35 = vand.u32 4294901760, %v4302_v48  ;;  %v6302_v62 = vand.u32 4294901760, %v4306_v49  ;;  %878 = vmatprep.subr.mxu0 %v3967_v19  ;;  %v6538_v30 = vand.u32 4294901760, %v4295_v63 }
  0x4d   :  { %670 = vmatpush1.msra.mxu1 %v669_v21  ;;  %6537 = vst [vmem:[#allocation43_spill] sm:$0xff] %v4322_v47  ;;  %v681_v3 = vand.u32 4294901760, %v680_v45  ;;  %v686_v54 = vsub.f32 %v4291_v9, %v6296_v0  ;;  %v6307_v21 = vand.u32 4294901760, %v4316_v7  ;;  %v4338_v45 = vsub.f32 %v187_v14, %v4322_v47 }
  0x4e   :  { %6536 = vst [vmem:[#allocation42_spill] sm:$0xff] %v4319_v35  ;;  %v692_v34 = vsub.f32 %v4295_v63, %v6538_v30  ;;  %676 = vmatprep.subr.mxu1 %v675_v37  ;;  %v366_v38 = vsub.f32 %v4302_v48, %v4319_v35  ;;  %v698_v39 = vsub.f32 %v4306_v49, %v6302_v62  ;;  %v188_v48 = vld [vmem:[#allocation3 + $0x10] sm:$0xff]  ;;  %v189_v62 = vld [vmem:[#allocation3 + $0x18] sm:$0xff] }
  0x4f   :  { %6539 = vst [vmem:[#allocation44_spill] sm:$0xff] %v4338_v45  ;;  %v4342_v0 = vsub.f32 %v4191_v55, %v4225_v27  ;;  %682 = vmatpush1.msra.mxu1 %v681_v3  ;;  %v687_v19 = vand.u32 4294901760, %v686_v54  ;;  %v704_v37 = vsub.f32 %v4316_v7, %v6307_v21  ;;  %v4349_v35 = vsub.f32 %v4216_v52, %v4244_v29  ;;  %v190_v55 = vld [vmem:[#allocation3 + $0x20] sm:$0xff] }
  0x50   :  { %v693_v30 = vand.u32 4294901760, %v692_v34  ;;  %v4351_v20 = vand.u32 4294901760, %v366_v38  ;;  %v699_v14 = vand.u32 4294901760, %v698_v39  ;;  %v4354_v1 = vand.u32 4294901760, %v4338_v45 }
  0x51   :  { %v6313_v3 = vand.u32 4294901760, %v4342_v0  ;;  %688 = vmatprep.subr.mxu1 %v687_v19  ;;  %v705_v54 = vand.u32 4294901760, %v704_v37  ;;  %v6318_v34 = vand.u32 4294901760, %v4349_v35  ;;  %v4360_v21 = vsub.f32 %v4227_v57, %v4258_v42 }
  0x52   :  { %6540 = vst [vmem:[#allocation45_spill] sm:$0xff] %v4351_v20  ;;  %6541 = vst [vmem:[#allocation46_spill] sm:$0xff] %v4354_v1  ;;  %v4364_v52 = vsub.f32 %v4250_v40, %v4274_v61  ;;  %368 = vmatmul.mubr.f32.vlgmr.msra.gmra.mxu0 %v4351_v20  ;;  %694 = vmatpush1.msra.mxu1 %v693_v30  ;;  %v377_v39 = vsub.f32 %v4338_v45, %v4354_v1  ;;  %v4372_v38 = vand.u32 4294901760, %v188_v48  ;;  %v6545_v57 = vmov 0.0   ;;  %v191_v61 = vld [vmem:[#allocation3 + $0x28] sm:$0xff] }
  0x53   :  { %v710_v19 = vsub.f32 %v4342_v0, %v6313_v3  ;;  %v4374_v37 = vand.u32 4294901760, %v189_v62  ;;  %700 = vmatprep.subr.mxu1 %v699_v14  ;;  %373 = vmatprep.mubr.f32.mxu0 %v6545_v57  ;;  %v716_v40 = vsub.f32 %v4349_v35, %v6318_v34  ;;  %v6323_v30 = vand.u32 4294901760, %v4360_v21  ;;  %v192_v34 = vld [vmem:[#allocation3 + $0x30] sm:$0xff] }
  0x54   :  { %6542 = vst [vmem:[#allocation47_spill] sm:$0xff] %v4364_v52  ;;  %6543 = vst [vmem:[#allocation48_spill] sm:$0xff] %v4372_v38  ;;  %v4382_v1 = vand.u32 4294901760, %v190_v55  ;;  %706 = vmatpush1.msra.mxu1 %v705_v54  ;;  %v4384_v3 = vand.u32 4294901760, %v377_v39  ;;  %881 = vmatpush1.msra.mxu0 %v3980_v24  ;;  %v4388_v14 = vsub.f32 %v188_v48, %v4372_v38  ;;  %v6550_v27 = vand.u32 4294901760, %v4364_v52 }
  0x55   :  { %6544 = vst [vmem:[#allocation49_spill] sm:$0xff] %v4374_v37  ;;  %v711_v45 = vand.u32 4294901760, %v710_v19  ;;  %v4391_v42 = vsub.f32 %v189_v62, %v4374_v37  ;;  %v717_v29 = vand.u32 4294901760, %v716_v40  ;;  %v722_v20 = vsub.f32 %v4360_v21, %v6323_v30  ;;  %884 = vmatprep.subr.mxu0 %v3986_v26 }
  0x56   :  { %6546 = vst [vmem:[#allocation50_spill] sm:$0xff] %v4382_v1  ;;  %6547 = vst [vmem:[#allocation51_spill] sm:$0xff] %v4384_v3  ;;  %v728_v54 = vsub.f32 %v4364_v52, %v6550_v27  ;;  %v4401_v39 = vsub.f32 %v190_v55, %v4382_v1  ;;  %379 = vmatmul.mubr.f32.gmra.mxu0 %v4384_v3  ;;  %v4405_v48 = vand.u32 4294901760, %v4388_v14  ;;  %v4410_v19 = vand.u32 4294901760, %v191_v61 }
  0x57   :  { %6548 = vst [vmem:[#allocation52_spill] sm:$0xff] %v4388_v14  ;;  %6549 = vst [vmem:[#allocation53_spill] sm:$0xff] %v4391_v42  ;;  %712 = vmatprep.subr.mxu1 %v711_v45  ;;  %v4408_v62 = vand.u32 4294901760, %v4391_v42  ;;  %v723_v40 = vand.u32 4294901760, %v722_v20  ;;  %384 = vmatprep.mubr.f32.mxu0 %v6545_v57  ;;  %v4413_v30 = vand.u32 4294901760, %v192_v34  ;;  %v193_v20 = vld [vmem:[#allocation3 + $0x38] sm:$0xff] }
  0x58   :  { %6551 = vst [vmem:[#allocation54_spill] sm:$0xff] %v4401_v39  ;;  %6552 = vst [vmem:[#allocation55_spill] sm:$0xff] %v4405_v48  ;;  %718 = vmatpush1.msra.mxu1 %v717_v29  ;;  %v729_v27 = vand.u32 4294901760, %v728_v54  ;;  %v388_v55 = vsub.f32 %v4388_v14, %v4405_v48  ;;  %887 = vmatpush1.msra.mxu0 %v4000_v32  ;;  %v4421_v3 = vand.u32 4294901760, %v4401_v39  ;;  %v4432_v54 = vand.u32 4294901760, %v193_v20 }
  0x59   :  { %6553 = vst [vmem:[#allocation56_spill] sm:$0xff] %v4408_v62  ;;  %6554 = vst [vmem:[#allocation57_spill] sm:$0xff] %v4410_v19  ;;  %v399_v45 = vsub.f32 %v4391_v42, %v4408_v62  ;;  %v4424_v26 = vsub.f32 %v191_v61, %v4410_v19  ;;  %724 = vmatprep.subr.mxu1 %v723_v40  ;;  %890 = vmatprep.subr.mxu0 %v4009_v36 }
  0x5a   :  { %6555 = vst [vmem:[#allocation58_spill] sm:$0xff] %v4413_v30  ;;  %6556 = vst [vmem:[#allocation59_spill] sm:$0xff] %v4421_v3  ;;  %730 = vmatpush1.msra.mxu1 %v729_v27  ;;  %v4427_v29 = vand.u32 4294901760, %v388_v55  ;;  %893 = vmatpush1.msra.mxu0 %v4022_v41  ;;  %v410_v40 = vsub.f32 %v4401_v39, %v4421_v3  ;;  %v4444_v55 = vsub.f32 %v192_v34, %v4413_v30 }
  0x5b   :  { %6557 = vst [vmem:[#allocation60_spill] sm:$0xff] %v4424_v26  ;;  %765 = vmatmul.mubr.f32.vlgmr.msra.gmra.mxu1 %v4285_v56  ;;  %1134 = vmatprep.subr.mxu1 %v3947_v4  ;;  %6559 = vst [vmem:[#allocation62_spill] sm:$0xff] %v4432_v54  ;;  %v4436_v61 = vand.u32 4294901760, %v399_v45  ;;  %v4441_v27 = vand.u32 4294901760, %v4424_v26  ;;  %v194_v56 = vld [vmem:[#allocation3 + $0x40] sm:$0xff]  ;;  %v4453_v45 = vsub.f32 %v193_v20, %v4432_v54 }
  0x5c   :  { %6558 = vst [vmem:[#allocation61_spill] sm:$0xff] %v4427_v29  ;;  %390 = vmatmul.mubr.f32.gmra.mxu0 %v4427_v29  ;;  %1136 = vmatpush1.msra.mxu1 %v3949_v5  ;;  %6562 = vst [vmem:[#allocation65_spill] sm:$0xff] %v4444_v55  ;;  %v4457_v34 = vand.u32 4294901760, %v410_v40  ;;  %v4462_v3 = vand.u32 4294901760, %v4444_v55  ;;  %v4464_v62 = vand.u32 4294901760, %v194_v56 }
  0x5d   :  { %6560 = vst [vmem:[#allocation63_spill] sm:$0xff] %v4436_v61  ;;  %6561 = vst [vmem:[#allocation64_spill] sm:$0xff] %v4441_v27  ;;  %395 = vmatprep.mubr.f32.mxu0 %v6545_v57  ;;  %770 = vmatprep.mubr.f32.mxu1 %v6545_v57  ;;  %v421_v29 = vsub.f32 %v4424_v26, %v4441_v27  ;;  %v4481_v27 = vand.u32 4294901760, %v4453_v45 }
  0x5e   :  { %1138 = vmatprep.subr.mxu1 %v3951_v6  ;;  %896 = vmatprep.subr.mxu0 %v4036_v46  ;;  %6563 = vst [vmem:[#allocation66_spill] sm:$0xff] %v4453_v45  ;;  %6564 = vst [vmem:[#allocation67_spill] sm:$0xff] %v4457_v34  ;;  %v4484_v26 = vsub.f32 %v194_v56, %v4464_v62 }
  0x5f   :  { %772 = vmatmul.mubr.f32.gmra.mxu1 %v4322_v47  ;;  %899 = vmatpush1.msra.mxu0 %v4062_v60  ;;  %6565 = vst [vmem:[#allocation68_spill] sm:$0xff] %v4462_v3  ;;  %6566 = vst [vmem:[#allocation69_spill] sm:$0xff] %v4464_v62  ;;  %v195_v47 = vld [vmem:[#allocation3 + $0x48] sm:$0xff]  ;;  %v4476_v40 = vand.u32 4294901760, %v421_v29 }
  0x60   :  { %401 = vmatmul.mubr.f32.gmra.mxu0 %v4436_v61  ;;  %1140 = vmatpush1.msra.mxu1 %v3953_v10  ;;  %v4472_v20 = vand.u32 4294901760, %v195_v47  ;;  %v432_v61 = vsub.f32 %v4444_v55, %v4462_v3  ;;  %6569 = vst [vmem:[#allocation72_spill] sm:$0xff] %v4481_v27  ;;  %6570 = vst [vmem:[#allocation73_spill] sm:$0xff] %v4484_v26  ;;  %v4502_v3 = vand.u32 4294901760, %v4484_v26 }
  0x61   :  { %406 = vmatprep.mubr.f32.mxu0 %v6545_v57  ;;  %777 = vmatprep.mubr.f32.mxu1 %v6545_v57  ;;  %6568 = vst [vmem:[#allocation71_spill] sm:$0xff] %v4476_v40 }
  0x62   :  { %1142 = vmatprep.subr.mxu1 %v3955_v11  ;;  %902 = vmatprep.subr.mxu0 %v4074_v2  ;;  %6567 = vst [vmem:[#allocation70_spill] sm:$0xff] %v4472_v20  ;;  %v4493_v29 = vsub.f32 %v195_v47, %v4472_v20  ;;  %v4497_v56 = vand.u32 4294901760, %v432_v61  ;;  %6573 = vst [vmem:[#allocation76_spill] sm:$0xff] %v4502_v3 }
  0x63   :  { %779 = vmatmul.mubr.f32.gmra.mxu1 %v4372_v38  ;;  %905 = vmatpush1.msra.mxu0 %v4085_v13  ;;  %v196_v38 = vld [vmem:[#allocation3 + $0x50] sm:$0xff] }
  0x64   :  { %412 = vmatmul.mubr.f32.gmra.mxu0 %v4457_v34  ;;  %1144 = vmatpush1.msra.mxu1 %v3957_v12  ;;  %6571 = vst [vmem:[#allocation74_spill] sm:$0xff] %v4493_v29  ;;  %6572 = vst [vmem:[#allocation75_spill] sm:$0xff] %v4497_v56  ;;  %v443_v34 = vsub.f32 %v4453_v45, %v4481_v27  ;;  %v4504_v55 = vand.u32 4294901760, %v196_v38  ;;  %v4521_v27 = vand.u32 4294901760, %v4493_v29 }
  0x65   :  { %417 = vmatprep.mubr.f32.mxu0 %v6545_v57  ;;  %784 = vmatprep.mubr.f32.mxu1 %v6545_v57 }
  0x66   :  { %1146 = vmatprep.subr.mxu1 %v3960_v16  ;;  %908 = vmatprep.subr.mxu0 %v4096_v44  ;;  %6574 = vst [vmem:[#allocation77_spill] sm:$0xff] %v4504_v55  ;;  %v4516_v61 = vand.u32 4294901760, %v443_v34  ;;  %6577 = vst [vmem:[#allocation80_spill] sm:$0xff] %v4521_v27  ;;  %v4524_v45 = vsub.f32 %v196_v38, %v4504_v55 }
  0x67   :  { %786 = vmatmul.mubr.f32.gmra.mxu1 %v4374_v37  ;;  %911 = vmatpush1.msra.mxu0 %v4108_v53  ;;  %v197_v37 = vld [vmem:[#allocation3 + $0x58] sm:$0xff] }
  0x68   :  { %423 = vmatmul.mubr.f32.gmra.mxu0 %v4476_v40  ;;  %1148 = vmatpush1.msra.mxu1 %v3962_v17  ;;  %v4512_v47 = vand.u32 4294901760, %v197_v37  ;;  %6576 = vst [vmem:[#allocation79_spill] sm:$0xff] %v4516_v61  ;;  %v454_v40 = vsub.f32 %v4484_v26, %v4502_v3  ;;  %6578 = vst [vmem:[#allocation81_spill] sm:$0xff] %v4524_v45  ;;  %v4541_v3 = vand.u32 4294901760, %v4524_v45 }
  0x69   :  { %428 = vmatprep.mubr.f32.mxu0 %v6545_v57  ;;  %791 = vmatprep.mubr.f32.mxu1 %v6545_v57 }
  0x6a   :  { %1150 = vmatprep.subr.mxu1 %v3964_v18  ;;  %914 = vmatprep.subr.mxu0 %v4122_v59  ;;  %6575 = vst [vmem:[#allocation78_spill] sm:$0xff] %v4512_v47  ;;  %v4536_v38 = vand.u32 4294901760, %v454_v40  ;;  %6581 = vst [vmem:[#allocation84_spill] sm:$0xff] %v4541_v3  ;;  %v4544_v26 = vsub.f32 %v197_v37, %v4512_v47  ;;  %v6583_v40 = vld [vmem:[#allocation30_spill] sm:$0xff]  ;;  %v6585_v37 = vld [vmem:[#allocation15_spill] sm:$0xff] }
  0x6b   :  { %793 = vmatmul.mubr.f32.gmra.mxu1 %v4382_v1  ;;  %917 = vmatpush1.msra.mxu0 %v4134_v43  ;;  %v198_v1 = vld [vmem:[#allocation3 + $0x60] sm:$0xff] }
  0x6c   :  { %434 = vmatmul.mubr.f32.gmra.mxu0 %v4497_v56  ;;  %1152 = vmatpush1.msra.mxu1 %v3977_v23  ;;  %v4532_v34 = vand.u32 4294901760, %v198_v1  ;;  %6580 = vst [vmem:[#allocation83_spill] sm:$0xff] %v4536_v38  ;;  %v465_v56 = vsub.f32 %v4493_v29, %v4521_v27  ;;  %6582 = vst [vmem:[#allocation85_spill] sm:$0xff] %v4544_v26  ;;  %v476_v29 = vsub.f32 %v4524_v45, %v4541_v3  ;;  %v6592_v3 = vld [vmem:[#allocation17_spill] sm:$0xff] }
  0x6d   :  { %439 = vmatprep.mubr.f32.mxu0 %v6545_v57  ;;  %798 = vmatprep.mubr.f32.mxu1 %v6545_v57 }
  0x6e   :  { %1154 = vmatprep.subr.mxu1 %v3983_v25  ;;  %920 = vmatprep.subr.mxu0 %v4155_v58  ;;  %6579 = vst [vmem:[#allocation82_spill] sm:$0xff] %v4532_v34  ;;  %v4557_v27 = vand.u32 4294901760, %v465_v56  ;;  %v4576_v45 = vand.u32 4294901760, %v476_v29 }
  0x6f   :  { %800 = vmatmul.mubr.f32.gmra.mxu1 %v4410_v19  ;;  %923 = vmatpush1.msra.mxu0 %v4168_v8  ;;  %v199_v19 = vld [vmem:[#allocation3 + $0x68] sm:$0xff]  ;;  %v4562_v8 = vand.u32 4294901760, %v4544_v26 }
  0x70   :  { %445 = vmatmul.mubr.f32.gmra.mxu0 %v4516_v61  ;;  %1156 = vmatpush1.msra.mxu1 %v3997_v31  ;;  %v4553_v61 = vsub.f32 %v198_v1, %v4532_v34  ;;  %6586 = vst [vmem:[#allocation87_spill] sm:$0xff] %v4557_v27  ;;  %v6589_v1 = vld [vmem:[#allocation16_spill] sm:$0xff]  ;;  %6593 = vst [vmem:[#allocation90_spill] sm:$0xff] %v4576_v45 }
  0x71   :  { %450 = vmatprep.mubr.f32.mxu0 %v6545_v57  ;;  %805 = vmatprep.mubr.f32.mxu1 %v6545_v57  ;;  %6587 = vst [vmem:[#allocation88_spill] sm:$0xff] %v4562_v8 }
  0x72   :  { %1158 = vmatprep.subr.mxu1 %v4003_v33  ;;  %926 = vmatprep.subr.mxu0 %v4186_v50  ;;  %6584 = vst [vmem:[#allocation86_spill] sm:$0xff] %v4553_v61  ;;  %v4564_v50 = vand.u32 4294901760, %v199_v19 }
  0x73   :  { %807 = vmatmul.mubr.f32.gmra.mxu1 %v4413_v30  ;;  %929 = vmatpush1.msra.mxu0 %v6583_v40  ;;  %v200_v30 = vld [vmem:[#allocation3 + $0x70] sm:$0xff]  ;;  %v487_v40 = vsub.f32 %v4544_v26, %v4562_v8 }
  0x74   :  { %456 = vmatmul.mubr.f32.gmra.mxu0 %v4536_v38  ;;  %1160 = vmatpush1.msra.mxu1 %v6585_v37  ;;  %6588 = vst [vmem:[#allocation89_spill] sm:$0xff] %v4564_v50  ;;  %v6590_v38 = vld [vmem:[#allocation32_spill] sm:$0xff]  ;;  %v4572_v56 = vand.u32 4294901760, %v200_v30  ;;  %v4581_v37 = vand.u32 4294901760, %v4553_v61  ;;  %v6599_v8 = vld [vmem:[#allocation19_spill] sm:$0xff] }
  0x75   :  { %461 = vmatprep.mubr.f32.mxu0 %v6545_v57  ;;  %812 = vmatprep.mubr.f32.mxu1 %v6545_v57 }
  0x76   :  { %1162 = vmatprep.subr.mxu1 %v6589_v1  ;;  %932 = vmatprep.subr.mxu0 %v6590_v38  ;;  %6591 = vst [vmem:[#allocation16_spill] sm:$0xff] %v4572_v56  ;;  %6594 = vst [vmem:[#allocation91_spill] sm:$0xff] %v4581_v37  ;;  %v4584_v38 = vsub.f32 %v199_v19, %v4564_v50  ;;  %v4596_v19 = vand.u32 4294901760, %v487_v40  ;;  %v498_v26 = vsub.f32 %v4553_v61, %v4581_v37  ;;  %v6604_v40 = vld [vmem:[#allocation21_spill] sm:$0xff] }
  0x77   :  { %814 = vmatmul.mubr.f32.gmra.mxu1 %v4432_v54  ;;  %935 = vmatpush1.msra.mxu0 %v4222_v28  ;;  %v201_v54 = vld [vmem:[#allocation3 + $0x78] sm:$0xff]  ;;  %v6596_v28 = vld [vmem:[#allocation18_spill] sm:$0xff] }
  0x78   :  { %467 = vmatmul.mubr.f32.gmra.mxu0 %v4557_v27  ;;  %1164 = vmatpush1.msra.mxu1 %v6592_v3  ;;  %6595 = vst [vmem:[#allocation92_spill] sm:$0xff] %v4584_v38  ;;  %v6597_v27 = vld [vmem:[#allocation36_spill] sm:$0xff]  ;;  %v4592_v29 = vand.u32 4294901760, %v201_v54  ;;  %6600 = vst [vmem:[#allocation19_spill] sm:$0xff] %v4596_v19  ;;  %v4601_v3 = vand.u32 4294901760, %v4584_v38 }
  0x79   :  { %472 = vmatprep.mubr.f32.mxu0 %v6545_v57  ;;  %819 = vmatprep.mubr.f32.mxu1 %v6545_v57 }
  0x7a   :  { %1166 = vmatprep.subr.mxu1 %v6596_v28  ;;  %938 = vmatprep.subr.mxu0 %v6597_v27  ;;  %6598 = vst [vmem:[#allocation18_spill] sm:$0xff] %v4592_v29  ;;  %6601 = vst [vmem:[#allocation93_spill] sm:$0xff] %v4601_v3  ;;  %v4604_v27 = vsub.f32 %v200_v30, %v4572_v56  ;;  %v509_v30 = vsub.f32 %v4584_v38, %v4601_v3  ;;  %v6612_v38 = vld [vmem:[#allocation24_spill] sm:$0xff] }
  0x7b   :  { %821 = vmatmul.mubr.f32.gmra.mxu1 %v4464_v62  ;;  %941 = vmatpush1.msra.mxu0 %v4248_v51  ;;  %v6603_v62 = vld [vmem:[#allocation20_spill] sm:$0xff]  ;;  %v4622_v61 = vsub.f32 %v201_v54, %v4592_v29 }
  0x7c   :  { %478 = vmatmul.mubr.f32.gmra.mxu0 %v4576_v45  ;;  %1168 = vmatpush1.msra.mxu1 %v6599_v8  ;;  %6602 = vst [vmem:[#allocation94_spill] sm:$0xff] %v4604_v27  ;;  %v4614_v45 = vand.u32 4294901760, %v498_v26  ;;  %v4619_v37 = vand.u32 4294901760, %v4604_v27  ;;  %v6609_v26 = vld [vmem:[#allocation23_spill] sm:$0xff] }
  0x7d   :  { %483 = vmatprep.mubr.f32.mxu0 %v6545_v57  ;;  %826 = vmatprep.mubr.f32.mxu1 %v6545_v57  ;;  %6607 = vst [vmem:[#allocation95_spill] sm:$0xff] %v4622_v61  ;;  %v4637_v3 = vand.u32 4294901760, %v4622_v61 }
  0x7e   :  { %1170 = vmatprep.subr.mxu1 %v6603_v62  ;;  %944 = vmatprep.subr.mxu0 %v4267_v22  ;;  %6605 = vst [vmem:[#allocation20_spill] sm:$0xff] %v4614_v45  ;;  %6606 = vst [vmem:[#allocation21_spill] sm:$0xff] %v4619_v37  ;;  %v520_v54 = vsub.f32 %v4604_v27, %v4619_v37  ;;  %v6615_v37 = vld [vmem:[#allocation27_spill] sm:$0xff] }
  0x7f   :  { %828 = vmatmul.mubr.f32.gmra.mxu1 %v4472_v20  ;;  %947 = vmatpush1.msra.mxu0 %v4278_v15  ;;  %v6608_v20 = vld [vmem:[#allocation22_spill] sm:$0xff]  ;;  %6611 = vst [vmem:[#allocation23_spill] sm:$0xff] %v4637_v3 }
  0x80   :  { %489 = vmatmul.mubr.f32.gmra.mxu0 %v4596_v19  ;;  %1172 = vmatpush1.msra.mxu1 %v6604_v40  ;;  %v4632_v19 = vand.u32 4294901760, %v509_v30  ;;  %v6613_v30 = vld [vmem:[#allocation25_spill] sm:$0xff] }
  0x81   :  { %494 = vmatprep.mubr.f32.mxu0 %v6545_v57  ;;  %833 = vmatprep.mubr.f32.mxu1 %v6545_v57 }
  0x82   :  { %1174 = vmatprep.subr.mxu1 %v6608_v20  ;;  %950 = vmatprep.subr.mxu0 %v4291_v9  ;;  %6610 = vst [vmem:[#allocation22_spill] sm:$0xff] %v4632_v19 }
  0x83   :  { %835 = vmatmul.mubr.f32.gmra.mxu1 %v4504_v55  ;;  %953 = vmatpush1.msra.mxu0 %v4295_v63  ;;  %v531_v55 = vsub.f32 %v4622_v61, %v4637_v3  ;;  %v6623_v61 = vld [vmem:[#allocation41_spill] sm:$0xff] }
  0x84   :  { %500 = vmatmul.mubr.f32.gmra.mxu0 %v4614_v45  ;;  %1176 = vmatpush1.msra.mxu1 %v6609_v26  ;;  %v4647_v45 = vand.u32 4294901760, %v520_v54 }
  0x85   :  { %505 = vmatprep.mubr.f32.mxu0 %v6545_v57  ;;  %840 = vmatprep.mubr.f32.mxu1 %v6545_v57  ;;  %v4659_v54 = vand.u32 4294901760, %v531_v55  ;;  %v6620_v55 = vld [vmem:[#allocation35_spill] sm:$0xff] }
  0x86   :  { %1178 = vmatprep.subr.mxu1 %v6612_v38  ;;  %956 = vmatprep.subr.mxu0 %v4306_v49  ;;  %6614 = vst [vmem:[#allocation24_spill] sm:$0xff] %v4647_v45 }
  0x87   :  { %842 = vmatmul.mubr.f32.gmra.mxu1 %v4512_v47  ;;  %959 = vmatpush1.msra.mxu0 %v4316_v7  ;;  %6617 = vst [vmem:[#allocation25_spill] sm:$0xff] %v4659_v54  ;;  %v6618_v47 = vld [vmem:[#allocation31_spill] sm:$0xff] }
  0x88   :  { %511 = vmatmul.mubr.f32.gmra.mxu0 %v4632_v19  ;;  %1180 = vmatpush1.msra.mxu1 %v6613_v30  ;;  %v6616_v19 = vld [vmem:[#allocation29_spill] sm:$0xff] }
  0x89   :  { %516 = vmatprep.mubr.f32.mxu0 %v6545_v57  ;;  %847 = vmatprep.mubr.f32.mxu1 %v6545_v57 }
  0x8a   :  { %1182 = vmatprep.subr.mxu1 %v6615_v37  ;;  %962 = vmatprep.subr.mxu0 %v4342_v0 }
  0x8b   :  { %849 = vmatmul.mubr.f32.gmra.mxu1 %v4532_v34  ;;  %965 = vmatpush1.msra.mxu0 %v4349_v35  ;;  %v6619_v34 = vld [vmem:[#allocation33_spill] sm:$0xff] }
  0x8c   :  { %522 = vmatmul.mubr.f32.gmra.mxu0 %v4647_v45  ;;  %1184 = vmatpush1.msra.mxu1 %v6616_v19  ;;  %v6621_v45 = vld [vmem:[#allocation13_spill] sm:$0xff] }
  0x8d   :  { %527 = vmatprep.mubr.f32.mxu0 %v6545_v57  ;;  %854 = vmatprep.mubr.f32.mxu1 %v6545_v57  ;;  %v6622_v3 = vand.u32 4294901760, %v6621_v45 }
  0x8e   :  { %1186 = vmatprep.subr.mxu1 %v6618_v47  ;;  %968 = vmatprep.subr.mxu0 %v4360_v21 }
  0x8f   :  { %856 = vmatmul.mubr.f32.gmra.mxu1 %v4564_v50  ;;  %971 = vmatpush1.msra.mxu0 %v4364_v52  ;;  %v6624_v50 = vld [vmem:[#allocation37_spill] sm:$0xff]  ;;  %v6626_v52 = vand.u32 4294901760, %v3980_v24  ;;  %v6632_v24 = vld [vmem:[#allocation42_spill] sm:$0xff] }
  0x90   :  { %533 = vmatmul.mubr.f32.gmra.mxu0 %v4659_v54  ;;  %1188 = vmatpush1.msra.mxu1 %v6619_v34  ;;  %v6625_v54 = vld [vmem:[#allocation38_spill] sm:$0xff] }
  0x91   :  { %861 = vmatprep.mubr.f32.mxu1 %v6545_v57  ;;  %1004 = vmatprep.mubr.f32.mxu0 %v6545_v57 }
  0x92   :  { %1190 = vmatprep.subr.mxu1 %v6620_v55  ;;  %1377 = vmatprep.subr.mxu0 %v6622_v3  ;;  %v6627_v55 = vld [vmem:[#allocation14_spill] sm:$0xff]  ;;  %v6629_v3 = vld [vmem:[#allocation44_spill] sm:$0xff] }
  0x93   :  { %863 = vmatmul.mubr.f32.gmra.mxu1 %v4572_v56  ;;  %v6628_v45 = vand.u32 4294901760, %v6627_v55  ;;  %v6630_v56 = vld [vmem:[#allocation39_spill] sm:$0xff]  ;;  %v6660_v55 = vld [vmem:[#allocation72_spill] sm:$0xff] }
  0x94   :  { %1007 = vmatmul.mubr.f32.vlgmr.msra.gmra.mxu0 %v6623_v61  ;;  %1192 = vmatpush1.msra.mxu1 %v6624_v50  ;;  %v6631_v61 = vand.u32 4294901760, %v4000_v32  ;;  %v6635_v32 = vld [vmem:[#allocation46_spill] sm:$0xff] }
  0x95   :  { %868 = vmatprep.mubr.f32.mxu1 %v6545_v57  ;;  %1012 = vmatprep.mubr.f32.mxu0 %v6545_v57 }
  0x96   :  { %1194 = vmatprep.subr.mxu1 %v6625_v54  ;;  %1381 = vmatpush1.msra.mxu0 %v6626_v52  ;;  %v6633_v52 = vand.u32 4294901760, %v4009_v36  ;;  %v6641_v36 = vand.u32 4294901760, %v4096_v44  ;;  %v6654_v44 = vld [vmem:[#allocation28_spill] sm:$0xff] }
  0x97   :  { %870 = vmatmul.mubr.f32.gmra.mxu1 %v4592_v29  ;;  %1385 = vmatprep.subr.mxu0 %v6628_v45  ;;  %v6661_v45 = vld [vmem:[#allocation32_spill] sm:$0xff] }
  0x98   :  { %1015 = vmatmul.mubr.f32.gmra.mxu0 %v6629_v3  ;;  %1196 = vmatpush1.msra.mxu1 %v6630_v56 }
  0x99   :  { %1020 = vmatprep.mubr.f32.mxu0 %v6545_v57  ;;  %1229 = vmatprep.mubr.f32.mxu1 %v6545_v57 }
  0x9a   :  { %1648 = vmatprep.subr.mxu1 %v3947_v4  ;;  %1389 = vmatpush1.msra.mxu0 %v6631_v61  ;;  %v6634_v4 = vand.u32 4294901760, %v4022_v41  ;;  %v6636_v61 = vand.u32 4294901760, %v4036_v46  ;;  %v6642_v41 = vld [vmem:[#allocation60_spill] sm:$0xff]  ;;  %v6645_v46 = vand.u32 4294901760, %v4122_v59  ;;  %v6657_v59 = vld [vmem:[#allocation15_spill] sm:$0xff] }
  0x9b   :  { %1233 = vmatmul.mubr.f32.vlgmr.msra.gmra.mxu1 %v6632_v24  ;;  %1393 = vmatprep.subr.mxu0 %v6633_v52  ;;  %v6662_v52 = vand.u32 4294901760, %v6661_v45  ;;  %v257_v45 = vld [vmem:[#allocation6 + $0x1b8] sm:$0xff] }
  0x9c   :  { %1023 = vmatmul.mubr.f32.gmra.mxu0 %v4388_v14  ;;  %1650 = vmatpush1.msra.mxu1 %v3949_v5  ;;  %v6637_v5 = vand.u32 4294901760, %v4062_v60  ;;  %v6646_v60 = vld [vmem:[#allocation65_spill] sm:$0xff]  ;;  %v221_v14 = vld [vmem:[#allocation6 + $0x98] sm:$0xff] }
  0x9d   :  { %1028 = vmatprep.mubr.f32.mxu0 %v6545_v57  ;;  %1238 = vmatprep.mubr.f32.mxu1 %v6545_v57 }
  0x9e   :  { %1652 = vmatprep.subr.mxu1 %v3951_v6  ;;  %1397 = vmatpush1.msra.mxu0 %v6634_v4  ;;  %v6638_v6 = vand.u32 4294901760, %v4074_v2  ;;  %v6649_v2 = vand.u32 4294901760, %v4155_v58  ;;  %v6656_v58 = vld [vmem:[#allocation73_spill] sm:$0xff]  ;;  %v6663_v4 = vld [vmem:[#allocation74_spill] sm:$0xff] }
  0x9f   :  { %1242 = vmatmul.mubr.f32.gmra.mxu1 %v6635_v32  ;;  %1401 = vmatprep.subr.mxu0 %v6636_v61  ;;  %v6664_v61 = vld [vmem:[#allocation17_spill] sm:$0xff]  ;;  %v224_v32 = vld [vmem:[#allocation6 + $0xb0] sm:$0xff] }
  0xa0   :  { %1031 = vmatmul.mubr.f32.gmra.mxu0 %v4391_v42  ;;  %1654 = vmatpush1.msra.mxu1 %v3953_v10  ;;  %v6639_v10 = vand.u32 4294901760, %v4085_v13  ;;  %v6650_v13 = vld [vmem:[#allocation66_spill] sm:$0xff]  ;;  %v5048_v3 = vand.u32 4294901760, %v224_v32 }
  0xa1   :  { %1036 = vmatprep.mubr.f32.mxu0 %v6545_v57  ;;  %1247 = vmatprep.mubr.f32.mxu1 %v6545_v57 }
  0xa2   :  { %1656 = vmatprep.subr.mxu1 %v3955_v11  ;;  %1405 = vmatpush1.msra.mxu0 %v6637_v5  ;;  %v6640_v11 = vld [vmem:[#allocation56_spill] sm:$0xff]  ;;  %v6665_v5 = vld [vmem:[#allocation34_spill] sm:$0xff]  ;;  %6729 = vst [vmem:[#allocation17_spill] sm:$0xff] %v5048_v3 }
  0xa3   :  { %1251 = vmatmul.mubr.f32.gmra.mxu1 %v4405_v48  ;;  %1409 = vmatprep.subr.mxu0 %v6638_v6  ;;  %v6667_v6 = vld [vmem:[#allocation76_spill] sm:$0xff] }
  0xa4   :  { %1039 = vmatmul.mubr.f32.gmra.mxu0 %v4401_v39  ;;  %1658 = vmatpush1.msra.mxu1 %v3957_v12  ;;  %v6643_v12 = vand.u32 4294901760, %v4108_v53  ;;  %v6655_v53 = vand.u32 4294901760, %v6654_v44  ;;  %v6681_v44 = vand.u32 4294901760, %v4306_v49  ;;  %v225_v39 = vld [vmem:[#allocation6 + $0xb8] sm:$0xff] }
  0xa5   :  { %1044 = vmatprep.mubr.f32.mxu0 %v6545_v57  ;;  %1256 = vmatprep.mubr.f32.mxu1 %v6545_v57 }
  0xa6   :  { %1660 = vmatprep.subr.mxu1 %v3960_v16  ;;  %1413 = vmatpush1.msra.mxu0 %v6639_v10  ;;  %v6644_v16 = vld [vmem:[#allocation59_spill] sm:$0xff]  ;;  %v6668_v10 = vld [vmem:[#allocation36_spill] sm:$0xff] }
  0xa7   :  { %1260 = vmatmul.mubr.f32.gmra.mxu1 %v6640_v11  ;;  %1417 = vmatprep.subr.mxu0 %v6641_v36  ;;  %v6669_v36 = vand.u32 4294901760, %v6668_v10 }
  0xa8   :  { %1047 = vmatmul.mubr.f32.gmra.mxu0 %v6642_v41  ;;  %1662 = vmatpush1.msra.mxu1 %v3962_v17  ;;  %v6647_v17 = vand.u32 4294901760, %v4134_v43  ;;  %v6653_v43 = vld [vmem:[#allocation68_spill] sm:$0xff]  ;;  %v228_v41 = vld [vmem:[#allocation6 + $0xd0] sm:$0xff] }
  0xa9   :  { %1052 = vmatprep.mubr.f32.mxu0 %v6545_v57  ;;  %1265 = vmatprep.mubr.f32.mxu1 %v6545_v57  ;;  %v5024_v48 = vand.u32 4294901760, %v228_v41 }
  0xaa   :  { %1664 = vmatprep.subr.mxu1 %v3964_v18  ;;  %1421 = vmatpush1.msra.mxu0 %v6643_v12  ;;  %v6648_v18 = vld [vmem:[#allocation64_spill] sm:$0xff]  ;;  %v6670_v12 = vld [vmem:[#allocation81_spill] sm:$0xff] }
  0xab   :  { %1269 = vmatmul.mubr.f32.gmra.mxu1 %v6644_v16  ;;  %1425 = vmatprep.subr.mxu0 %v6645_v46  ;;  %v6672_v46 = vld [vmem:[#allocation80_spill] sm:$0xff]  ;;  %6722 = vst [vmem:[#allocation28_spill] sm:$0xff] %v5024_v48 }
  0xac   :  { %1055 = vmatmul.mubr.f32.gmra.mxu0 %v6646_v60  ;;  %1666 = vmatpush1.msra.mxu1 %v3977_v23  ;;  %v6651_v23 = vld [vmem:[#allocation26_spill] sm:$0xff] }
  0xad   :  { %1060 = vmatprep.mubr.f32.mxu0 %v6545_v57  ;;  %1274 = vmatprep.mubr.f32.mxu1 %v6545_v57 }
  0xae   :  { %1668 = vmatprep.subr.mxu1 %v3983_v25  ;;  %1429 = vmatpush1.msra.mxu0 %v6647_v17  ;;  %v6652_v25 = vand.u32 4294901760, %v6651_v23  ;;  %v6673_v17 = vand.u32 4294901760, %v4267_v22  ;;  %v265_v22 = vld [vmem:[#allocation6 + $0x1f8] sm:$0xff]  ;;  %v6678_v23 = vld [vmem:[#allocation86_spill] sm:$0xff] }
  0xaf   :  { %1278 = vmatmul.mubr.f32.gmra.mxu1 %v6648_v18  ;;  %1433 = vmatprep.subr.mxu0 %v6649_v2  ;;  %v6674_v2 = vld [vmem:[#allocation85_spill] sm:$0xff] }
  0xb0   :  { %1063 = vmatmul.mubr.f32.gmra.mxu0 %v6650_v13  ;;  %1670 = vmatpush1.msra.mxu1 %v3997_v31  ;;  %v6658_v31 = vld [vmem:[#allocation30_spill] sm:$0xff]  ;;  %v229_v13 = vld [vmem:[#allocation6 + $0xd8] sm:$0xff] }
  0xb1   :  { %1068 = vmatprep.mubr.f32.mxu0 %v6545_v57  ;;  %1283 = vmatprep.mubr.f32.mxu1 %v6545_v57 }
  0xb2   :  { %1672 = vmatprep.subr.mxu1 %v4003_v33  ;;  %1437 = vmatpush1.msra.mxu0 %v6652_v25  ;;  %v6659_v33 = vand.u32 4294901760, %v6658_v31  ;;  %v261_v25 = vld [vmem:[#allocation6 + $0x1d8] sm:$0xff] }
  0xb3   :  { %1287 = vmatmul.mubr.f32.gmra.mxu1 %v6653_v43  ;;  %1441 = vmatprep.subr.mxu0 %v6655_v53  ;;  %v6682_v53 = vld [vmem:[#allocation92_spill] sm:$0xff]  ;;  %v6684_v31 = vld [vmem:[#allocation91_spill] sm:$0xff] }
  0xb4   :  { %1071 = vmatmul.mubr.f32.gmra.mxu0 %v6656_v58  ;;  %1674 = vmatpush1.msra.mxu1 %v6657_v59  ;;  %v260_v59 = vld [vmem:[#allocation6 + $0x1d0] sm:$0xff] }
  0xb5   :  { %1076 = vmatprep.mubr.f32.mxu0 %v6545_v57  ;;  %1292 = vmatprep.mubr.f32.mxu1 %v6545_v57  ;;  %v232_v58 = vld [vmem:[#allocation6 + $0xf0] sm:$0xff] }
  0xb6   :  { %1676 = vmatprep.subr.mxu1 %v6589_v1  ;;  %1445 = vmatpush1.msra.mxu0 %v6659_v33  ;;  %v6666_v1 = vand.u32 4294901760, %v6665_v5  ;;  %v4824_v33 = vand.u32 4294901760, %v260_v59  ;;  %v4840_v5 = vand.u32 4294901760, %v257_v45  ;;  %v5000_v60 = vand.u32 4294901760, %v232_v58 }
  0xb7   :  { %1296 = vmatmul.mubr.f32.gmra.mxu1 %v6660_v55  ;;  %1449 = vmatprep.subr.mxu0 %v6662_v52  ;;  %v256_v52 = vld [vmem:[#allocation6 + $0x1b0] sm:$0xff] }
  0xb8   :  { %1079 = vmatmul.mubr.f32.gmra.mxu0 %v6663_v4  ;;  %1678 = vmatpush1.msra.mxu1 %v6664_v61  ;;  %v4846_v10 = vsub.f32 %v260_v59, %v4824_v33  ;;  %v249_v59 = vld [vmem:[#allocation6 + $0x178] sm:$0xff]  ;;  %6715 = vst [vmem:[#allocation38_spill] sm:$0xff] %v5000_v60 }
  0xb9   :  { %1084 = vmatprep.mubr.f32.mxu0 %v6545_v57  ;;  %1301 = vmatprep.mubr.f32.mxu1 %v6545_v57 }
  0xba   :  { %1680 = vmatprep.subr.mxu1 %v6596_v28  ;;  %1453 = vmatpush1.msra.mxu0 %v6666_v1  ;;  %v6671_v28 = vand.u32 4294901760, %v4248_v51  ;;  %v6676_v51 = vld [vmem:[#allocation84_spill] sm:$0xff]  ;;  %v6688_v1 = vand.u32 4294901760, %v4360_v21 }
  0xbb   :  { %1305 = vmatmul.mubr.f32.gmra.mxu1 %v6667_v6  ;;  %1457 = vmatprep.subr.mxu0 %v6669_v36  ;;  %v253_v36 = vld [vmem:[#allocation6 + $0x198] sm:$0xff] }
  0xbc   :  { %1087 = vmatmul.mubr.f32.gmra.mxu0 %v6670_v12  ;;  %1682 = vmatpush1.msra.mxu1 %v6599_v8  ;;  %v6675_v8 = vand.u32 4294901760, %v4278_v15  ;;  %v6679_v15 = vand.u32 4294901760, %v4295_v63  ;;  %v4813_v63 = vand.u32 4294901760, %v261_v25  ;;  %v236_v12 = vld [vmem:[#allocation6 + $0x110] sm:$0xff]  ;;  %v233_v6 = vld [vmem:[#allocation6 + $0xf8] sm:$0xff] }
  0xbd   :  { %1092 = vmatprep.mubr.f32.mxu0 %v6545_v57  ;;  %1310 = vmatprep.mubr.f32.mxu1 %v6545_v57  ;;  %v4976_v55 = vand.u32 4294901760, %v236_v12 }
  0xbe   :  { %1684 = vmatprep.subr.mxu1 %v6603_v62  ;;  %1461 = vmatpush1.msra.mxu0 %v6671_v28  ;;  %v6677_v62 = vand.u32 4294901760, %v4291_v9  ;;  %v6680_v9 = vld [vmem:[#allocation88_spill] sm:$0xff]  ;;  %v6689_v28 = vld [vmem:[#allocation95_spill] sm:$0xff] }
  0xbf   :  { %1314 = vmatmul.mubr.f32.gmra.mxu1 %v6672_v46  ;;  %1465 = vmatprep.subr.mxu0 %v6673_v17  ;;  %v6690_v17 = vld [vmem:[#allocation47_spill] sm:$0xff]  ;;  %6709 = vst [vmem:[#allocation33_spill] sm:$0xff] %v4976_v55 }
  0xc0   :  { %1095 = vmatmul.mubr.f32.gmra.mxu0 %v6674_v2  ;;  %1686 = vmatpush1.msra.mxu1 %v6604_v40  ;;  %v264_v40 = vld [vmem:[#allocation6 + $0x1f0] sm:$0xff] }
  0xc1   :  { %1100 = vmatprep.mubr.f32.mxu0 %v6545_v57  ;;  %1319 = vmatprep.mubr.f32.mxu1 %v6545_v57 }
  0xc2   :  { %1688 = vmatprep.subr.mxu1 %v6608_v20  ;;  %1469 = vmatpush1.msra.mxu0 %v6675_v8  ;;  %v4802_v20 = vand.u32 4294901760, %v265_v22  ;;  %v6691_v8 = vand.u32 4294901760, %v6690_v17  ;;  %v248_v17 = vld [vmem:[#allocation6 + $0x170] sm:$0xff] }
  0xc3   :  { %1323 = vmatmul.mubr.f32.gmra.mxu1 %v6676_v51  ;;  %1473 = vmatprep.subr.mxu0 %v6677_v62  ;;  %v252_v62 = vld [vmem:[#allocation6 + $0x190] sm:$0xff]  ;;  %v237_v51 = vld [vmem:[#allocation6 + $0x118] sm:$0xff] }
  0xc4   :  { %1103 = vmatmul.mubr.f32.gmra.mxu0 %v6678_v23  ;;  %1690 = vmatpush1.msra.mxu1 %v6609_v26  ;;  %v4809_v26 = vand.u32 4294901760, %v264_v40  ;;  %v4819_v49 = vsub.f32 %v265_v22, %v4802_v20  ;;  %v6692_v22 = vld [vmem:[#allocation35_spill] sm:$0xff] }
  0xc5   :  { %1108 = vmatprep.mubr.f32.mxu0 %v6545_v57  ;;  %1328 = vmatprep.mubr.f32.mxu1 %v6545_v57 }
  0xc6   :  { %1692 = vmatprep.subr.mxu1 %v6612_v38  ;;  %1477 = vmatpush1.msra.mxu0 %v6679_v15  ;;  %v6683_v38 = vand.u32 4294901760, %v4316_v7  ;;  %v4834_v7 = vsub.f32 %v261_v25, %v4813_v63  ;;  %v6422_v61 = vand.u32 4294901760, %v4819_v49  ;;  %v4865_v15 = vand.u32 4294901760, %v253_v36  ;;  %v6693_v25 = vld [vmem:[#allocation21_spill] sm:$0xff] }
  0xc7   :  { %1332 = vmatmul.mubr.f32.gmra.mxu1 %v6680_v9  ;;  %1481 = vmatprep.subr.mxu0 %v6681_v44  ;;  %v6423_v44 = vand.u32 4294901760, %v4846_v10 }
  0xc8   :  { %1111 = vmatmul.mubr.f32.gmra.mxu0 %v6682_v53  ;;  %1694 = vmatpush1.msra.mxu1 %v6613_v30  ;;  %v6685_v30 = vand.u32 4294901760, %v4342_v0  ;;  %v6686_v0 = vand.u32 4294901760, %v4349_v35  ;;  %v6421_v21 = vand.u32 4294901760, %v4834_v7  ;;  %v240_v53 = vld [vmem:[#allocation6 + $0x130] sm:$0xff] }
  0xc9   :  { %1116 = vmatprep.mubr.f32.mxu0 %v6545_v57  ;;  %1337 = vmatprep.mubr.f32.mxu1 %v6545_v57  ;;  %v4944_v23 = vand.u32 4294901760, %v240_v53 }
  0xca   :  { %1696 = vmatprep.subr.mxu1 %v6615_v37  ;;  %1485 = vmatpush1.msra.mxu0 %v6683_v38  ;;  %v4829_v37 = vsub.f32 %v264_v40, %v4809_v26  ;;  %v4863_v40 = vsub.f32 %v257_v45, %v4840_v5  ;;  %v6694_v38 = vld [vmem:[#allocation40_spill] sm:$0xff] }
  0xcb   :  { %1341 = vmatmul.mubr.f32.gmra.mxu1 %v6684_v31  ;;  %1489 = vmatprep.subr.mxu0 %v6685_v30  ;;  %6702 = vst [vmem:[#allocation29_spill] sm:$0xff] %v4944_v23 }
  0xcc   :  { %1119 = vmatmul.mubr.f32.gmra.mxu0 %v4604_v27  ;;  %1698 = vmatpush1.msra.mxu1 %v6616_v19  ;;  %v6687_v19 = vld [vmem:[#allocation93_spill] sm:$0xff]  ;;  %v6420_v35 = vand.u32 4294901760, %v4829_v37 }
  0xcd   :  { %1124 = vmatprep.mubr.f32.mxu0 %v6545_v57  ;;  %1346 = vmatprep.mubr.f32.mxu1 %v6545_v57 }
  0xce   :  { %1700 = vmatprep.subr.mxu1 %v6618_v47  ;;  %1493 = vmatpush1.msra.mxu0 %v6686_v0  ;;  %v4851_v47 = vand.u32 4294901760, %v256_v52  ;;  %v2138_v30 = vsub.f32 %v4829_v37, %v6420_v35  ;;  %v4878_v0 = vand.u32 4294901760, %v252_v62  ;;  %v6695_v35 = vld [vmem:[#allocation23_spill] sm:$0xff] }
  0xcf   :  { %1350 = vmatmul.mubr.f32.gmra.mxu1 %v6687_v19  ;;  %1497 = vmatprep.subr.mxu0 %v6688_v1  ;;  %v2144_v1 = vsub.f32 %v4834_v7, %v6421_v21  ;;  %v2150_v21 = vsub.f32 %v4846_v10, %v6423_v44  ;;  %v6697_v44 = vand.u32 4294901760, %v4863_v40  ;;  %v241_v19 = vld [vmem:[#allocation6 + $0x138] sm:$0xff] }
  0xd0   :  { %1127 = vmatmul.mubr.f32.gmra.mxu0 %v6689_v28  ;;  %1702 = vmatpush1.msra.mxu1 %v6619_v34  ;;  %v2132_v34 = vsub.f32 %v4819_v49, %v6422_v61  ;;  %v4876_v45 = vsub.f32 %v256_v52, %v4851_v47  ;;  %v4889_v52 = vsub.f32 %v253_v36, %v4865_v15  ;;  %v245_v61 = vld [vmem:[#allocation6 + $0x158] sm:$0xff]  ;;  %v244_v28 = vld [vmem:[#allocation6 + $0x150] sm:$0xff] }
  0xd1   :  { %1355 = vmatprep.mubr.f32.mxu1 %v6545_v57  ;;  %1501 = vmatpush1.msra.mxu0 %v6691_v8  ;;  %v4902_v36 = vsub.f32 %v252_v62, %v4878_v0  ;;  %v4916_v8 = vand.u32 4294901760, %v245_v61  ;;  %v2151_v27 = vand.u32 4294901760, %v2150_v21  ;;  %v4928_v31 = vand.u32 4294901760, %v244_v28 }
  0xd2   :  { %1534 = vmatprep.mubr.f32.mxu0 %v6545_v57  ;;  %1704 = vmatprep.subr.mxu1 %v6692_v22  ;;  %v4891_v22 = vand.u32 4294901760, %v249_v59  ;;  %v4932_v21 = vand.u32 4294901760, %v241_v19 }
  0xd3   :  { %1359 = vmatmul.mubr.f32.gmra.mxu1 %v6693_v25  ;;  %1857 = vmatprep.subr.mxu0 %v4802_v20  ;;  %v4904_v25 = vand.u32 4294901760, %v248_v17  ;;  %v4940_v9 = vsub.f32 %v245_v61, %v4916_v8  ;;  %v6704_v2 = vand.u32 4294901760, %v4902_v36  ;;  %v4952_v61 = vsub.f32 %v244_v28, %v4928_v31 }
  0xd4   :  { %1536 = vmatmul.mubr.f32.vlgmr.msra.gmra.mxu0 %v6694_v38  ;;  %1706 = vmatpush1.msra.mxu1 %v6624_v50  ;;  %v2133_v50 = vand.u32 4294901760, %v2132_v34  ;;  %v2139_v34 = vand.u32 4294901760, %v2138_v30  ;;  %v4914_v62 = vsub.f32 %v249_v59, %v4891_v22  ;;  %6700 = vst [vmem:[#allocation27_spill] sm:$0xff] %v4932_v21  ;;  %v4957_v46 = vsub.f32 %v241_v19, %v4932_v21 }
  0xd5   :  { %1364 = vmatprep.mubr.f32.mxu1 %v6545_v57  ;;  %1541 = vmatprep.mubr.f32.mxu0 %v6545_v57  ;;  %v4926_v59 = vsub.f32 %v248_v17, %v4904_v25  ;;  %v4964_v28 = vand.u32 4294901760, %v237_v51  ;;  %v4969_v19 = vsub.f32 %v240_v53, %v4944_v23  ;;  %v4988_v17 = vand.u32 4294901760, %v233_v6 }
  0xd6   :  { %1708 = vmatprep.subr.mxu1 %v6625_v54  ;;  %1859 = vmatpush1.msra.mxu0 %v4809_v26  ;;  %v6696_v54 = vld [vmem:[#allocation43_spill] sm:$0xff]  ;;  %v6713_v18 = vand.u32 4294901760, %v4952_v61  ;;  %v6716_v53 = vand.u32 4294901760, %v4957_v46 }
  0xd7   :  { %1368 = vmatmul.mubr.f32.gmra.mxu1 %v6695_v35  ;;  %1861 = vmatprep.subr.mxu0 %v4813_v63  ;;  %v2145_v35 = vand.u32 4294901760, %v2144_v1  ;;  %v6698_v1 = vld [vmem:[#allocation48_spill] sm:$0xff]  ;;  %6706 = vst [vmem:[#allocation31_spill] sm:$0xff] %v4964_v28  ;;  %v6708_v4 = vand.u32 4294901760, %v4926_v59  ;;  %6711 = vst [vmem:[#allocation13_spill] sm:$0xff] %v4988_v17  ;;  %v6719_v11 = vand.u32 4294901760, %v4969_v19 }
  0xd8   :  { %1543 = vmatmul.mubr.f32.gmra.mxu0 %v6696_v54  ;;  %1710 = vmatpush1.msra.mxu1 %v6630_v56  ;;  %v2156_v56 = vsub.f32 %v4863_v40, %v6697_v44  ;;  %v2204_v16 = vsub.f32 %v4957_v46, %v6716_v53 }
  0xd9   :  { %1548 = vmatprep.mubr.f32.mxu0 %v6545_v57  ;;  %1743 = vmatprep.mubr.f32.mxu1 %v6545_v57  ;;  %v2210_v53 = vsub.f32 %v4969_v19, %v6719_v11 }
  0xda   :  { %2134 = vmatprep.subr.mxu1 %v2133_v50  ;;  %1863 = vmatpush1.msra.mxu0 %v4824_v33  ;;  %v6699_v50 = vand.u32 4294901760, %v4876_v45  ;;  %v2205_v42 = vand.u32 4294901760, %v2204_v16  ;;  %v6726_v16 = vld [vmem:[#allocation62_spill] sm:$0xff] }
  0xdb   :  { %1745 = vmatmul.mubr.f32.vlgmr.msra.gmra.mxu1 %v6694_v38  ;;  %1865 = vmatprep.subr.mxu0 %v4840_v5  ;;  %v2211_v24 = vand.u32 4294901760, %v2210_v53  ;;  %v5052_v53 = vand.u32 4294901760, %v221_v14 }
  0xdc   :  { %1550 = vmatmul.mubr.f32.gmra.mxu0 %v6698_v1  ;;  %2140 = vmatpush1.msra.mxu1 %v2139_v34  ;;  %v2162_v44 = vsub.f32 %v4876_v45, %v6699_v50  ;;  %v2157_v34 = vand.u32 4294901760, %v2156_v56  ;;  %v6701_v50 = vand.u32 4294901760, %v4889_v52 }
  0xdd   :  { %1555 = vmatprep.mubr.f32.mxu0 %v6545_v57  ;;  %1750 = vmatprep.mubr.f32.mxu1 %v6545_v57  ;;  %6730 = vst [vmem:[#allocation34_spill] sm:$0xff] %v5052_v53 }
  0xde   :  { %2146 = vmatprep.subr.mxu1 %v2145_v35  ;;  %1867 = vmatpush1.msra.mxu0 %v4851_v47  ;;  %v2168_v30 = vsub.f32 %v4889_v52, %v6701_v50  ;;  %v6703_v35 = vld [vmem:[#allocation49_spill] sm:$0xff]  ;;  %v2163_v56 = vand.u32 4294901760, %v2162_v44  ;;  %v2174_v50 = vsub.f32 %v4902_v36, %v6704_v2  ;;  %v6705_v44 = vand.u32 4294901760, %v4914_v62 }
  0xdf   :  { %1752 = vmatmul.mubr.f32.gmra.mxu1 %v6696_v54  ;;  %1869 = vmatprep.subr.mxu0 %v4865_v15 }
  0xe0   :  { %1557 = vmatmul.mubr.f32.gmra.mxu0 %v6703_v35  ;;  %2152 = vmatpush1.msra.mxu1 %v2151_v27  ;;  %v2169_v27 = vand.u32 4294901760, %v2168_v30  ;;  %v2180_v2 = vsub.f32 %v4914_v62, %v6705_v44  ;;  %v2175_v30 = vand.u32 4294901760, %v2174_v50  ;;  %v2186_v44 = vsub.f32 %v4926_v59, %v6708_v4 }
  0xe1   :  { %1562 = vmatprep.mubr.f32.mxu0 %v6545_v57  ;;  %1757 = vmatprep.mubr.f32.mxu1 %v6545_v57  ;;  %v6710_v50 = vand.u32 4294901760, %v4940_v9  ;;  %v4986_v4 = vsub.f32 %v237_v51, %v4964_v28  ;;  %v4998_v51 = vsub.f32 %v236_v12, %v4976_v55  ;;  %v5010_v12 = vsub.f32 %v233_v6, %v4988_v17 }
  0xe2   :  { %2158 = vmatprep.subr.mxu1 %v2157_v34  ;;  %1871 = vmatpush1.msra.mxu0 %v4878_v0  ;;  %v6707_v34 = vld [vmem:[#allocation50_spill] sm:$0xff]  ;;  %v5022_v6 = vsub.f32 %v232_v58, %v5000_v60 }
  0xe3   :  { %1759 = vmatmul.mubr.f32.gmra.mxu1 %v6698_v1  ;;  %1873 = vmatprep.subr.mxu0 %v4891_v22  ;;  %v2192_v43 = vsub.f32 %v4940_v9, %v6710_v50  ;;  %v2198_v50 = vsub.f32 %v4952_v61, %v6713_v18  ;;  %6714 = vst [vmem:[#allocation37_spill] sm:$0xff] %v4998_v51  ;;  %6717 = vst [vmem:[#allocation14_spill] sm:$0xff] %v5010_v12  ;;  %v6723_v11 = vand.u32 4294901760, %v4986_v4 }
  0xe4   :  { %1564 = vmatmul.mubr.f32.gmra.mxu0 %v6707_v34  ;;  %2164 = vmatpush1.msra.mxu1 %v2163_v56  ;;  %v2181_v56 = vand.u32 4294901760, %v2180_v2  ;;  %v2187_v2 = vand.u32 4294901760, %v2186_v44  ;;  %v5012_v44 = vand.u32 4294901760, %v229_v13  ;;  %6721 = vst [vmem:[#allocation26_spill] sm:$0xff] %v5022_v6  ;;  %v5036_v18 = vand.u32 4294901760, %v225_v39 }
  0xe5   :  { %1569 = vmatprep.mubr.f32.mxu0 %v6545_v57  ;;  %1764 = vmatprep.mubr.f32.mxu1 %v6545_v57 }
  0xe6   :  { %2170 = vmatprep.subr.mxu1 %v2169_v27  ;;  %1875 = vmatpush1.msra.mxu0 %v4904_v25  ;;  %v6712_v27 = vld [vmem:[#allocation57_spill] sm:$0xff]  ;;  %6718 = vst [vmem:[#allocation39_spill] sm:$0xff] %v5012_v44  ;;  %v5034_v58 = vsub.f32 %v229_v13, %v5012_v44  ;;  %6725 = vst [vmem:[#allocation30_spill] sm:$0xff] %v5036_v18  ;;  %v5046_v13 = vsub.f32 %v228_v41, %v5024_v48 }
  0xe7   :  { %1766 = vmatmul.mubr.f32.gmra.mxu1 %v6703_v35  ;;  %1877 = vmatprep.subr.mxu0 %v4916_v8 }
  0xe8   :  { %1571 = vmatmul.mubr.f32.gmra.mxu0 %v6712_v27  ;;  %2176 = vmatpush1.msra.mxu1 %v2175_v30  ;;  %v2193_v30 = vand.u32 4294901760, %v2192_v43  ;;  %v2199_v43 = vand.u32 4294901760, %v2198_v50  ;;  %6724 = vst [vmem:[#allocation15_spill] sm:$0xff] %v5034_v58  ;;  %6728 = vst [vmem:[#allocation32_spill] sm:$0xff] %v5046_v13 }
  0xe9   :  { %1576 = vmatprep.mubr.f32.mxu0 %v6545_v57  ;;  %1771 = vmatprep.mubr.f32.mxu1 %v6545_v57 }
  0xea   :  { %2182 = vmatprep.subr.mxu1 %v2181_v56  ;;  %1879 = vmatpush1.msra.mxu0 %v4928_v31  ;;  %v6720_v56 = vld [vmem:[#allocation58_spill] sm:$0xff] }
  0xeb   :  { %1773 = vmatmul.mubr.f32.gmra.mxu1 %v6707_v34  ;;  %1881 = vmatprep.subr.mxu0 %v4932_v21  ;;  %v217_v21 = vld [vmem:[#allocation6 + $0x78] sm:$0xff] }
  0xec   :  { %1578 = vmatmul.mubr.f32.gmra.mxu0 %v6720_v56  ;;  %2188 = vmatpush1.msra.mxu1 %v2187_v2  ;;  %v2216_v2 = vsub.f32 %v4986_v4, %v6723_v11 }
  0xed   :  { %1583 = vmatprep.mubr.f32.mxu0 %v6545_v57  ;;  %1778 = vmatprep.mubr.f32.mxu1 %v6545_v57 }
  0xee   :  { %2194 = vmatprep.subr.mxu1 %v2193_v30  ;;  %1883 = vmatpush1.msra.mxu0 %v4944_v23  ;;  %v6727_v30 = vand.u32 4294901760, %v4998_v51  ;;  %v220_v23 = vld [vmem:[#allocation6 + $0x90] sm:$0xff] }
  0xef   :  { %1780 = vmatmul.mubr.f32.gmra.mxu1 %v6712_v27  ;;  %1885 = vmatprep.subr.mxu0 %v4964_v28  ;;  %v5060_v28 = vsub.f32 %v225_v39, %v5036_v18  ;;  %v5072_v39 = vsub.f32 %v224_v32, %v5048_v3  ;;  %v5084_v32 = vand.u32 4294901760, %v217_v21 }
  0xf0   :  { %1585 = vmatmul.mubr.f32.gmra.mxu0 %v6726_v16  ;;  %2200 = vmatpush1.msra.mxu1 %v2199_v43  ;;  %v2222_v11 = vsub.f32 %v4998_v51, %v6727_v30  ;;  %v2217_v43 = vand.u32 4294901760, %v2216_v2  ;;  %v6731_v30 = vand.u32 4294901760, %v5010_v12  ;;  %v5064_v51 = vand.u32 4294901760, %v220_v23 }
  0xf1   :  { %1590 = vmatprep.mubr.f32.mxu0 %v6545_v57  ;;  %1785 = vmatprep.mubr.f32.mxu1 %v6545_v57  ;;  %6732 = vst [vmem:[#allocation36_spill] sm:$0xff] %v5060_v28  ;;  %6736 = vst [vmem:[#allocation35_spill] sm:$0xff] %v5072_v39 }
  0xf2   :  { %2206 = vmatprep.subr.mxu1 %v2205_v42  ;;  %1887 = vmatpush1.msra.mxu0 %v4976_v55  ;;  %v2228_v50 = vsub.f32 %v5010_v12, %v6731_v30  ;;  %6733 = vst [vmem:[#allocation47_spill] sm:$0xff] %v5064_v51  ;;  %v6734_v42 = vld [vmem:[#allocation69_spill] sm:$0xff]  ;;  %v2223_v2 = vand.u32 4294901760, %v2222_v11  ;;  %v6735_v55 = vand.u32 4294901760, %v5022_v6  ;;  %v216_v12 = vld [vmem:[#allocation6 + $0x70] sm:$0xff]  ;;  %v6738_v11 = vand.u32 4294901760, %v5034_v58 }
  0xf3   :  { %1787 = vmatmul.mubr.f32.gmra.mxu1 %v6720_v56  ;;  %1889 = vmatprep.subr.mxu0 %v4988_v17  ;;  %v5077_v17 = vsub.f32 %v221_v14, %v5052_v53  ;;  %6739 = vst [vmem:[#allocation97_spill] sm:$0xff] %v5084_v32  ;;  %v5089_v14 = vsub.f32 %v220_v23, %v5064_v51 }
  0xf4   :  { %1592 = vmatmul.mubr.f32.gmra.mxu0 %v6734_v42  ;;  %2212 = vmatpush1.msra.mxu1 %v2211_v24  ;;  %v2234_v30 = vsub.f32 %v5022_v6, %v6735_v55  ;;  %v2229_v24 = vand.u32 4294901760, %v2228_v50  ;;  %v2240_v55 = vsub.f32 %v5034_v58, %v6738_v11  ;;  %v213_v6 = vld [vmem:[#allocation6 + $0x58] sm:$0xff]  ;;  %v5096_v58 = vand.u32 4294901760, %v216_v12 }
  0xf5   :  { %1597 = vmatprep.mubr.f32.mxu0 %v6545_v57  ;;  %1792 = vmatprep.mubr.f32.mxu1 %v6545_v57  ;;  %6737 = vst [vmem:[#allocation96_spill] sm:$0xff] %v5077_v17  ;;  %6740 = vst [vmem:[#allocation98_spill] sm:$0xff] %v5089_v14  ;;  %v5108_v41 = vand.u32 4294901760, %v213_v6  ;;  %v6748_v23 = vand.u32 4294901760, %v5077_v17 }
  0xf6   :  { %2218 = vmatprep.subr.mxu1 %v2217_v43  ;;  %1891 = vmatpush1.msra.mxu0 %v5000_v60  ;;  %v6741_v43 = vld [vmem:[#allocation70_spill] sm:$0xff]  ;;  %v2235_v50 = vand.u32 4294901760, %v2234_v30  ;;  %v6742_v60 = vand.u32 4294901760, %v5046_v13  ;;  %6743 = vst [vmem:[#allocation99_spill] sm:$0xff] %v5096_v58  ;;  %v6744_v30 = vand.u32 4294901760, %v5060_v28 }
  0xf7   :  { %1794 = vmatmul.mubr.f32.gmra.mxu1 %v6726_v16  ;;  %1893 = vmatprep.subr.mxu0 %v5012_v44  ;;  %v212_v44 = vld [vmem:[#allocation6 + $0x50] sm:$0xff] }
  0xf8   :  { %1599 = vmatmul.mubr.f32.gmra.mxu0 %v6741_v43  ;;  %2224 = vmatpush1.msra.mxu1 %v2223_v2  ;;  %v2246_v11 = vsub.f32 %v5046_v13, %v6742_v60  ;;  %v2241_v2 = vand.u32 4294901760, %v2240_v55  ;;  %v2252_v16 = vsub.f32 %v5060_v28, %v6744_v30  ;;  %v5106_v60 = vsub.f32 %v217_v21, %v5084_v32  ;;  %v209_v13 = vld [vmem:[#allocation6 + $0x38] sm:$0xff] }
  0xf9   :  { %1604 = vmatprep.mubr.f32.mxu0 %v6545_v57  ;;  %1799 = vmatprep.mubr.f32.mxu1 %v6545_v57  ;;  %v5118_v21 = vsub.f32 %v216_v12, %v5096_v58  ;;  %v5120_v28 = vand.u32 4294901760, %v212_v44  ;;  %v5132_v12 = vsub.f32 %v213_v6, %v5108_v41 }
  0xfa   :  { %2230 = vmatprep.subr.mxu1 %v2229_v24  ;;  %1895 = vmatpush1.msra.mxu0 %v5024_v48  ;;  %6745 = vst [vmem:[#allocation100_spill] sm:$0xff] %v5106_v60  ;;  %v6746_v24 = vld [vmem:[#allocation77_spill] sm:$0xff]  ;;  %v2247_v55 = vand.u32 4294901760, %v2246_v11  ;;  %v6747_v48 = vand.u32 4294901760, %v5072_v39  ;;  %v5129_v11 = vand.u32 4294901760, %v209_v13 }
  0xfb   :  { %1801 = vmatmul.mubr.f32.gmra.mxu1 %v6734_v42  ;;  %1897 = vmatprep.subr.mxu0 %v5036_v18  ;;  %v2264_v18 = vsub.f32 %v5077_v17, %v6748_v23  ;;  %v208_v42 = vld [vmem:[#allocation6 + $0x30] sm:$0xff]  ;;  %v205_v17 = vld [vmem:[#allocation6 + $0x18] sm:$0xff] }
  0xfc   :  { %1606 = vmatmul.mubr.f32.gmra.mxu0 %v6746_v24  ;;  %2236 = vmatpush1.msra.mxu1 %v2235_v50  ;;  %v2258_v30 = vsub.f32 %v5072_v39, %v6747_v48  ;;  %v2253_v50 = vand.u32 4294901760, %v2252_v16  ;;  %6749 = vst [vmem:[#allocation101_spill] sm:$0xff] %v5129_v11  ;;  %v6750_v39 = vand.u32 4294901760, %v5089_v14  ;;  %v5144_v6 = vand.u32 4294901760, %v208_v42 }
  0xfd   :  { %1611 = vmatprep.mubr.f32.mxu0 %v6545_v57  ;;  %1806 = vmatprep.mubr.f32.mxu1 %v6545_v57  ;;  %v5153_v48 = vand.u32 4294901760, %v205_v17 }
  0xfe   :  { %2242 = vmatprep.subr.mxu1 %v2241_v2  ;;  %1899 = vmatpush1.msra.mxu0 %v5048_v3  ;;  %v2270_v23 = vsub.f32 %v5089_v14, %v6750_v39  ;;  %v6751_v2 = vld [vmem:[#allocation78_spill] sm:$0xff]  ;;  %v2259_v16 = vand.u32 4294901760, %v2258_v30  ;;  %v5142_v3 = vsub.f32 %v212_v44, %v5120_v28  ;;  %v6752_v39 = vand.u32 4294901760, %v5106_v60  ;;  %v6756_v30 = vld [vmem:[#allocation89_spill] sm:$0xff] }
  0xff   :  { %1808 = vmatmul.mubr.f32.gmra.mxu1 %v6741_v43  ;;  %1901 = vmatprep.subr.mxu0 %v5052_v53  ;;  %v2265_v53 = vand.u32 4294901760, %v2264_v18  ;;  %v204_v43 = vld [vmem:[#allocation6 + $0x10] sm:$0xff]  ;;  %v5156_v44 = vsub.f32 %v209_v13, %v5129_v11 }
 0x100   :  { %1613 = vmatmul.mubr.f32.gmra.mxu0 %v6751_v2  ;;  %2248 = vmatpush1.msra.mxu1 %v2247_v55  ;;  %v2276_v55 = vsub.f32 %v5106_v60, %v6752_v39  ;;  %v2271_v14 = vand.u32 4294901760, %v2270_v23  ;;  %v6753_v18 = vld [vmem:[#allocation82_spill] sm:$0xff]  ;;  %v5165_v39 = vsub.f32 %v208_v42, %v5144_v6  ;;  %v5168_v60 = vand.u32 4294901760, %v204_v43 }
 0x101   :  { %1618 = vmatprep.mubr.f32.mxu0 %v6545_v57  ;;  %1813 = vmatprep.mubr.f32.mxu1 %v6545_v57  ;;  %v6755_v23 = vand.u32 4294901760, %v5132_v12  ;;  %v5178_v42 = vsub.f32 %v205_v17, %v5153_v48 }
 0x102   :  { %2254 = vmatprep.subr.mxu1 %v2253_v50  ;;  %1903 = vmatpush1.msra.mxu0 %v5064_v51  ;;  %v6754_v50 = vand.u32 4294901760, %v5118_v21  ;;  %v2277_v13 = vand.u32 4294901760, %v2276_v55 }
 0x103   :  { %1815 = vmatmul.mubr.f32.gmra.mxu1 %v6746_v24  ;;  %1905 = vmatprep.subr.mxu0 %v5084_v32  ;;  %v5187_v32 = vsub.f32 %v204_v43, %v5168_v60 }
 0x104   :  { %1620 = vmatmul.mubr.f32.gmra.mxu0 %v6753_v18  ;;  %2260 = vmatpush1.msra.mxu1 %v2259_v16  ;;  %v2282_v51 = vsub.f32 %v5118_v21, %v6754_v50  ;;  %v2288_v16 = vsub.f32 %v5132_v12, %v6755_v23  ;;  %v6480_v50 = vand.u32 4294901760, %v5156_v44  ;;  %v6485_v23 = vand.u32 4294901760, %v5165_v39 }
 0x105   :  { %1625 = vmatprep.mubr.f32.mxu0 %v6545_v57  ;;  %1820 = vmatprep.mubr.f32.mxu1 %v6545_v57 }
 0x106   :  { %2266 = vmatprep.subr.mxu1 %v2265_v53  ;;  %1907 = vmatpush1.msra.mxu0 %v5096_v58  ;;  %v2283_v53 = vand.u32 4294901760, %v2282_v51  ;;  %v6757_v58 = vand.u32 4294901760, %v5142_v3  ;;  %v2289_v17 = vand.u32 4294901760, %v2288_v16  ;;  %v2300_v51 = vsub.f32 %v5156_v44, %v6480_v50 }
 0x107   :  { %1822 = vmatmul.mubr.f32.gmra.mxu1 %v6751_v2  ;;  %1909 = vmatprep.subr.mxu0 %v5108_v41  ;;  %v6484_v16 = vand.u32 4294901760, %v5187_v32 }
 0x108   :  { %1627 = vmatmul.mubr.f32.gmra.mxu0 %v6756_v30  ;;  %2272 = vmatpush1.msra.mxu1 %v2271_v14  ;;  %v2294_v55 = vsub.f32 %v5142_v3, %v6757_v58  ;;  %v6483_v14 = vand.u32 4294901760, %v5178_v42  ;;  %v6758_v58 = vld [vmem:[#allocation16_spill] sm:$0xff]  ;;  %v2301_v50 = vand.u32 4294901760, %v2300_v51 }
 0x109   :  { %1632 = vmatprep.mubr.f32.mxu0 %v6545_v57  ;;  %1827 = vmatprep.mubr.f32.mxu1 %v6545_v57 }
 0x10a   :  { %2278 = vmatprep.subr.mxu1 %v2277_v13  ;;  %1911 = vmatpush1.msra.mxu0 %v5120_v28  ;;  %v2295_v43 = vand.u32 4294901760, %v2294_v55  ;;  %v2306_v13 = vsub.f32 %v5165_v39, %v6485_v23  ;;  %v2318_v55 = vsub.f32 %v5187_v32, %v6484_v16 }
 0x10b   :  { %1829 = vmatmul.mubr.f32.gmra.mxu1 %v6753_v18  ;;  %1913 = vmatprep.subr.mxu0 %v5129_v11  ;;  %v2312_v11 = vsub.f32 %v5178_v42, %v6483_v14  ;;  %v6759_v14 = vld [vmem:[#allocation45_spill] sm:$0xff] }
 0x10c   :  { %1634 = vmatmul.mubr.f32.gmra.mxu0 %v6758_v58  ;;  %2284 = vmatpush1.msra.mxu1 %v2283_v53  ;;  %v2307_v53 = vand.u32 4294901760, %v2306_v13  ;;  %v2319_v13 = vand.u32 4294901760, %v2318_v55 }
 0x10d   :  { %1639 = vmatprep.mubr.f32.mxu0 %v6545_v57  ;;  %1834 = vmatprep.mubr.f32.mxu1 %v6545_v57  ;;  %v2313_v51 = vand.u32 4294901760, %v2312_v11  ;;  %v6760_v11 = vld [vmem:[#allocation51_spill] sm:$0xff] }
 0x10e   :  { %2290 = vmatprep.subr.mxu1 %v2289_v17  ;;  %1915 = vmatpush1.msra.mxu0 %v5144_v6 }
 0x10f   :  { %1836 = vmatmul.mubr.f32.gmra.mxu1 %v6756_v30  ;;  %1917 = vmatprep.subr.mxu0 %v5153_v48 }
 0x110   :  { %1641 = vmatmul.mubr.f32.gmra.mxu0 %v4592_v29  ;;  %2296 = vmatpush1.msra.mxu1 %v2295_v43 }
 0x111   :  { %1841 = vmatprep.mubr.f32.mxu1 %v6545_v57  ;;  %1919 = vmatpush1.msra.mxu0 %v5168_v60 }
 0x112   :  { %1952 = vmatprep.mubr.f32.mxu0 %v6545_v57  ;;  %v369_v17 = vpop.f32.mrf.mxu0  ;;  %2302 = vmatprep.subr.mxu1 %v2301_v50 }
 0x113   :  { %1843 = vmatmul.mubr.f32.gmra.mxu1 %v6758_v58  ;;  %2468 = vmatprep.subr.mxu0 %v4819_v49 }
 0x114   :  { %1958 = vmatmul.mubr.f32.vlgmr.msra.gmra.mxu0 %v6759_v14  ;;  %2308 = vmatpush1.msra.mxu1 %v2307_v53  ;;  %v371_v43 = vpop.f32.mrf.mxu0 }
 0x115   :  { %1848 = vmatprep.mubr.f32.mxu1 %v6545_v57  ;;  %1963 = vmatprep.mubr.f32.mxu0 %v6545_v57 }
 0x116   :  { %v380_v16 = vpop.f32.mrf.mxu0  ;;  %2314 = vmatprep.subr.mxu1 %v2313_v51  ;;  %2471 = vmatpush1.msra.mxu0 %v4829_v37  ;;  %v6762_v51 = vld [vmem:[#allocation61_spill] sm:$0xff] }
 0x117   :  { %1850 = vmatmul.mubr.f32.gmra.mxu1 %v4592_v29  ;;  %2474 = vmatprep.subr.mxu0 %v4834_v7 }
 0x118   :  { %1969 = vmatmul.mubr.f32.gmra.mxu0 %v6760_v11  ;;  %2320 = vmatpush1.msra.mxu1 %v2319_v13  ;;  %v382_v50 = vpop.f32.mrf.mxu0 }
 0x119   :  { %1974 = vmatprep.mubr.f32.mxu0 %v6545_v57  ;;  %2353 = vmatprep.mubr.f32.mxu1 %v6545_v57 }
 0x11a   :  { %2724 = vmatprep.subr.mxu1 %v4802_v20  ;;  %2477 = vmatpush1.msra.mxu0 %v4846_v10 }
 0x11b   :  { %v766_v14 = vpop.f32.mrf.mxu1  ;;  %2355 = vmatmul.mubr.f32.vlgmr.msra.gmra.mxu1 %v6694_v38  ;;  %2480 = vmatprep.subr.mxu0 %v4863_v40 }
 0x11c   :  { %v391_v53 = vpop.f32.mrf.mxu0  ;;  %v5234_v55 = vadd.f32 %v766_v14, %v369_v17  ;;  %1980 = vmatmul.mubr.f32.gmra.mxu0 %v6762_v51  ;;  %2726 = vmatpush1.msra.mxu1 %v4809_v26  ;;  %v6765_v51 = vld [vmem:[#allocation63_spill] sm:$0xff] }
 0x11d   :  { %v768_v13 = vpop.f32.mrf.mxu1  ;;  %1985 = vmatprep.mubr.f32.mxu0 %v6545_v57  ;;  %2360 = vmatprep.mubr.f32.mxu1 %v6545_v57 }
 0x11e   :  { %6761 = vst [vmem:[#allocation45_spill] sm:$0xff] %v5234_v55  ;;  %v393_v11 = vpop.f32.mrf.mxu0  ;;  %v5240_v23 = vadd.f32 %v768_v13, %v371_v43  ;;  %2728 = vmatprep.subr.mxu1 %v4813_v63  ;;  %2483 = vmatpush1.msra.mxu0 %v4876_v45 }
 0x11f   :  { %v773_v38 = vpop.f32.mrf.mxu1  ;;  %2362 = vmatmul.mubr.f32.gmra.mxu1 %v6696_v54  ;;  %2486 = vmatprep.subr.mxu0 %v4889_v52 }
 0x120   :  { %6763 = vst [vmem:[#allocation51_spill] sm:$0xff] %v5240_v23  ;;  %v402_v17 = vpop.f32.mrf.mxu0  ;;  %v5246_v14 = vadd.f32 %v773_v38, %v380_v16  ;;  %1991 = vmatmul.mubr.f32.gmra.mxu0 %v6765_v51  ;;  %2730 = vmatpush1.msra.mxu1 %v4824_v33  ;;  %v6768_v51 = vld [vmem:[#allocation67_spill] sm:$0xff] }
 0x121   :  { %v775_v55 = vpop.f32.mrf.mxu1  ;;  %1996 = vmatprep.mubr.f32.mxu0 %v6545_v57  ;;  %2367 = vmatprep.mubr.f32.mxu1 %v6545_v57 }
 0x122   :  { %6764 = vst [vmem:[#allocation61_spill] sm:$0xff] %v5246_v14  ;;  %v404_v43 = vpop.f32.mrf.mxu0  ;;  %v5252_v13 = vadd.f32 %v775_v55, %v382_v50  ;;  %2732 = vmatprep.subr.mxu1 %v4840_v5  ;;  %2489 = vmatpush1.msra.mxu0 %v4902_v36 }
 0x123   :  { %v780_v54 = vpop.f32.mrf.mxu1  ;;  %2369 = vmatmul.mubr.f32.gmra.mxu1 %v6698_v1  ;;  %2492 = vmatprep.subr.mxu0 %v4914_v62 }
 0x124   :  { %6766 = vst [vmem:[#allocation63_spill] sm:$0xff] %v5252_v13  ;;  %v413_v38 = vpop.f32.mrf.mxu0  ;;  %v5258_v16 = vadd.f32 %v780_v54, %v391_v53  ;;  %2002 = vmatmul.mubr.f32.gmra.mxu0 %v6768_v51  ;;  %2734 = vmatpush1.msra.mxu1 %v4851_v47  ;;  %v6771_v51 = vld [vmem:[#allocation71_spill] sm:$0xff] }
 0x125   :  { %v782_v14 = vpop.f32.mrf.mxu1  ;;  %2007 = vmatprep.mubr.f32.mxu0 %v6545_v57  ;;  %2374 = vmatprep.mubr.f32.mxu1 %v6545_v57 }
 0x126   :  { %6767 = vst [vmem:[#allocation102_spill] sm:$0xff] %v5258_v16  ;;  %v415_v50 = vpop.f32.mrf.mxu0  ;;  %v5264_v55 = vadd.f32 %v782_v14, %v393_v11  ;;  %2736 = vmatprep.subr.mxu1 %v4865_v15  ;;  %2495 = vmatpush1.msra.mxu0 %v4926_v59 }
 0x127   :  { %v787_v1 = vpop.f32.mrf.mxu1  ;;  %2376 = vmatmul.mubr.f32.gmra.mxu1 %v6703_v35  ;;  %2498 = vmatprep.subr.mxu0 %v4940_v9 }
 0x128   :  { %6769 = vst [vmem:[#allocation67_spill] sm:$0xff] %v5264_v55  ;;  %v424_v54 = vpop.f32.mrf.mxu0  ;;  %v5270_v53 = vadd.f32 %v787_v1, %v402_v17  ;;  %2013 = vmatmul.mubr.f32.gmra.mxu0 %v6771_v51  ;;  %2738 = vmatpush1.msra.mxu1 %v4878_v0  ;;  %v6774_v51 = vld [vmem:[#allocation75_spill] sm:$0xff]  ;;  %v6784_v55 = vld [vmem:[#allocation29_spill] sm:$0xff] }
 0x129   :  { %v789_v16 = vpop.f32.mrf.mxu1  ;;  %2018 = vmatprep.mubr.f32.mxu0 %v6545_v57  ;;  %2381 = vmatprep.mubr.f32.mxu1 %v6545_v57 }
 0x12a   :  { %6770 = vst [vmem:[#allocation103_spill] sm:$0xff] %v5270_v53  ;;  %v426_v11 = vpop.f32.mrf.mxu0  ;;  %v5276_v14 = vadd.f32 %v789_v16, %v404_v43  ;;  %2740 = vmatprep.subr.mxu1 %v4891_v22  ;;  %2501 = vmatpush1.msra.mxu0 %v4952_v61 }
 0x12b   :  { %v794_v35 = vpop.f32.mrf.mxu1  ;;  %2383 = vmatmul.mubr.f32.gmra.mxu1 %v6707_v34  ;;  %2504 = vmatprep.subr.mxu0 %v4957_v46 }
 0x12c   :  { %6772 = vst [vmem:[#allocation71_spill] sm:$0xff] %v5276_v14  ;;  %v435_v1 = vpop.f32.mrf.mxu0  ;;  %v5282_v17 = vadd.f32 %v794_v35, %v413_v38  ;;  %2024 = vmatmul.mubr.f32.gmra.mxu0 %v6774_v51  ;;  %2742 = vmatpush1.msra.mxu1 %v4904_v25  ;;  %v6777_v51 = vld [vmem:[#allocation79_spill] sm:$0xff] }
 0x12d   :  { %v796_v53 = vpop.f32.mrf.mxu1  ;;  %2029 = vmatprep.mubr.f32.mxu0 %v6545_v57  ;;  %2388 = vmatprep.mubr.f32.mxu1 %v6545_v57 }
 0x12e   :  { %6773 = vst [vmem:[#allocation104_spill] sm:$0xff] %v5282_v17  ;;  %v437_v43 = vpop.f32.mrf.mxu0  ;;  %v5288_v16 = vadd.f32 %v796_v53, %v415_v50  ;;  %2744 = vmatprep.subr.mxu1 %v4916_v8  ;;  %2507 = vmatpush1.msra.mxu0 %v4969_v19 }
 0x12f   :  { %v801_v34 = vpop.f32.mrf.mxu1  ;;  %2390 = vmatmul.mubr.f32.gmra.mxu1 %v6712_v27  ;;  %2510 = vmatprep.subr.mxu0 %v4986_v4  ;;  %v6780_v27 = vld [vmem:[#allocation37_spill] sm:$0xff] }
 0x130   :  { %6775 = vst [vmem:[#allocation75_spill] sm:$0xff] %v5288_v16  ;;  %v446_v35 = vpop.f32.mrf.mxu0  ;;  %v5294_v38 = vadd.f32 %v801_v34, %v424_v54  ;;  %2035 = vmatmul.mubr.f32.gmra.mxu0 %v6777_v51  ;;  %2746 = vmatpush1.msra.mxu1 %v4928_v31  ;;  %v6779_v16 = vld [vmem:[#allocation27_spill] sm:$0xff]  ;;  %v6781_v34 = vld [vmem:[#allocation14_spill] sm:$0xff] }
 0x131   :  { %v803_v17 = vpop.f32.mrf.mxu1  ;;  %2040 = vmatprep.mubr.f32.mxu0 %v6545_v57  ;;  %2395 = vmatprep.mubr.f32.mxu1 %v6545_v57 }
 0x132   :  { %6776 = vst [vmem:[#allocation105_spill] sm:$0xff] %v5294_v38  ;;  %v448_v50 = vpop.f32.mrf.mxu0  ;;  %v5300_v53 = vadd.f32 %v803_v17, %v426_v11  ;;  %2748 = vmatprep.subr.mxu1 %v6779_v16  ;;  %2513 = vmatpush1.msra.mxu0 %v6780_v27  ;;  %v6783_v38 = vld [vmem:[#allocation83_spill] sm:$0xff] }
 0x133   :  { %v808_v14 = vpop.f32.mrf.mxu1  ;;  %2397 = vmatmul.mubr.f32.gmra.mxu1 %v6720_v56  ;;  %2516 = vmatprep.subr.mxu0 %v6781_v34  ;;  %v6787_v56 = vld [vmem:[#allocation26_spill] sm:$0xff] }
 0x134   :  { %6778 = vst [vmem:[#allocation79_spill] sm:$0xff] %v5300_v53  ;;  %v457_v54 = vpop.f32.mrf.mxu0  ;;  %v5306_v51 = vadd.f32 %v808_v14, %v435_v1  ;;  %2046 = vmatmul.mubr.f32.gmra.mxu0 %v6783_v38  ;;  %2750 = vmatpush1.msra.mxu1 %v6784_v55  ;;  %v6786_v53 = vld [vmem:[#allocation31_spill] sm:$0xff]  ;;  %v6788_v34 = vld [vmem:[#allocation62_spill] sm:$0xff]  ;;  %v6792_v55 = vld [vmem:[#allocation33_spill] sm:$0xff] }
 0x135   :  { %v810_v13 = vpop.f32.mrf.mxu1  ;;  %2051 = vmatprep.mubr.f32.mxu0 %v6545_v57  ;;  %2402 = vmatprep.mubr.f32.mxu1 %v6545_v57  ;;  %v6789_v14 = vld [vmem:[#allocation15_spill] sm:$0xff] }
 0x136   :  { %6782 = vst [vmem:[#allocation27_spill] sm:$0xff] %v5306_v51  ;;  %v459_v11 = vpop.f32.mrf.mxu0  ;;  %v5312_v17 = vadd.f32 %v810_v13, %v437_v43  ;;  %2752 = vmatprep.subr.mxu1 %v6786_v53  ;;  %2519 = vmatpush1.msra.mxu0 %v6787_v56  ;;  %v6791_v51 = vld [vmem:[#allocation87_spill] sm:$0xff]  ;;  %v6796_v56 = vld [vmem:[#allocation69_spill] sm:$0xff] }
 0x137   :  { %v815_v23 = vpop.f32.mrf.mxu1  ;;  %2404 = vmatmul.mubr.f32.gmra.mxu1 %v6788_v34  ;;  %2522 = vmatprep.subr.mxu0 %v6789_v14  ;;  %v6795_v34 = vld [vmem:[#allocation32_spill] sm:$0xff] }
 0x138   :  { %6785 = vst [vmem:[#allocation83_spill] sm:$0xff] %v5312_v17  ;;  %v468_v1 = vpop.f32.mrf.mxu0  ;;  %v5318_v38 = vadd.f32 %v815_v23, %v446_v35  ;;  %2057 = vmatmul.mubr.f32.gmra.mxu0 %v6791_v51  ;;  %2754 = vmatpush1.msra.mxu1 %v6792_v55  ;;  %v6794_v17 = vld [vmem:[#allocation13_spill] sm:$0xff]  ;;  %v6797_v23 = vld [vmem:[#allocation36_spill] sm:$0xff]  ;;  %v6800_v55 = vld [vmem:[#allocation38_spill] sm:$0xff] }
 0x139   :  { %v817_v27 = vpop.f32.mrf.mxu1  ;;  %2062 = vmatprep.mubr.f32.mxu0 %v6545_v57  ;;  %2409 = vmatprep.mubr.f32.mxu1 %v6545_v57 }
 0x13a   :  { %6790 = vst [vmem:[#allocation106_spill] sm:$0xff] %v5318_v38  ;;  %v470_v13 = vpop.f32.mrf.mxu0  ;;  %v5324_v43 = vadd.f32 %v817_v27, %v448_v50  ;;  %2756 = vmatprep.subr.mxu1 %v6794_v17  ;;  %2525 = vmatpush1.msra.mxu0 %v6795_v34  ;;  %v6799_v38 = vld [vmem:[#allocation90_spill] sm:$0xff] }
 0x13b   :  { %v822_v14 = vpop.f32.mrf.mxu1  ;;  %2411 = vmatmul.mubr.f32.gmra.mxu1 %v6796_v56  ;;  %2528 = vmatprep.subr.mxu0 %v6797_v23  ;;  %v6803_v56 = vld [vmem:[#allocation35_spill] sm:$0xff]  ;;  %v6804_v34 = vld [vmem:[#allocation70_spill] sm:$0xff] }
 0x13c   :  { %6793 = vst [vmem:[#allocation87_spill] sm:$0xff] %v5324_v43  ;;  %v479_v35 = vpop.f32.mrf.mxu0  ;;  %v5330_v51 = vadd.f32 %v822_v14, %v457_v54  ;;  %2068 = vmatmul.mubr.f32.gmra.mxu0 %v6799_v38  ;;  %2758 = vmatpush1.msra.mxu1 %v6800_v55  ;;  %v6802_v43 = vld [vmem:[#allocation39_spill] sm:$0xff]  ;;  %v6805_v54 = vld [vmem:[#allocation96_spill] sm:$0xff] }
 0x13d   :  { %v824_v53 = vpop.f32.mrf.mxu1  ;;  %2073 = vmatprep.mubr.f32.mxu0 %v6545_v57  ;;  %2416 = vmatprep.mubr.f32.mxu1 %v6545_v57  ;;  %v6808_v55 = vld [vmem:[#allocation28_spill] sm:$0xff] }
 0x13e   :  { %6798 = vst [vmem:[#allocation107_spill] sm:$0xff] %v5330_v51  ;;  %v481_v27 = vpop.f32.mrf.mxu0  ;;  %v5336_v50 = vadd.f32 %v824_v53, %v459_v11  ;;  %2760 = vmatprep.subr.mxu1 %v6802_v43  ;;  %2531 = vmatpush1.msra.mxu0 %v6803_v56  ;;  %v6807_v51 = vld [vmem:[#allocation19_spill] sm:$0xff] }
 0x13f   :  { %v829_v23 = vpop.f32.mrf.mxu1  ;;  %2418 = vmatmul.mubr.f32.gmra.mxu1 %v6804_v34  ;;  %2534 = vmatprep.subr.mxu0 %v6805_v54  ;;  %v6811_v34 = vld [vmem:[#allocation98_spill] sm:$0xff] }
 0x140   :  { %6801 = vst [vmem:[#allocation90_spill] sm:$0xff] %v5336_v50  ;;  %v490_v14 = vpop.f32.mrf.mxu0  ;;  %v5342_v38 = vadd.f32 %v829_v23, %v468_v1  ;;  %2079 = vmatmul.mubr.f32.gmra.mxu0 %v6807_v51  ;;  %2762 = vmatpush1.msra.mxu1 %v6808_v55  ;;  %v6810_v50 = vld [vmem:[#allocation30_spill] sm:$0xff]  ;;  %v6812_v1 = vld [vmem:[#allocation100_spill] sm:$0xff]  ;;  %v6815_v55 = vld [vmem:[#allocation17_spill] sm:$0xff] }
 0x141   :  { %v831_v17 = vpop.f32.mrf.mxu1  ;;  %2084 = vmatprep.mubr.f32.mxu0 %v6545_v57  ;;  %2423 = vmatprep.mubr.f32.mxu1 %v6545_v57 }
 0x142   :  { %6806 = vst [vmem:[#allocation39_spill] sm:$0xff] %v5342_v38  ;;  %v492_v53 = vpop.f32.mrf.mxu0  ;;  %v5348_v11 = vadd.f32 %v831_v17, %v470_v13  ;;  %2764 = vmatprep.subr.mxu1 %v6810_v50  ;;  %2537 = vmatpush1.msra.mxu0 %v6811_v34  ;;  %v6814_v38 = vld [vmem:[#allocation20_spill] sm:$0xff] }
 0x143   :  { %v836_v54 = vpop.f32.mrf.mxu1  ;;  %2425 = vmatmul.mubr.f32.gmra.mxu1 %v6746_v24  ;;  %2540 = vmatprep.subr.mxu0 %v6812_v1 }
 0x144   :  { %6809 = vst [vmem:[#allocation19_spill] sm:$0xff] %v5348_v11  ;;  %v501_v23 = vpop.f32.mrf.mxu0  ;;  %v5354_v51 = vadd.f32 %v836_v54, %v479_v35  ;;  %2090 = vmatmul.mubr.f32.gmra.mxu0 %v6814_v38  ;;  %2766 = vmatpush1.msra.mxu1 %v6815_v55  ;;  %v6817_v11 = vld [vmem:[#allocation34_spill] sm:$0xff] }
 0x145   :  { %v838_v56 = vpop.f32.mrf.mxu1  ;;  %2095 = vmatprep.mubr.f32.mxu0 %v6545_v57  ;;  %2430 = vmatprep.mubr.f32.mxu1 %v6545_v57  ;;  %v6819_v38 = vld [vmem:[#allocation22_spill] sm:$0xff] }
 0x146   :  { %6813 = vst [vmem:[#allocation30_spill] sm:$0xff] %v5354_v51  ;;  %v503_v17 = vpop.f32.mrf.mxu0  ;;  %v5360_v13 = vadd.f32 %v838_v56, %v481_v27  ;;  %2768 = vmatprep.subr.mxu1 %v6817_v11  ;;  %2543 = vmatpush1.msra.mxu0 %v5118_v21  ;;  %v6820_v51 = vld [vmem:[#allocation47_spill] sm:$0xff] }
 0x147   :  { %v843_v24 = vpop.f32.mrf.mxu1  ;;  %2432 = vmatmul.mubr.f32.gmra.mxu1 %v6751_v2  ;;  %2546 = vmatprep.subr.mxu0 %v5132_v12 }
 0x148   :  { %6816 = vst [vmem:[#allocation98_spill] sm:$0xff] %v5360_v13  ;;  %v512_v35 = vpop.f32.mrf.mxu0  ;;  %v5366_v54 = vadd.f32 %v843_v24, %v490_v14  ;;  %2101 = vmatmul.mubr.f32.gmra.mxu0 %v6819_v38  ;;  %2770 = vmatpush1.msra.mxu1 %v6820_v51  ;;  %v6822_v13 = vld [vmem:[#allocation97_spill] sm:$0xff]  ;;  %v6824_v38 = vld [vmem:[#allocation24_spill] sm:$0xff] }
 0x149   :  { %v845_v55 = vpop.f32.mrf.mxu1  ;;  %2106 = vmatprep.mubr.f32.mxu0 %v6545_v57  ;;  %2437 = vmatprep.mubr.f32.mxu1 %v6545_v57 }
 0x14a   :  { %6818 = vst [vmem:[#allocation100_spill] sm:$0xff] %v5366_v54  ;;  %v514_v56 = vpop.f32.mrf.mxu0  ;;  %v5372_v27 = vadd.f32 %v845_v55, %v492_v53  ;;  %2772 = vmatprep.subr.mxu1 %v6822_v13  ;;  %2549 = vmatpush1.msra.mxu0 %v5142_v3  ;;  %v6825_v54 = vld [vmem:[#allocation99_spill] sm:$0xff] }
 0x14b   :  { %v850_v2 = vpop.f32.mrf.mxu1  ;;  %2439 = vmatmul.mubr.f32.gmra.mxu1 %v6753_v18  ;;  %2552 = vmatprep.subr.mxu0 %v5156_v44 }
 0x14c   :  { %6821 = vst [vmem:[#allocation20_spill] sm:$0xff] %v5372_v27  ;;  %v523_v24 = vpop.f32.mrf.mxu0  ;;  %v5378_v14 = vadd.f32 %v850_v2, %v501_v23  ;;  %2112 = vmatmul.mubr.f32.gmra.mxu0 %v6824_v38  ;;  %2774 = vmatpush1.msra.mxu1 %v6825_v54  ;;  %v6828_v38 = vld [vmem:[#allocation25_spill] sm:$0xff] }
 0x14d   :  { %v852_v51 = vpop.f32.mrf.mxu1  ;;  %2117 = vmatprep.mubr.f32.mxu0 %v6545_v57  ;;  %2444 = vmatprep.mubr.f32.mxu1 %v6545_v57 }
 0x14e   :  { %6823 = vst [vmem:[#allocation34_spill] sm:$0xff] %v5378_v14  ;;  %v525_v55 = vpop.f32.mrf.mxu0  ;;  %v5384_v53 = vadd.f32 %v852_v51, %v503_v17  ;;  %2776 = vmatprep.subr.mxu1 %v5108_v41  ;;  %2555 = vmatpush1.msra.mxu0 %v5165_v39 }
 0x14f   :  { %v857_v18 = vpop.f32.mrf.mxu1  ;;  %2446 = vmatmul.mubr.f32.gmra.mxu1 %v6756_v30  ;;  %2558 = vmatprep.subr.mxu0 %v5178_v42  ;;  %v6830_v30 = vld [vmem:[#allocation101_spill] sm:$0xff] }
 0x150   :  { %6826 = vst [vmem:[#allocation22_spill] sm:$0xff] %v5384_v53  ;;  %v534_v2 = vpop.f32.mrf.mxu0  ;;  %v5390_v23 = vadd.f32 %v857_v18, %v512_v35  ;;  %2123 = vmatmul.mubr.f32.gmra.mxu0 %v6828_v38  ;;  %2778 = vmatpush1.msra.mxu1 %v5120_v28  ;;  %v6831_v18 = vand.u32 4294901760, %v4819_v49  ;;  %v6835_v49 = vand.u32 4294901760, %v4829_v37 }
 0x151   :  { %v859_v14 = vpop.f32.mrf.mxu1  ;;  %2451 = vmatprep.mubr.f32.mxu1 %v6545_v57  ;;  %2561 = vmatpush1.msra.mxu0 %v5187_v32 }
 0x152   :  { %6827 = vst [vmem:[#allocation97_spill] sm:$0xff] %v5390_v23  ;;  %v536_v51 = vpop.f32.mrf.mxu0  ;;  %v5396_v17 = vadd.f32 %v859_v14, %v514_v56  ;;  %2594 = vmatprep.mubr.f32.mxu0 %v6545_v57  ;;  %2780 = vmatprep.subr.mxu1 %v6830_v30  ;;  %v6833_v23 = vld [vmem:[#allocation41_spill] sm:$0xff] }
 0x153   :  { %v864_v53 = vpop.f32.mrf.mxu1  ;;  %2453 = vmatmul.mubr.f32.gmra.mxu1 %v6758_v58  ;;  %2967 = vmatprep.subr.mxu0 %v6831_v18  ;;  %v6881_v58 = vld [vmem:[#allocation33_spill] sm:$0xff] }
 0x154   :  { %6829 = vst [vmem:[#allocation24_spill] sm:$0xff] %v5396_v17  ;;  %v5403_v35 = vadd.f32 %v864_v53, %v523_v24  ;;  %v5405_v38 = vpop.f32.mrf.mxu0  ;;  %2597 = vmatmul.mubr.f32.vlgmr.msra.gmra.mxu0 %v6833_v23  ;;  %2782 = vmatpush1.msra.mxu1 %v5144_v6  ;;  %v6836_v53 = vand.u32 4294901760, %v4834_v7  ;;  %v6840_v7 = vand.u32 4294901760, %v4846_v10  ;;  %v6844_v10 = vand.u32 4294901760, %v4876_v45 }
 0x155   :  { %v866_v56 = vpop.f32.mrf.mxu1  ;;  %2458 = vmatprep.mubr.f32.mxu1 %v6545_v57  ;;  %2602 = vmatprep.mubr.f32.mxu0 %v6545_v57  ;;  %v6848_v45 = vand.u32 4294901760, %v4902_v36  ;;  %v6852_v36 = vand.u32 4294901760, %v4926_v59  ;;  %v6856_v59 = vand.u32 4294901760, %v4952_v61  ;;  %v6860_v61 = vand.u32 4294901760, %v4969_v19  ;;  %v6864_v19 = vld [vmem:[#allocation37_spill] sm:$0xff] }
 0x156   :  { %6832 = vst [vmem:[#allocation99_spill] sm:$0xff] %v5403_v35  ;;  %v5411_v14 = vadd.f32 %v866_v56, %v525_v55  ;;  %v5413_v17 = vpop.f32.mrf.mxu0  ;;  %2784 = vmatprep.subr.mxu1 %v5153_v48  ;;  %2971 = vmatpush1.msra.mxu0 %v6835_v49  ;;  %v6838_v35 = vld [vmem:[#allocation44_spill] sm:$0xff]  ;;  %v6841_v49 = vld [vmem:[#allocation42_spill] sm:$0xff] }
 0x157   :  { %v871_v24 = vpop.f32.mrf.mxu1  ;;  %2460 = vmatmul.mubr.f32.gmra.mxu1 %v4592_v29  ;;  %2975 = vmatprep.subr.mxu0 %v6836_v53  ;;  %v6843_v53 = vld [vmem:[#allocation52_spill] sm:$0xff] }
 0x158   :  { %6834 = vst [vmem:[#allocation25_spill] sm:$0xff] %v5411_v14  ;;  %v5421_v23 = vadd.f32 %v871_v24, %v534_v2  ;;  %v5423_v18 = vpop.f32.mrf.mxu0  ;;  %2605 = vmatmul.mubr.f32.gmra.mxu0 %v6838_v35  ;;  %2786 = vmatpush1.msra.mxu1 %v5168_v60  ;;  %v6842_v35 = vand.u32 4294901760, %v4863_v40  ;;  %v6880_v14 = vld [vmem:[#allocation74_spill] sm:$0xff] }
 0x159   :  { %v873_v55 = vpop.f32.mrf.mxu1  ;;  %2610 = vmatprep.mubr.f32.mxu0 %v6545_v57  ;;  %2819 = vmatprep.mubr.f32.mxu1 %v6545_v57 }
 0x15a   :  { %6837 = vst [vmem:[#allocation101_spill] sm:$0xff] %v5421_v23  ;;  %v5429_v37 = vadd.f32 %v873_v55, %v536_v51  ;;  %v5431_v56 = vpop.f32.mrf.mxu0  ;;  %3238 = vmatprep.subr.mxu1 %v4802_v20  ;;  %2979 = vmatpush1.msra.mxu0 %v6840_v7  ;;  %v6845_v55 = vld [vmem:[#allocation46_spill] sm:$0xff]  ;;  %v6846_v7 = vand.u32 4294901760, %v4889_v52 }
 0x15b   :  { %v5436_v2 = vpop.f32.mrf.mxu1  ;;  %2823 = vmatmul.mubr.f32.vlgmr.msra.gmra.mxu1 %v6841_v49  ;;  %2983 = vmatprep.subr.mxu0 %v6842_v35  ;;  %v6847_v49 = vld [vmem:[#allocation53_spill] sm:$0xff] }
 0x15c   :  { %6839 = vst [vmem:[#allocation41_spill] sm:$0xff] %v5429_v37  ;;  %v5441_v24 = vpop.f32.mrf.mxu0  ;;  %2613 = vmatmul.mubr.f32.gmra.mxu0 %v6843_v53  ;;  %3240 = vmatpush1.msra.mxu1 %v4809_v26  ;;  %v6849_v53 = vld [vmem:[#allocation55_spill] sm:$0xff]  ;;  %v6871_v37 = vld [vmem:[#allocation29_spill] sm:$0xff] }
 0x15d   :  { %v5445_v51 = vpop.f32.mrf.mxu1  ;;  %2618 = vmatprep.mubr.f32.mxu0 %v6545_v57  ;;  %2828 = vmatprep.mubr.f32.mxu1 %v6545_v57 }
 0x15e   :  { %v5449_v20 = vpop.f32.mrf.mxu0  ;;  %3242 = vmatprep.subr.mxu1 %v4813_v63  ;;  %2987 = vmatpush1.msra.mxu0 %v6844_v10  ;;  %v6850_v10 = vand.u32 4294901760, %v4914_v62 }
 0x15f   :  { %v5454_v40 = vpop.f32.mrf.mxu1  ;;  %2832 = vmatmul.mubr.f32.gmra.mxu1 %v6845_v55  ;;  %2991 = vmatprep.subr.mxu0 %v6846_v7  ;;  %v6851_v55 = vld [vmem:[#allocation54_spill] sm:$0xff] }
 0x160   :  { %v5459_v26 = vpop.f32.mrf.mxu0  ;;  %2621 = vmatmul.mubr.f32.gmra.mxu0 %v6847_v49  ;;  %3244 = vmatpush1.msra.mxu1 %v4824_v33  ;;  %v6853_v49 = vld [vmem:[#allocation56_spill] sm:$0xff] }
 0x161   :  { %v5463_v35 = vpop.f32.mrf.mxu1  ;;  %2626 = vmatprep.mubr.f32.mxu0 %v6545_v57  ;;  %2837 = vmatprep.mubr.f32.mxu1 %v6545_v57 }
 0x162   :  { %v5467_v63 = vpop.f32.mrf.mxu0  ;;  %3246 = vmatprep.subr.mxu1 %v4840_v5  ;;  %2995 = vmatpush1.msra.mxu0 %v6848_v45  ;;  %v6854_v45 = vand.u32 4294901760, %v4940_v9 }
 0x163   :  { %v5472_v52 = vpop.f32.mrf.mxu1  ;;  %2841 = vmatmul.mubr.f32.gmra.mxu1 %v6849_v53  ;;  %2999 = vmatprep.subr.mxu0 %v6850_v10  ;;  %v6855_v53 = vld [vmem:[#allocation60_spill] sm:$0xff] }
 0x164   :  { %v5477_v33 = vpop.f32.mrf.mxu0  ;;  %2629 = vmatmul.mubr.f32.gmra.mxu0 %v6851_v55  ;;  %3248 = vmatpush1.msra.mxu1 %v4851_v47  ;;  %v6857_v55 = vld [vmem:[#allocation59_spill] sm:$0xff] }
 0x165   :  { %v5481_v7 = vpop.f32.mrf.mxu1  ;;  %2634 = vmatprep.mubr.f32.mxu0 %v6545_v57  ;;  %2846 = vmatprep.mubr.f32.mxu1 %v6545_v57 }
 0x166   :  { %v5485_v5 = vpop.f32.mrf.mxu0  ;;  %3250 = vmatprep.subr.mxu1 %v4865_v15  ;;  %3003 = vmatpush1.msra.mxu0 %v6852_v36  ;;  %v6858_v36 = vand.u32 4294901760, %v4957_v46 }
 0x167   :  { %v5490_v62 = vpop.f32.mrf.mxu1  ;;  %2850 = vmatmul.mubr.f32.gmra.mxu1 %v6853_v49  ;;  %3007 = vmatprep.subr.mxu0 %v6854_v45  ;;  %v6859_v49 = vld [vmem:[#allocation65_spill] sm:$0xff] }
 0x168   :  { %v5495_v47 = vpop.f32.mrf.mxu0  ;;  %2637 = vmatmul.mubr.f32.gmra.mxu0 %v6855_v53  ;;  %3252 = vmatpush1.msra.mxu1 %v4878_v0  ;;  %v6861_v53 = vld [vmem:[#allocation64_spill] sm:$0xff] }
 0x169   :  { %v5499_v10 = vpop.f32.mrf.mxu1  ;;  %2642 = vmatprep.mubr.f32.mxu0 %v6545_v57  ;;  %2855 = vmatprep.mubr.f32.mxu1 %v6545_v57 }
 0x16a   :  { %v5503_v15 = vpop.f32.mrf.mxu0  ;;  %3254 = vmatprep.subr.mxu1 %v4891_v22  ;;  %3011 = vmatpush1.msra.mxu0 %v6856_v59  ;;  %v6862_v59 = vand.u32 4294901760, %v4986_v4 }
 0x16b   :  { %v5508_v9 = vpop.f32.mrf.mxu1  ;;  %2859 = vmatmul.mubr.f32.gmra.mxu1 %v6857_v55  ;;  %3015 = vmatprep.subr.mxu0 %v6858_v36  ;;  %v6863_v55 = vld [vmem:[#allocation66_spill] sm:$0xff] }
 0x16c   :  { %v5513_v0 = vpop.f32.mrf.mxu0  ;;  %2645 = vmatmul.mubr.f32.gmra.mxu0 %v6859_v49  ;;  %3256 = vmatpush1.msra.mxu1 %v4904_v25  ;;  %v6865_v49 = vand.u32 4294901760, %v6864_v19  ;;  %v6873_v19 = vld [vmem:[#allocation31_spill] sm:$0xff] }
 0x16d   :  { %v5517_v45 = vpop.f32.mrf.mxu1  ;;  %2650 = vmatprep.mubr.f32.mxu0 %v6545_v57  ;;  %2864 = vmatprep.mubr.f32.mxu1 %v6545_v57 }
 0x16e   :  { %v5521_v22 = vpop.f32.mrf.mxu0  ;;  %3258 = vmatprep.subr.mxu1 %v4916_v8  ;;  %3019 = vmatpush1.msra.mxu0 %v6860_v61  ;;  %v6866_v61 = vld [vmem:[#allocation68_spill] sm:$0xff] }
 0x16f   :  { %v5526_v46 = vpop.f32.mrf.mxu1  ;;  %2868 = vmatmul.mubr.f32.gmra.mxu1 %v6861_v53  ;;  %3023 = vmatprep.subr.mxu0 %v6862_v59  ;;  %v6867_v53 = vld [vmem:[#allocation14_spill] sm:$0xff] }
 0x170   :  { %v5531_v25 = vpop.f32.mrf.mxu0  ;;  %2653 = vmatmul.mubr.f32.gmra.mxu0 %v6863_v55  ;;  %3260 = vmatpush1.msra.mxu1 %v4928_v31  ;;  %v6868_v59 = vand.u32 4294901760, %v6867_v53  ;;  %v6870_v55 = vld [vmem:[#allocation73_spill] sm:$0xff] }
 0x171   :  { %v5535_v36 = vpop.f32.mrf.mxu1  ;;  %2658 = vmatprep.mubr.f32.mxu0 %v6545_v57  ;;  %2873 = vmatprep.mubr.f32.mxu1 %v6545_v57 }
 0x172   :  { %v5539_v8 = vpop.f32.mrf.mxu0  ;;  %3262 = vmatprep.subr.mxu1 %v6779_v16  ;;  %3027 = vmatpush1.msra.mxu0 %v6865_v49  ;;  %v6874_v49 = vld [vmem:[#allocation26_spill] sm:$0xff] }
 0x173   :  { %v5544_v4 = vpop.f32.mrf.mxu1  ;;  %2877 = vmatmul.mubr.f32.gmra.mxu1 %v6866_v61  ;;  %3031 = vmatprep.subr.mxu0 %v6868_v59  ;;  %v6875_v61 = vand.u32 4294901760, %v6874_v49  ;;  %v6876_v59 = vld [vmem:[#allocation72_spill] sm:$0xff]  ;;  %v6884_v49 = vld [vmem:[#allocation13_spill] sm:$0xff] }
 0x174   :  { %v5549_v31 = vpop.f32.mrf.mxu0  ;;  %2661 = vmatmul.mubr.f32.gmra.mxu0 %v6870_v55  ;;  %3264 = vmatpush1.msra.mxu1 %v6871_v37  ;;  %v6877_v55 = vld [vmem:[#allocation15_spill] sm:$0xff] }
 0x175   :  { %6869 = vst [vmem:[#allocation44_spill] sm:$0xff] %v5549_v31  ;;  %v5553_v23 = vpop.f32.mrf.mxu1  ;;  %2666 = vmatprep.mubr.f32.mxu0 %v6545_v57  ;;  %2882 = vmatprep.mubr.f32.mxu1 %v6545_v57  ;;  %v6878_v29 = vand.u32 4294901760, %v6877_v55  ;;  %v6887_v55 = vld [vmem:[#allocation76_spill] sm:$0xff] }
 0x176   :  { %v5557_v16 = vpop.f32.mrf.mxu0  ;;  %3266 = vmatprep.subr.mxu1 %v6873_v19  ;;  %3035 = vmatpush1.msra.mxu0 %v6875_v61  ;;  %v6885_v61 = vld [vmem:[#allocation32_spill] sm:$0xff] }
 0x177   :  { %6872 = vst [vmem:[#allocation42_spill] sm:$0xff] %v5557_v16  ;;  %v5562_v53 = vpop.f32.mrf.mxu1  ;;  %2886 = vmatmul.mubr.f32.gmra.mxu1 %v6876_v59  ;;  %3039 = vmatprep.subr.mxu0 %v6878_v29  ;;  %v6886_v59 = vand.u32 4294901760, %v6885_v61  ;;  %v6891_v16 = vld [vmem:[#allocation81_spill] sm:$0xff]  ;;  %v6894_v61 = vld [vmem:[#allocation35_spill] sm:$0xff] }
 0x178   :  { %v5567_v37 = vpop.f32.mrf.mxu0  ;;  %2669 = vmatmul.mubr.f32.gmra.mxu0 %v6880_v14  ;;  %3268 = vmatpush1.msra.mxu1 %v6881_v58  ;;  %v6888_v14 = vld [vmem:[#allocation36_spill] sm:$0xff] }
 0x179   :  { %6879 = vst [vmem:[#allocation52_spill] sm:$0xff] %v5567_v37  ;;  %v5571_v27 = vpop.f32.mrf.mxu1  ;;  %2674 = vmatprep.mubr.f32.mxu0 %v6545_v57  ;;  %2891 = vmatprep.mubr.f32.mxu1 %v6545_v57  ;;  %v6889_v37 = vand.u32 4294901760, %v6888_v14 }
 0x17a   :  { %6882 = vst [vmem:[#allocation46_spill] sm:$0xff] %v5571_v27  ;;  %v5575_v19 = vpop.f32.mrf.mxu0  ;;  %3270 = vmatprep.subr.mxu1 %v6884_v49  ;;  %3043 = vmatpush1.msra.mxu0 %v6886_v59  ;;  %v6892_v27 = vld [vmem:[#allocation38_spill] sm:$0xff]  ;;  %v6895_v59 = vand.u32 4294901760, %v6894_v61  ;;  %v6902_v61 = vand.u32 4294901760, %v6811_v34 }
 0x17b   :  { %6883 = vst [vmem:[#allocation53_spill] sm:$0xff] %v5575_v19  ;;  %v5580_v29 = vpop.f32.mrf.mxu1  ;;  %2895 = vmatmul.mubr.f32.gmra.mxu1 %v6887_v55  ;;  %3047 = vmatprep.subr.mxu0 %v6889_v37  ;;  %v6896_v55 = vld [vmem:[#allocation80_spill] sm:$0xff] }
 0x17c   :  { %v5585_v58 = vpop.f32.mrf.mxu0  ;;  %2677 = vmatmul.mubr.f32.gmra.mxu0 %v6891_v16  ;;  %3272 = vmatpush1.msra.mxu1 %v6892_v27  ;;  %v6897_v16 = vld [vmem:[#allocation96_spill] sm:$0xff] }
 0x17d   :  { %6890 = vst [vmem:[#allocation55_spill] sm:$0xff] %v5585_v58  ;;  %v5589_v31 = vpop.f32.mrf.mxu1  ;;  %2682 = vmatprep.mubr.f32.mxu0 %v6545_v57  ;;  %2900 = vmatprep.mubr.f32.mxu1 %v6545_v57  ;;  %v6898_v14 = vand.u32 4294901760, %v6897_v16  ;;  %v6900_v58 = vld [vmem:[#allocation85_spill] sm:$0xff]  ;;  %v6901_v19 = vld [vmem:[#allocation28_spill] sm:$0xff]  ;;  %v6906_v16 = vld [vmem:[#allocation86_spill] sm:$0xff] }
 0x17e   :  { %6893 = vst [vmem:[#allocation54_spill] sm:$0xff] %v5589_v31  ;;  %v5593_v49 = vpop.f32.mrf.mxu0  ;;  %3274 = vmatprep.subr.mxu1 %v6802_v43  ;;  %3051 = vmatpush1.msra.mxu0 %v6895_v59 }
 0x17f   :  { %v5598_v37 = vpop.f32.mrf.mxu1  ;;  %2904 = vmatmul.mubr.f32.gmra.mxu1 %v6896_v55  ;;  %3055 = vmatprep.subr.mxu0 %v6898_v14  ;;  %v6903_v55 = vld [vmem:[#allocation84_spill] sm:$0xff]  ;;  %v6907_v14 = vld [vmem:[#allocation17_spill] sm:$0xff] }
 0x180   :  { %v5603_v27 = vpop.f32.mrf.mxu0  ;;  %2685 = vmatmul.mubr.f32.gmra.mxu0 %v6900_v58  ;;  %3276 = vmatpush1.msra.mxu1 %v6901_v19  ;;  %v6904_v58 = vand.u32 4294901760, %v6812_v1 }
 0x181   :  { %6899 = vst [vmem:[#allocation56_spill] sm:$0xff] %v5603_v27  ;;  %v5607_v31 = vpop.f32.mrf.mxu1  ;;  %2690 = vmatprep.mubr.f32.mxu0 %v6545_v57  ;;  %2909 = vmatprep.mubr.f32.mxu1 %v6545_v57 }
 0x182   :  { %v5611_v43 = vpop.f32.mrf.mxu0  ;;  %3278 = vmatprep.subr.mxu1 %v6810_v50  ;;  %3059 = vmatpush1.msra.mxu0 %v6902_v61  ;;  %v6908_v50 = vand.u32 4294901760, %v5118_v21  ;;  %v6909_v61 = vld [vmem:[#allocation88_spill] sm:$0xff] }
 0x183   :  { %v5616_v59 = vpop.f32.mrf.mxu1  ;;  %2913 = vmatmul.mubr.f32.gmra.mxu1 %v6903_v55  ;;  %3063 = vmatprep.subr.mxu0 %v6904_v58  ;;  %v6910_v55 = vand.u32 4294901760, %v5132_v12 }
 0x184   :  { %v5621_v19 = vpop.f32.mrf.mxu0  ;;  %2693 = vmatmul.mubr.f32.gmra.mxu0 %v6906_v16  ;;  %3280 = vmatpush1.msra.mxu1 %v6907_v14  ;;  %v6911_v16 = vld [vmem:[#allocation92_spill] sm:$0xff]  ;;  %v6912_v14 = vld [vmem:[#allocation47_spill] sm:$0xff] }
 0x185   :  { %6905 = vst [vmem:[#allocation60_spill] sm:$0xff] %v5621_v19  ;;  %v5625_v27 = vpop.f32.mrf.mxu1  ;;  %2698 = vmatprep.mubr.f32.mxu0 %v6545_v57  ;;  %2918 = vmatprep.mubr.f32.mxu1 %v6545_v57 }
 0x186   :  { %v5629_v34 = vpop.f32.mrf.mxu0  ;;  %3282 = vmatprep.subr.mxu1 %v6817_v11  ;;  %3067 = vmatpush1.msra.mxu0 %v6908_v50  ;;  %v6914_v11 = vand.u32 4294901760, %v5142_v3  ;;  %v6915_v50 = vld [vmem:[#allocation91_spill] sm:$0xff] }
 0x187   :  { %v5634_v1 = vpop.f32.mrf.mxu1  ;;  %2922 = vmatmul.mubr.f32.gmra.mxu1 %v6909_v61  ;;  %3071 = vmatprep.subr.mxu0 %v6910_v55  ;;  %v6916_v61 = vand.u32 4294901760, %v5156_v44  ;;  %v3643_v44 = vlaneseq }
 0x188   :  { %v5639_v58 = vpop.f32.mrf.mxu0  ;;  %2701 = vmatmul.mubr.f32.gmra.mxu0 %v6911_v16  ;;  %3284 = vmatpush1.msra.mxu1 %v6912_v14  ;;  %v6918_v16 = vld [vmem:[#allocation94_spill] sm:$0xff] }
 0x189   :  { %v5643_v19 = vpop.f32.mrf.mxu1  ;;  %2706 = vmatprep.mubr.f32.mxu0 %v6545_v57  ;;  %2927 = vmatprep.mubr.f32.mxu1 %v6545_v57 }
 0x18a   :  { %v5647_v21 = vpop.f32.mrf.mxu0  ;;  %3286 = vmatprep.subr.mxu1 %v6822_v13  ;;  %3075 = vmatpush1.msra.mxu0 %v6914_v11  ;;  %v6920_v13 = vand.u32 4294901760, %v5165_v39 }
 0x18b   :  { %6913 = vst [vmem:[#allocation59_spill] sm:$0xff] %v5647_v21  ;;  %v5652_v12 = vpop.f32.mrf.mxu1  ;;  %2931 = vmatmul.mubr.f32.gmra.mxu1 %v6915_v50  ;;  %3079 = vmatprep.subr.mxu0 %v6916_v61  ;;  %v6922_v50 = vld [vmem:[#allocation93_spill] sm:$0xff] }
 0x18c   :  { %v5657_v55 = vpop.f32.mrf.mxu0  ;;  %2709 = vmatmul.mubr.f32.gmra.mxu0 %v6918_v16  ;;  %3288 = vmatpush1.msra.mxu1 %v6825_v54  ;;  %v6923_v54 = vand.u32 4294901760, %v5178_v42  ;;  %v6925_v16 = vld [vmem:[#allocation95_spill] sm:$0xff]  ;;  %v5688_v42 = vshrl.u32 %v3643_v44, 7 }
 0x18d   :  { %6917 = vst [vmem:[#allocation65_spill] sm:$0xff] %v5657_v55  ;;  %v5661_v14 = vpop.f32.mrf.mxu1  ;;  %2714 = vmatprep.mubr.f32.mxu0 %v6545_v57  ;;  %2936 = vmatprep.mubr.f32.mxu1 %v6545_v57 }
 0x18e   :  { %v5665_v3 = vpop.f32.mrf.mxu0  ;;  %3290 = vmatprep.subr.mxu1 %v5108_v41  ;;  %3083 = vmatpush1.msra.mxu0 %v6920_v13  ;;  %v6927_v41 = vand.u32 4294901760, %v5187_v32  ;;  %6929 = vst [vmem:[#allocation73_spill] sm:$0xff] %v5688_v42  ;;  %v6934_v32 = vld [vmem:[#allocation45_spill] sm:$0xff] }
 0x18f   :  { %6919 = vst [vmem:[#allocation64_spill] sm:$0xff] %v5665_v3  ;;  %v5670_v11 = vpop.f32.mrf.mxu1  ;;  %2940 = vmatmul.mubr.f32.gmra.mxu1 %v6922_v50  ;;  %3087 = vmatprep.subr.mxu0 %v6923_v54  ;;  %v6931_v50 = vld [vmem:[#allocation21_spill] sm:$0xff]  ;;  %v6932_v54 = vld [vmem:[#allocation40_spill] sm:$0xff] }
 0x190   :  { %6921 = vst [vmem:[#allocation66_spill] sm:$0xff] %v5670_v11  ;;  %v5675_v61 = vpop.f32.mrf.mxu0  ;;  %2717 = vmatmul.mubr.f32.gmra.mxu0 %v6925_v16  ;;  %3292 = vmatpush1.msra.mxu1 %v5120_v28 }
 0x191   :  { %6924 = vst [vmem:[#allocation37_spill] sm:$0xff] %v5675_v61  ;;  %v5679_v3 = vpop.f32.mrf.mxu1  ;;  %2945 = vmatprep.mubr.f32.mxu1 %v6545_v57  ;;  %3091 = vmatpush1.msra.mxu0 %v6927_v41  ;;  %v3645_v41 = vsub.s32 0, %v5688_v42  ;;  %v5706_v61 = vld [vmem:[#allocation8] sm:$0xf] }
 0x192   :  { %6926 = vst [vmem:[#allocation68_spill] sm:$0xff] %v5679_v3  ;;  %v5684_v39 = vpop.f32.mrf.mxu0  ;;  %3124 = vmatprep.mubr.f32.mxu0 %v6545_v57  ;;  %3294 = vmatprep.subr.mxu1 %v6830_v30  ;;  %v1009_v30 = vadd.f32 %v5405_v38, %v6934_v32  ;;  %v6938_v38 = vld [vmem:[#allocation43_spill] sm:$0xff] }
 0x193   :  { %6928 = vst [vmem:[#allocation14_spill] sm:$0xff] %v5684_v39  ;;  %v5690_v13 = vpop.f32.mrf.mxu1  ;;  %2949 = vmatmul.mubr.f32.gmra.mxu1 %v6931_v50  ;;  %v6936_v39 = vld [vmem:[#allocation23_spill] sm:$0xff] }
 0x194   :  { %6930 = vst [vmem:[#allocation29_spill] sm:$0xff] %v5690_v13  ;;  %v1537_v28 = vpop.f32.mrf.mxu0  ;;  %3126 = vmatmul.mubr.f32.vlgmr.msra.gmra.mxu0 %v6932_v54  ;;  %3296 = vmatpush1.msra.mxu1 %v5144_v6  ;;  %v3649_v6 = vsub.s32 1, %v5688_v42  ;;  %v1235_v3 = vadd.f32 %v5436_v2, %v1009_v30  ;;  %v5722_v2 = vrot.slane %v5706_v61, %v3645_v41 }
 0x195   :  { %v5695_v16 = vpop.f32.mrf.mxu1  ;;  %2954 = vmatprep.mubr.f32.mxu1 %v6545_v57  ;;  %3131 = vmatprep.mubr.f32.mxu0 %v6545_v57 }
 0x196   :  { %6933 = vst [vmem:[#allocation31_spill] sm:$0xff] %v5695_v16  ;;  %v1539_v44 = vpop.f32.mrf.mxu0  ;;  %3298 = vmatprep.subr.mxu1 %v5153_v48  ;;  %v6937_v16 = vld [vmem:[#allocation51_spill] sm:$0xff] }
 0x197   :  { %v5703_v50 = vpop.f32.mrf.mxu1  ;;  %2958 = vmatmul.mubr.f32.gmra.mxu1 %v6936_v39  ;;  %v1011_v13 = vadd.f32 %v5413_v17, %v6937_v16  ;;  %v6940_v39 = vld [vmem:[#allocation61_spill] sm:$0xff]  ;;  %v6941_v16 = vld [vmem:[#allocation63_spill] sm:$0xff] }
 0x198   :  { %6935 = vst [vmem:[#allocation26_spill] sm:$0xff] %v5703_v50  ;;  %v1544_v55 = vpop.f32.mrf.mxu0  ;;  %3133 = vmatmul.mubr.f32.gmra.mxu0 %v6938_v38  ;;  %3300 = vmatpush1.msra.mxu1 %v5168_v60  ;;  %v1017_v32 = vadd.f32 %v5423_v18, %v6940_v39  ;;  %v1538_v50 = vadd.f32 %v1537_v28, %v1235_v3  ;;  %v6943_v3 = vld [vmem:[#allocation102_spill] sm:$0xff] }
 0x199   :  { %v5714_v48 = vpop.f32.mrf.mxu1  ;;  %3138 = vmatprep.mubr.f32.mxu0 %v6545_v57  ;;  %3333 = vmatprep.mubr.f32.mxu1 %v6545_v57  ;;  %v1237_v42 = vadd.f32 %v5445_v51, %v1011_v13  ;;  %v1019_v30 = vadd.f32 %v5431_v56, %v6941_v16  ;;  %v6942_v51 = vld [vmem:[#allocation48_spill] sm:$0xff]  ;;  %v1025_v13 = vadd.f32 %v5441_v24, %v6943_v3 }
 0x19a   :  { %6939 = vst [vmem:[#allocation72_spill] sm:$0xff] %v5714_v48  ;;  %v1546_v17 = vpop.f32.mrf.mxu0  ;;  %v5728_v48 = vrot.slane %v5706_v61, %v3649_v6  ;;  %v1244_v11 = vadd.f32 %v5454_v40, %v1017_v32 }
 0x19b   :  { %v1746_v60 = vpop.f32.mrf.mxu1  ;;  %3335 = vmatmul.mubr.f32.vlgmr.msra.gmra.mxu1 %v6932_v54  ;;  %v1540_v21 = vadd.f32 %v1539_v44, %v1237_v42  ;;  %v1246_v56 = vadd.f32 %v5463_v35, %v1019_v30  ;;  %v6944_v42 = vld [vmem:[#allocation67_spill] sm:$0xff]  ;;  %v6945_v35 = vld [vmem:[#allocation49_spill] sm:$0xff] }
 0x19c   :  { %v1551_v18 = vpop.f32.mrf.mxu0  ;;  %v1747_v39 = vadd.f32 %v1746_v60, %v1538_v50  ;;  %3140 = vmatmul.mubr.f32.gmra.mxu0 %v6942_v51  ;;  %3340 = vmatprep.mubr.f32.mxu1 %v6545_v57  ;;  %v1545_v54 = vadd.f32 %v1544_v55, %v1244_v11  ;;  %v1027_v44 = vadd.f32 %v5449_v20, %v6944_v42  ;;  %v6946_v55 = vld [vmem:[#allocation103_spill] sm:$0xff] }
 0x19d   :  { %v1748_v28 = vpop.f32.mrf.mxu1  ;;  %3145 = vmatprep.mubr.f32.mxu0 %v6545_v57  ;;  %v1253_v50 = vadd.f32 %v5472_v52, %v1025_v13  ;;  %v1547_v16 = vadd.f32 %v1546_v17, %v1246_v56 }
 0x19e   :  { %v3663_v41 = vadd.f32 %v5722_v2, %v1747_v39  ;;  %v1553_v6 = vpop.f32.mrf.mxu0  ;;  %v1749_v40 = vadd.f32 %v1748_v28, %v1540_v21  ;;  %v1033_v21 = vadd.f32 %v5459_v26, %v6946_v55  ;;  %v1255_v20 = vadd.f32 %v5481_v7, %v1027_v44  ;;  %v6947_v39 = vld [vmem:[#allocation71_spill] sm:$0xff] }
 0x19f   :  { %v1753_v32 = vpop.f32.mrf.mxu1  ;;  %3342 = vmatmul.mubr.f32.gmra.mxu1 %v6938_v38  ;;  %v1552_v52 = vadd.f32 %v1551_v18, %v1253_v50  ;;  %v1035_v13 = vadd.f32 %v5467_v63, %v6947_v39  ;;  %v6948_v18 = vld [vmem:[#allocation50_spill] sm:$0xff] }
 0x1a0   :  { %3727 = vst [vmem:[#allocation9] sm:$0xff] %v3663_v41  ;;  %v3664_v24 = vadd.f32 %v5728_v48, %v1749_v40  ;;  %v1558_v60 = vpop.f32.mrf.mxu0  ;;  %v1754_v3 = vadd.f32 %v1753_v32, %v1545_v54  ;;  %3147 = vmatmul.mubr.f32.gmra.mxu0 %v6945_v35  ;;  %3347 = vmatprep.mubr.f32.mxu1 %v6545_v57  ;;  %v6949_v40 = vld [vmem:[#allocation104_spill] sm:$0xff]  ;;  %v6950_v32 = vld [vmem:[#allocation75_spill] sm:$0xff] }
 0x1a1   :  { %v1755_v11 = vpop.f32.mrf.mxu1  ;;  %3152 = vmatprep.mubr.f32.mxu0 %v6545_v57  ;;  %v1262_v28 = vadd.f32 %v5490_v62, %v1033_v21  ;;  %v1554_v26 = vadd.f32 %v1553_v6, %v1255_v20  ;;  %v1041_v42 = vadd.f32 %v5477_v33, %v6949_v40  ;;  %v1264_v63 = vadd.f32 %v5499_v10, %v1035_v13 }
 0x1a2   :  { %3728 = vst [vmem:[#allocation9 + $0x8] sm:$0xff] %v3664_v24  ;;  %v3667_v38 = vadd.f32 %v5722_v2, %v1754_v3  ;;  %v1560_v17 = vpop.f32.mrf.mxu0  ;;  %v1756_v30 = vadd.f32 %v1755_v11, %v1547_v16  ;;  %v1043_v16 = vadd.f32 %v5485_v5, %v6950_v32  ;;  %v6952_v11 = vld [vmem:[#allocation105_spill] sm:$0xff] }
 0x1a3   :  { %v1760_v56 = vpop.f32.mrf.mxu1  ;;  %3349 = vmatmul.mubr.f32.gmra.mxu1 %v6942_v51  ;;  %v1559_v62 = vadd.f32 %v1558_v60, %v1262_v28  ;;  %v1271_v24 = vadd.f32 %v5508_v9, %v1041_v42  ;;  %v1561_v33 = vadd.f32 %v1560_v17, %v1264_v63  ;;  %v6951_v60 = vld [vmem:[#allocation57_spill] sm:$0xff]  ;;  %v1049_v20 = vadd.f32 %v5495_v47, %v6952_v11  ;;  %v6956_v63 = vld [vmem:[#allocation83_spill] sm:$0xff] }
 0x1a4   :  { %3731 = vst [vmem:[#allocation9 + $0x20] sm:$0xff] %v3667_v38  ;;  %v3668_v54 = vadd.f32 %v5728_v48, %v1756_v30  ;;  %v1565_v41 = vpop.f32.mrf.mxu0  ;;  %v1761_v7 = vadd.f32 %v1760_v56, %v1552_v52  ;;  %3154 = vmatmul.mubr.f32.gmra.mxu0 %v6948_v18  ;;  %3354 = vmatprep.mubr.f32.mxu1 %v6545_v57  ;;  %v6953_v30 = vld [vmem:[#allocation79_spill] sm:$0xff] }
 0x1a5   :  { %v1762_v44 = vpop.f32.mrf.mxu1  ;;  %3159 = vmatprep.mubr.f32.mxu0 %v6545_v57  ;;  %v1273_v5 = vadd.f32 %v5517_v45, %v1043_v16  ;;  %v1566_v9 = vadd.f32 %v1565_v41, %v1271_v24  ;;  %v1051_v39 = vadd.f32 %v5503_v15, %v6953_v30  ;;  %v1280_v13 = vadd.f32 %v5526_v46, %v1049_v20  ;;  %v6955_v41 = vld [vmem:[#allocation27_spill] sm:$0xff]  ;;  %v6957_v16 = vld [vmem:[#allocation62_spill] sm:$0xff] }
 0x1a6   :  { %3732 = vst [vmem:[#allocation9 + $0x28] sm:$0xff] %v3668_v54  ;;  %v3671_v51 = vadd.f32 %v5722_v2, %v1761_v7  ;;  %v1567_v6 = vpop.f32.mrf.mxu0  ;;  %v1763_v50 = vadd.f32 %v1762_v44, %v1554_v26  ;;  %v6954_v54 = vld [vmem:[#allocation58_spill] sm:$0xff]  ;;  %v1057_v7 = vadd.f32 %v5513_v0, %v6955_v41 }
 0x1a7   :  { %v1767_v3 = vpop.f32.mrf.mxu1  ;;  %3356 = vmatmul.mubr.f32.gmra.mxu1 %v6945_v35  ;;  %v1568_v47 = vadd.f32 %v1567_v6, %v1273_v5  ;;  %v1282_v15 = vadd.f32 %v5535_v36, %v1051_v39  ;;  %v6958_v24 = vld [vmem:[#allocation106_spill] sm:$0xff] }
 0x1a8   :  { %3735 = vst [vmem:[#allocation9 + $0x40] sm:$0xff] %v3671_v51  ;;  %v3672_v55 = vadd.f32 %v5728_v48, %v1763_v50  ;;  %v1572_v21 = vpop.f32.mrf.mxu0  ;;  %v1768_v10 = vadd.f32 %v1767_v3, %v1559_v62  ;;  %3161 = vmatmul.mubr.f32.gmra.mxu0 %v6951_v60  ;;  %3361 = vmatprep.mubr.f32.mxu1 %v6545_v57 }
 0x1a9   :  { %v1769_v52 = vpop.f32.mrf.mxu1  ;;  %3166 = vmatprep.mubr.f32.mxu0 %v6545_v57  ;;  %v1573_v46 = vadd.f32 %v1572_v21, %v1280_v13  ;;  %v1059_v62 = vadd.f32 %v5521_v22, %v6956_v63  ;;  %v1289_v51 = vadd.f32 %v5544_v4, %v1057_v7  ;;  %v1065_v3 = vadd.f32 %v5531_v25, %v6958_v24  ;;  %v6968_v63 = vld [vmem:[#allocation52_spill] sm:$0xff]  ;;  %v6971_v24 = vld [vmem:[#allocation53_spill] sm:$0xff] }
 0x1aa   :  { %3736 = vst [vmem:[#allocation9 + $0x48] sm:$0xff] %v3672_v55  ;;  %v3675_v35 = vadd.f32 %v5722_v2, %v1768_v10  ;;  %v1574_v38 = vpop.f32.mrf.mxu0  ;;  %v1770_v17 = vadd.f32 %v1769_v52, %v1561_v33 }
 0x1ab   :  { %v1774_v28 = vpop.f32.mrf.mxu1  ;;  %3363 = vmatmul.mubr.f32.gmra.mxu1 %v6948_v18  ;;  %v1575_v0 = vadd.f32 %v1574_v38, %v1282_v15  ;;  %v1291_v22 = vadd.f32 %v5553_v23, %v1059_v62  ;;  %v1298_v20 = vadd.f32 %v5562_v53, %v1065_v3  ;;  %v6961_v38 = vld [vmem:[#allocation107_spill] sm:$0xff] }
 0x1ac   :  { %3739 = vst [vmem:[#allocation9 + $0x60] sm:$0xff] %v3675_v35  ;;  %v3676_v56 = vadd.f32 %v5728_v48, %v1770_v17  ;;  %v1579_v26 = vpop.f32.mrf.mxu0  ;;  %v1775_v45 = vadd.f32 %v1774_v28, %v1566_v9  ;;  %3168 = vmatmul.mubr.f32.gmra.mxu0 %v6954_v54  ;;  %3368 = vmatprep.mubr.f32.mxu1 %v6545_v57  ;;  %v6960_v35 = vld [vmem:[#allocation69_spill] sm:$0xff]  ;;  %v6962_v17 = vld [vmem:[#allocation44_spill] sm:$0xff] }
 0x1ad   :  { %v1776_v40 = vpop.f32.mrf.mxu1  ;;  %3173 = vmatprep.mubr.f32.mxu0 %v6545_v57  ;;  %v1580_v4 = vadd.f32 %v1579_v26, %v1289_v51  ;;  %v1073_v30 = vadd.f32 %v6962_v17, %v6961_v38  ;;  %v6964_v26 = vld [vmem:[#allocation90_spill] sm:$0xff] }
 0x1ae   :  { %3740 = vst [vmem:[#allocation9 + $0x68] sm:$0xff] %v3676_v56  ;;  %v3679_v18 = vadd.f32 %v5722_v2, %v1775_v45  ;;  %v1581_v42 = vpop.f32.mrf.mxu0  ;;  %v1777_v44 = vadd.f32 %v1776_v40, %v1568_v47  ;;  %v6965_v45 = vld [vmem:[#allocation42_spill] sm:$0xff] }
 0x1af   :  { %v1781_v6 = vpop.f32.mrf.mxu1  ;;  %3370 = vmatmul.mubr.f32.gmra.mxu1 %v6951_v60  ;;  %v6959_v60 = vld [vmem:[#allocation87_spill] sm:$0xff]  ;;  %v1582_v25 = vadd.f32 %v1581_v42, %v1291_v22  ;;  %v1307_v41 = vadd.f32 %v5580_v29, %v1073_v30  ;;  %v6966_v42 = vld [vmem:[#allocation70_spill] sm:$0xff] }
 0x1b0   :  { %3743 = vst [vmem:[#allocation9 + $0x80] sm:$0xff] %v3679_v18  ;;  %v3680_v50 = vadd.f32 %v5728_v48, %v1777_v44  ;;  %v1586_v32 = vpop.f32.mrf.mxu0  ;;  %v1782_v36 = vadd.f32 %v1781_v6, %v1573_v46  ;;  %3175 = vmatmul.mubr.f32.gmra.mxu0 %v6957_v16  ;;  %3375 = vmatprep.mubr.f32.mxu1 %v6545_v57  ;;  %v6967_v44 = vld [vmem:[#allocation39_spill] sm:$0xff]  ;;  %v6969_v29 = vld [vmem:[#allocation54_spill] sm:$0xff] }
 0x1b1   :  { %v1783_v33 = vpop.f32.mrf.mxu1  ;;  %3180 = vmatprep.mubr.f32.mxu0 %v6545_v57  ;;  %v1067_v11 = vadd.f32 %v5539_v8, %v6959_v60  ;;  %v6963_v8 = vld [vmem:[#allocation46_spill] sm:$0xff]  ;;  %v1587_v13 = vadd.f32 %v1586_v32, %v1298_v20  ;;  %v1081_v62 = vadd.f32 %v6968_v63, %v6967_v44  ;;  %v6972_v60 = vld [vmem:[#allocation77_spill] sm:$0xff]  ;;  %v6974_v20 = vld [vmem:[#allocation55_spill] sm:$0xff] }
 0x1b2   :  { %3744 = vst [vmem:[#allocation9 + $0x88] sm:$0xff] %v3680_v50  ;;  %v3683_v55 = vadd.f32 %v5722_v2, %v1782_v36  ;;  %v1588_v21 = vpop.f32.mrf.mxu0  ;;  %v1784_v10 = vadd.f32 %v1783_v33, %v1575_v0  ;;  %v6975_v38 = vld [vmem:[#allocation98_spill] sm:$0xff] }
 0x1b3   :  { %v1788_v52 = vpop.f32.mrf.mxu1  ;;  %3377 = vmatmul.mubr.f32.gmra.mxu1 %v6954_v54  ;;  %v1300_v53 = vadd.f32 %v6963_v8, %v1067_v11  ;;  %v1075_v54 = vadd.f32 %v6965_v45, %v6964_v26  ;;  %v1316_v33 = vadd.f32 %v5598_v37, %v1081_v62  ;;  %v6973_v11 = vld [vmem:[#allocation30_spill] sm:$0xff]  ;;  %v1091_v17 = vadd.f32 %v5593_v49, %v6975_v38 }
 0x1b4   :  { %3747 = vst [vmem:[#allocation9 + $0xa0] sm:$0xff] %v3683_v55  ;;  %v3684_v5 = vadd.f32 %v5728_v48, %v1784_v10  ;;  %v1593_v9 = vpop.f32.mrf.mxu0  ;;  %v1789_v23 = vadd.f32 %v1788_v52, %v1580_v4  ;;  %3182 = vmatmul.mubr.f32.gmra.mxu0 %v6960_v35  ;;  %3382 = vmatprep.mubr.f32.mxu1 %v6545_v57  ;;  %v6980_v62 = vld [vmem:[#allocation82_spill] sm:$0xff] }
 0x1b5   :  { %v1790_v39 = vpop.f32.mrf.mxu1  ;;  %3187 = vmatprep.mubr.f32.mxu0 %v6545_v57  ;;  %v1589_v40 = vadd.f32 %v1588_v21, %v1300_v53  ;;  %v1309_v6 = vadd.f32 %v6969_v29, %v1075_v54  ;;  %v1594_v0 = vadd.f32 %v1593_v9, %v1307_v41  ;;  %v1089_v52 = vadd.f32 %v6974_v20, %v6973_v11  ;;  %v6982_v29 = vld [vmem:[#allocation60_spill] sm:$0xff] }
 0x1b6   :  { %3748 = vst [vmem:[#allocation9 + $0xa8] sm:$0xff] %v3684_v5  ;;  %v3687_v28 = vadd.f32 %v5722_v2, %v1789_v23  ;;  %v1595_v47 = vpop.f32.mrf.mxu0  ;;  %v1791_v56 = vadd.f32 %v1790_v39, %v1582_v25  ;;  %v1327_v49 = vadd.f32 %v5625_v27, %v1091_v17 }
 0x1b7   :  { %v1795_v7 = vpop.f32.mrf.mxu1  ;;  %3384 = vmatmul.mubr.f32.gmra.mxu1 %v6957_v16  ;;  %v6970_v16 = vld [vmem:[#allocation19_spill] sm:$0xff]  ;;  %v1596_v4 = vadd.f32 %v1595_v47, %v1309_v6  ;;  %v1325_v30 = vadd.f32 %v5616_v59, %v1089_v52  ;;  %v6977_v47 = vld [vmem:[#allocation100_spill] sm:$0xff] }
 0x1b8   :  { %3751 = vst [vmem:[#allocation9 + $0xc0] sm:$0xff] %v3687_v28  ;;  %v3688_v15 = vadd.f32 %v5728_v48, %v1791_v56  ;;  %v1600_v46 = vpop.f32.mrf.mxu0  ;;  %v1796_v18 = vadd.f32 %v1795_v7, %v1587_v13  ;;  %3189 = vmatmul.mubr.f32.gmra.mxu0 %v6966_v42  ;;  %3389 = vmatprep.mubr.f32.mxu1 %v6545_v57  ;;  %v6976_v28 = vld [vmem:[#allocation78_spill] sm:$0xff]  ;;  %v6978_v56 = vld [vmem:[#allocation56_spill] sm:$0xff] }
 0x1b9   :  { %v1797_v51 = vpop.f32.mrf.mxu1  ;;  %3194 = vmatprep.mubr.f32.mxu0 %v6545_v57  ;;  %v1083_v3 = vadd.f32 %v6971_v24, %v6970_v16  ;;  %v1601_v5 = vadd.f32 %v1600_v46, %v1316_v33  ;;  %v1097_v26 = vadd.f32 %v6978_v56, %v6977_v47  ;;  %v6983_v16 = vld [vmem:[#allocation22_spill] sm:$0xff] }
 0x1ba   :  { %3752 = vst [vmem:[#allocation9 + $0xc8] sm:$0xff] %v3688_v15  ;;  %v3691_v50 = vadd.f32 %v5722_v2, %v1796_v18  ;;  %v1602_v32 = vpop.f32.mrf.mxu0  ;;  %v1798_v36 = vadd.f32 %v1797_v51, %v1589_v40  ;;  %v6979_v40 = vld [vmem:[#allocation20_spill] sm:$0xff]  ;;  %v6981_v51 = vld [vmem:[#allocation34_spill] sm:$0xff]  ;;  %v1107_v24 = vadd.f32 %v5629_v34, %v6983_v16 }
 0x1bb   :  { %v1802_v22 = vpop.f32.mrf.mxu1  ;;  %3391 = vmatmul.mubr.f32.gmra.mxu1 %v6960_v35  ;;  %v1318_v37 = vadd.f32 %v5607_v31, %v1083_v3  ;;  %v1099_v15 = vadd.f32 %v5611_v43, %v6979_v40  ;;  %v1334_v46 = vadd.f32 %v5634_v1, %v1097_v26  ;;  %v1105_v6 = vadd.f32 %v6982_v29, %v6981_v51  ;;  %v7001_v16 = vld [vmem:[#allocation14_spill] sm:$0xff] }
 0x1bc   :  { %3755 = vst [vmem:[#allocation9 + $0xe0] sm:$0xff] %v3691_v50  ;;  %v3692_v55 = vadd.f32 %v5728_v48, %v1798_v36  ;;  %v1607_v21 = vpop.f32.mrf.mxu0  ;;  %v1803_v10 = vadd.f32 %v1802_v22, %v1594_v0  ;;  %3196 = vmatmul.mubr.f32.gmra.mxu0 %v6972_v60  ;;  %3396 = vmatprep.mubr.f32.mxu1 %v6545_v57 }
 0x1bd   :  { %v1804_v25 = vpop.f32.mrf.mxu1  ;;  %3201 = vmatprep.mubr.f32.mxu0 %v6545_v57  ;;  %v1603_v8 = vadd.f32 %v1602_v32, %v1318_v37  ;;  %v1608_v59 = vadd.f32 %v1607_v21, %v1325_v30  ;;  %v1336_v43 = vadd.f32 %v5643_v19, %v1099_v15  ;;  %v1343_v3 = vadd.f32 %v5652_v12, %v1105_v6  ;;  %v6984_v21 = vld [vmem:[#allocation89_spill] sm:$0xff]  ;;  %v6986_v37 = vld [vmem:[#allocation24_spill] sm:$0xff]  ;;  %v6999_v6 = vld [vmem:[#allocation31_spill] sm:$0xff] }
 0x1be   :  { %3756 = vst [vmem:[#allocation9 + $0xe8] sm:$0xff] %v3692_v55  ;;  %v3695_v9 = vadd.f32 %v5722_v2, %v1803_v10  ;;  %v1609_v23 = vpop.f32.mrf.mxu0  ;;  %v1805_v35 = vadd.f32 %v1804_v25, %v1596_v4  ;;  %v6985_v10 = vld [vmem:[#allocation97_spill] sm:$0xff]  ;;  %v1345_v34 = vadd.f32 %v5661_v14, %v1107_v24 }
 0x1bf   :  { %v1809_v39 = vpop.f32.mrf.mxu1  ;;  %3398 = vmatmul.mubr.f32.gmra.mxu1 %v6966_v42  ;;  %v1610_v42 = vadd.f32 %v1609_v23, %v1327_v49  ;;  %v6988_v23 = vld [vmem:[#allocation66_spill] sm:$0xff] }
 0x1c0   :  { %3759 = vst [vmem:[#allocation9 + $0x100] sm:$0xff] %v3695_v9  ;;  %v3696_v53 = vadd.f32 %v5728_v48, %v1805_v35  ;;  %v1614_v13 = vpop.f32.mrf.mxu0  ;;  %v1810_v31 = vadd.f32 %v1809_v39, %v1601_v5  ;;  %3203 = vmatmul.mubr.f32.gmra.mxu0 %v6976_v28  ;;  %3403 = vmatprep.mubr.f32.mxu1 %v6545_v57  ;;  %v6987_v5 = vld [vmem:[#allocation59_spill] sm:$0xff]  ;;  %v6989_v39 = vld [vmem:[#allocation16_spill] sm:$0xff] }
 0x1c1   :  { %v1811_v45 = vpop.f32.mrf.mxu1  ;;  %3208 = vmatprep.mubr.f32.mxu0 %v6545_v57  ;;  %v1615_v1 = vadd.f32 %v1614_v13, %v1334_v46  ;;  %v1115_v9 = vadd.f32 %v6987_v5, %v6986_v37 }
 0x1c2   :  { %3760 = vst [vmem:[#allocation9 + $0x108] sm:$0xff] %v3696_v53  ;;  %v3699_v54 = vadd.f32 %v5722_v2, %v1810_v31  ;;  %v1616_v41 = vpop.f32.mrf.mxu0  ;;  %v1812_v7 = vadd.f32 %v1811_v45, %v1603_v8  ;;  %v6990_v8 = vld [vmem:[#allocation99_spill] sm:$0xff]  ;;  %v6991_v53 = vld [vmem:[#allocation65_spill] sm:$0xff] }
 0x1c3   :  { %v1816_v18 = vpop.f32.mrf.mxu1  ;;  %3405 = vmatmul.mubr.f32.gmra.mxu1 %v6972_v60  ;;  %v1617_v22 = vadd.f32 %v1616_v41, %v1336_v43  ;;  %v1113_v60 = vadd.f32 %v5639_v58, %v6985_v10  ;;  %v1121_v13 = vadd.f32 %v6991_v53, %v6990_v8 }
 0x1c4   :  { %3763 = vst [vmem:[#allocation9 + $0x120] sm:$0xff] %v3699_v54  ;;  %v3700_v44 = vadd.f32 %v5728_v48, %v1812_v7  ;;  %v1621_v63 = vpop.f32.mrf.mxu0  ;;  %v1817_v27 = vadd.f32 %v1816_v18, %v1608_v59  ;;  %3210 = vmatmul.mubr.f32.gmra.mxu0 %v6980_v62  ;;  %3410 = vmatprep.mubr.f32.mxu1 %v6545_v57  ;;  %v6993_v59 = vld [vmem:[#allocation25_spill] sm:$0xff]  ;;  %v6994_v54 = vld [vmem:[#allocation64_spill] sm:$0xff] }
 0x1c5   :  { %v1818_v0 = vpop.f32.mrf.mxu1  ;;  %3215 = vmatprep.mubr.f32.mxu0 %v6545_v57  ;;  %v1622_v12 = vadd.f32 %v1621_v63, %v1343_v3  ;;  %v1352_v35 = vadd.f32 %v6988_v23, %v1113_v60  ;;  %v1123_v41 = vadd.f32 %v6994_v54, %v6993_v59  ;;  %v6995_v7 = vld [vmem:[#allocation29_spill] sm:$0xff]  ;;  %v6996_v63 = vld [vmem:[#allocation18_spill] sm:$0xff]  ;;  %v7003_v60 = vld [vmem:[#allocation72_spill] sm:$0xff] }
 0x1c6   :  { %3764 = vst [vmem:[#allocation9 + $0x128] sm:$0xff] %v3700_v44  ;;  %v3703_v50 = vadd.f32 %v5722_v2, %v1817_v27  ;;  %v1623_v32 = vpop.f32.mrf.mxu0  ;;  %v1819_v36 = vadd.f32 %v1818_v0, %v1610_v42  ;;  %v1361_v40 = vadd.f32 %v6995_v7, %v1121_v13  ;;  %v6997_v27 = vld [vmem:[#allocation101_spill] sm:$0xff] }
 0x1c7   :  { %v1823_v33 = vpop.f32.mrf.mxu1  ;;  %3412 = vmatmul.mubr.f32.gmra.mxu1 %v6976_v28  ;;  %v1624_v58 = vadd.f32 %v1623_v32, %v1345_v34  ;;  %v6992_v28 = vld [vmem:[#allocation68_spill] sm:$0xff]  ;;  %v1363_v0 = vadd.f32 %v6999_v6, %v1123_v41 }
 0x1c8   :  { %3767 = vst [vmem:[#allocation9 + $0x140] sm:$0xff] %v3703_v50  ;;  %v3704_v4 = vadd.f32 %v5728_v48, %v1819_v36  ;;  %v1628_v55 = vpop.f32.mrf.mxu0  ;;  %v1824_v19 = vadd.f32 %v1823_v33, %v1615_v1  ;;  %3217 = vmatmul.mubr.f32.gmra.mxu0 %v6984_v21  ;;  %3417 = vmatprep.mubr.f32.mxu1 %v6545_v57  ;;  %v7000_v36 = vld [vmem:[#allocation41_spill] sm:$0xff]  ;;  %v7002_v33 = vld [vmem:[#allocation26_spill] sm:$0xff] }
 0x1c9   :  { %v1825_v11 = vpop.f32.mrf.mxu1  ;;  %3222 = vmatprep.mubr.f32.mxu0 %v6545_v57  ;;  %v1354_v47 = vadd.f32 %v6992_v28, %v1115_v9  ;;  %v1629_v56 = vadd.f32 %v1628_v55, %v1352_v35  ;;  %v1131_v24 = vadd.f32 %v7001_v16, %v7000_v36 }
 0x1ca   :  { %3768 = vst [vmem:[#allocation9 + $0x148] sm:$0xff] %v3704_v4  ;;  %v3707_v20 = vadd.f32 %v5722_v2, %v1824_v19  ;;  %v1630_v52 = vpop.f32.mrf.mxu0  ;;  %v1826_v25 = vadd.f32 %v1825_v11, %v1617_v22 }
 0x1cb   :  { %v1830_v38 = vpop.f32.mrf.mxu1  ;;  %3419 = vmatmul.mubr.f32.gmra.mxu1 %v6980_v62  ;;  %v1631_v46 = vadd.f32 %v1630_v52, %v1354_v47  ;;  %v6998_v62 = vld [vmem:[#allocation37_spill] sm:$0xff]  ;;  %v1372_v11 = vadd.f32 %v7003_v60, %v1131_v24 }
 0x1cc   :  { %3771 = vst [vmem:[#allocation9 + $0x160] sm:$0xff] %v3707_v20  ;;  %v3708_v17 = vadd.f32 %v5728_v48, %v1826_v25  ;;  %v1635_v30 = vpop.f32.mrf.mxu0  ;;  %v1831_v14 = vadd.f32 %v1830_v38, %v1622_v12  ;;  %3224 = vmatmul.mubr.f32.gmra.mxu0 %v6989_v39  ;;  %3424 = vmatprep.mubr.f32.mxu1 %v6545_v57 }
 0x1cd   :  { %v1832_v31 = vpop.f32.mrf.mxu1  ;;  %3229 = vmatprep.mubr.f32.mxu0 %v6545_v57  ;;  %v1129_v51 = vadd.f32 %v6998_v62, %v6997_v27  ;;  %v1636_v43 = vadd.f32 %v1635_v30, %v1361_v40 }
 0x1ce   :  { %3772 = vst [vmem:[#allocation9 + $0x168] sm:$0xff] %v3708_v17  ;;  %v3711_v26 = vadd.f32 %v5722_v2, %v1831_v14  ;;  %v1637_v45 = vpop.f32.mrf.mxu0  ;;  %v1833_v49 = vadd.f32 %v1832_v31, %v1624_v58 }
 0x1cf   :  { %v1837_v15 = vpop.f32.mrf.mxu1  ;;  %3426 = vmatmul.mubr.f32.gmra.mxu1 %v6984_v21  ;;  %v1370_v22 = vadd.f32 %v7002_v33, %v1129_v51  ;;  %v1638_v4 = vadd.f32 %v1637_v45, %v1363_v0 }
 0x1d0   :  { %3775 = vst [vmem:[#allocation9 + $0x180] sm:$0xff] %v3711_v26  ;;  %v3712_v18 = vadd.f32 %v5728_v48, %v1833_v49  ;;  %v1642_v42 = vpop.f32.mrf.mxu0  ;;  %v1838_v44 = vadd.f32 %v1837_v15, %v1629_v56  ;;  %3231 = vmatmul.mubr.f32.gmra.mxu0 %v6996_v63  ;;  %3431 = vmatprep.mubr.f32.mxu1 %v6545_v57 }
 0x1d1   :  { %v1839_v29 = vpop.f32.mrf.mxu1  ;;  %v1643_v34 = vadd.f32 %v1642_v42, %v1370_v22 }
 0x1d2   :  { %3776 = vst [vmem:[#allocation9 + $0x188] sm:$0xff] %v3712_v18  ;;  %v3715_v1 = vadd.f32 %v5722_v2, %v1838_v44  ;;  %v1644_v50 = vpop.f32.mrf.mxu0  ;;  %v1840_v32 = vadd.f32 %v1839_v29, %v1631_v46 }
 0x1d3   :  { %v1844_v3 = vpop.f32.mrf.mxu1  ;;  %3433 = vmatmul.mubr.f32.gmra.mxu1 %v6989_v39  ;;  %v1645_v37 = vadd.f32 %v1644_v50, %v1372_v11 }
 0x1d4   :  { %3779 = vst [vmem:[#allocation9 + $0x1a0] sm:$0xff] %v3715_v1  ;;  %v3716_v55 = vadd.f32 %v5728_v48, %v1840_v32  ;;  %v1845_v19 = vadd.f32 %v1844_v3, %v1636_v43  ;;  %v1959_v21 = vpop.f32.mrf.mxu0  ;;  %3438 = vmatprep.mubr.f32.mxu1 %v6545_v57 }
 0x1d5   :  { %v1846_v10 = vpop.f32.mrf.mxu1 }
 0x1d6   :  { %3780 = vst [vmem:[#allocation9 + $0x1a8] sm:$0xff] %v3716_v55  ;;  %v3719_v12 = vadd.f32 %v5722_v2, %v1845_v19  ;;  %v1847_v20 = vadd.f32 %v1846_v10, %v1638_v4  ;;  %v1961_v52 = vpop.f32.mrf.mxu0 }
 0x1d7   :  { %v1851_v25 = vpop.f32.mrf.mxu1  ;;  %3440 = vmatmul.mubr.f32.gmra.mxu1 %v6996_v63 }
 0x1d8   :  { %3783 = vst [vmem:[#allocation9 + $0x1c0] sm:$0xff] %v3719_v12  ;;  %v3720_v5 = vadd.f32 %v5728_v48, %v1847_v20  ;;  %v1852_v9 = vadd.f32 %v1851_v25, %v1643_v34  ;;  %v1970_v23 = vpop.f32.mrf.mxu0 }
 0x1d9   :  { %v1853_v35 = vpop.f32.mrf.mxu1 }
 0x1da   :  { %3784 = vst [vmem:[#allocation9 + $0x1c8] sm:$0xff] %v3720_v5  ;;  %v3723_v57 = vadd.f32 %v5722_v2, %v1852_v9  ;;  %v1854_v38 = vadd.f32 %v1853_v35, %v1645_v37  ;;  %v1972_v58 = vpop.f32.mrf.mxu0 }
 0x1db   :  { %v2356_v17 = vpop.f32.mrf.mxu1 }
 0x1dc   :  { %3787 = vst [vmem:[#allocation9 + $0x1e0] sm:$0xff] %v3723_v57  ;;  %v3724_v30 = vadd.f32 %v5728_v48, %v1854_v38  ;;  %v1981_v14 = vpop.f32.mrf.mxu0  ;;  %v5905_v39 = vadd.f32 %v2356_v17, %v1959_v21 }
 0x1dd   :  { %v2358_v8 = vpop.f32.mrf.mxu1 }
 0x1de   :  { %3788 = vst [vmem:[#allocation9 + $0x1e8] sm:$0xff] %v3724_v30  ;;  %v1983_v53 = vpop.f32.mrf.mxu0  ;;  %v5907_v13 = vadd.f32 %v2358_v8, %v1961_v52 }
 0x1df   :  { %v2363_v31 = vpop.f32.mrf.mxu1 }
 0x1e0   :  { %v1992_v28 = vpop.f32.mrf.mxu0  ;;  %v5909_v47 = vadd.f32 %v2363_v31, %v1970_v23 }
 0x1e1   :  { %v2365_v56 = vpop.f32.mrf.mxu1 }
 0x1e2   :  { %v1994_v2 = vpop.f32.mrf.mxu0  ;;  %v5911_v26 = vadd.f32 %v2365_v56, %v1972_v58 }
 0x1e3   :  { %v2370_v45 = vpop.f32.mrf.mxu1 }
 0x1e4   :  { %v2003_v49 = vpop.f32.mrf.mxu0  ;;  %v5913_v59 = vadd.f32 %v2370_v45, %v1981_v14 }
 0x1e5   :  { %v2372_v48 = vpop.f32.mrf.mxu1 }
 0x1e6   :  { %v2005_v54 = vpop.f32.mrf.mxu0  ;;  %v5915_v41 = vadd.f32 %v2372_v48, %v1983_v53 }
 0x1e7   :  { %v2377_v7 = vpop.f32.mrf.mxu1 }
 0x1e8   :  { %v2014_v40 = vpop.f32.mrf.mxu0  ;;  %v5917_v15 = vadd.f32 %v2377_v7, %v1992_v28 }
 0x1e9   :  { %v2379_v46 = vpop.f32.mrf.mxu1 }
 0x1ea   :  { %v2016_v18 = vpop.f32.mrf.mxu0  ;;  %v5919_v42 = vadd.f32 %v2379_v46, %v1994_v2 }
 0x1eb   :  { %v2384_v44 = vpop.f32.mrf.mxu1 }
 0x1ec   :  { %v2025_v63 = vpop.f32.mrf.mxu0  ;;  %v5921_v27 = vadd.f32 %v2384_v44, %v2003_v49 }
 0x1ed   :  { %v2386_v62 = vpop.f32.mrf.mxu1 }
 0x1ee   :  { %v2027_v51 = vpop.f32.mrf.mxu0  ;;  %v5923_v29 = vadd.f32 %v2386_v62, %v2005_v54 }
 0x1ef   :  { %v2391_v6 = vpop.f32.mrf.mxu1 }
 0x1f0   :  { %v2036_v0 = vpop.f32.mrf.mxu0  ;;  %v5925_v43 = vadd.f32 %v2391_v6, %v2014_v40 }
 0x1f1   :  { %v2393_v1 = vpop.f32.mrf.mxu1 }
 0x1f2   :  { %v2038_v50 = vpop.f32.mrf.mxu0  ;;  %v5927_v32 = vadd.f32 %v2393_v1, %v2016_v18 }
 0x1f3   :  { %v2398_v36 = vpop.f32.mrf.mxu1 }
 0x1f4   :  { %v2047_v16 = vpop.f32.mrf.mxu0  ;;  %v5929_v24 = vadd.f32 %v2398_v36, %v2025_v63 }
 0x1f5   :  { %v2400_v3 = vpop.f32.mrf.mxu1 }
 0x1f6   :  { %v2049_v33 = vpop.f32.mrf.mxu0  ;;  %v5931_v22 = vadd.f32 %v2400_v3, %v2027_v51 }
 0x1f7   :  { %v2405_v4 = vpop.f32.mrf.mxu1 }
 0x1f8   :  { %v2058_v55 = vpop.f32.mrf.mxu0  ;;  %v5933_v19 = vadd.f32 %v2405_v4, %v2036_v0 }
 0x1f9   :  { %v2407_v21 = vpop.f32.mrf.mxu1 }
 0x1fa   :  { %v2060_v10 = vpop.f32.mrf.mxu0  ;;  %v5935_v60 = vadd.f32 %v2407_v21, %v2038_v50 }
 0x1fb   :  { %v2412_v11 = vpop.f32.mrf.mxu1 }
 0x1fc   :  { %v2069_v34 = vpop.f32.mrf.mxu0  ;;  %v5937_v12 = vadd.f32 %v2412_v11, %v2047_v16 }
 0x1fd   :  { %v2414_v20 = vpop.f32.mrf.mxu1 }
 0x1fe   :  { %v2071_v52 = vpop.f32.mrf.mxu0  ;;  %v5939_v25 = vadd.f32 %v2414_v20, %v2049_v33 }
 0x1ff   :  { %v2419_v37 = vpop.f32.mrf.mxu1 }
 0x200   :  { %7004 = vst [vmem:[#allocation15_spill] sm:$0xff] %v5939_v25  ;;  %v2080_v5 = vpop.f32.mrf.mxu0  ;;  %v5941_v9 = vadd.f32 %v2419_v37, %v2058_v55 }
 0x201   :  { %v2421_v23 = vpop.f32.mrf.mxu1 }
 0x202   :  { %7005 = vst [vmem:[#allocation74_spill] sm:$0xff] %v5941_v9  ;;  %v2082_v35 = vpop.f32.mrf.mxu0  ;;  %v5943_v57 = vadd.f32 %v2421_v23, %v2060_v10 }
 0x203   :  { %v2426_v38 = vpop.f32.mrf.mxu1 }
 0x204   :  { %7006 = vst [vmem:[#allocation33_spill] sm:$0xff] %v5943_v57  ;;  %v2091_v58 = vpop.f32.mrf.mxu0  ;;  %v5945_v17 = vadd.f32 %v2426_v38, %v2069_v34 }
 0x205   :  { %v2428_v30 = vpop.f32.mrf.mxu1 }
 0x206   :  { %7007 = vst [vmem:[#allocation13_spill] sm:$0xff] %v5945_v17  ;;  %v2093_v14 = vpop.f32.mrf.mxu0  ;;  %v5947_v8 = vadd.f32 %v2428_v30, %v2071_v52 }
 0x207   :  { %v2433_v53 = vpop.f32.mrf.mxu1 }
 0x208   :  { %7008 = vst [vmem:[#allocation32_spill] sm:$0xff] %v5947_v8  ;;  %v2102_v31 = vpop.f32.mrf.mxu0  ;;  %v5949_v28 = vadd.f32 %v2433_v53, %v2080_v5 }
 0x209   :  { %v2435_v56 = vpop.f32.mrf.mxu1 }
 0x20a   :  { %7009 = vst [vmem:[#allocation76_spill] sm:$0xff] %v5949_v28  ;;  %v2104_v2 = vpop.f32.mrf.mxu0  ;;  %v5951_v45 = vadd.f32 %v2435_v56, %v2082_v35 }
 0x20b   :  { %v2440_v49 = vpop.f32.mrf.mxu1 }
 0x20c   :  { %7010 = vst [vmem:[#allocation36_spill] sm:$0xff] %v5951_v45  ;;  %v2113_v48 = vpop.f32.mrf.mxu0  ;;  %v5953_v54 = vadd.f32 %v2440_v49, %v2091_v58 }
 0x20d   :  { %v2442_v7 = vpop.f32.mrf.mxu1 }
 0x20e   :  { %7011 = vst [vmem:[#allocation81_spill] sm:$0xff] %v5953_v54  ;;  %v2115_v40 = vpop.f32.mrf.mxu0  ;;  %v5955_v46 = vadd.f32 %v2442_v7, %v2093_v14 }
 0x20f   :  { %v2447_v18 = vpop.f32.mrf.mxu1 }
 0x210   :  { %7012 = vst [vmem:[#allocation38_spill] sm:$0xff] %v5955_v46  ;;  %v2124_v44 = vpop.f32.mrf.mxu0  ;;  %v5957_v63 = vadd.f32 %v2447_v18, %v2102_v31 }
 0x211   :  { %v2449_v62 = vpop.f32.mrf.mxu1 }
 0x212   :  { %7013 = vst [vmem:[#allocation35_spill] sm:$0xff] %v5957_v63  ;;  %v2126_v51 = vpop.f32.mrf.mxu0  ;;  %v5959_v6 = vadd.f32 %v2449_v62, %v2104_v2 }
 0x213   :  { %v2454_v0 = vpop.f32.mrf.mxu1 }
 0x214   :  { %7014 = vst [vmem:[#allocation80_spill] sm:$0xff] %v5959_v6  ;;  %v5961_v1 = vadd.f32 %v2454_v0, %v2113_v48  ;;  %v5963_v50 = vpop.f32.mrf.mxu0 }
 0x215   :  { %v2456_v36 = vpop.f32.mrf.mxu1 }
 0x216   :  { %7015 = vst [vmem:[#allocation96_spill] sm:$0xff] %v5961_v1  ;;  %v5965_v16 = vadd.f32 %v2456_v36, %v2115_v40  ;;  %v5967_v3 = vpop.f32.mrf.mxu0 }
 0x217   :  { %v2461_v33 = vpop.f32.mrf.mxu1 }
 0x218   :  { %7016 = vst [vmem:[#allocation85_spill] sm:$0xff] %v5965_v16  ;;  %v5969_v4 = vadd.f32 %v2461_v33, %v2124_v44  ;;  %v5971_v55 = vpop.f32.mrf.mxu0 }
 0x219   :  { %v2463_v21 = vpop.f32.mrf.mxu1 }
 0x21a   :  { %7017 = vst [vmem:[#allocation28_spill] sm:$0xff] %v5969_v4  ;;  %v5973_v10 = vadd.f32 %v2463_v21, %v2126_v51  ;;  %v5975_v11 = vpop.f32.mrf.mxu0 }
 0x21b   :  { %v5977_v34 = vpop.f32.mrf.mxu1 }
 0x21c   :  { %7018 = vst [vmem:[#allocation84_spill] sm:$0xff] %v5973_v10  ;;  %v5979_v20 = vpop.f32.mrf.mxu0 }
 0x21d   :  { %v5981_v52 = vpop.f32.mrf.mxu1 }
 0x21e   :  { %v5983_v37 = vpop.f32.mrf.mxu0 }
 0x21f   :  { %v5985_v5 = vpop.f32.mrf.mxu1 }
 0x220   :  { %v5987_v23 = vpop.f32.mrf.mxu0 }
 0x221   :  { %v5989_v35 = vpop.f32.mrf.mxu1 }
 0x222   :  { %v5991_v38 = vpop.f32.mrf.mxu0 }
 0x223   :  { %v5993_v58 = vpop.f32.mrf.mxu1 }
 0x224   :  { %v5995_v30 = vpop.f32.mrf.mxu0 }
 0x225   :  { %v5997_v14 = vpop.f32.mrf.mxu1 }
 0x226   :  { %v5999_v53 = vpop.f32.mrf.mxu0 }
 0x227   :  { %v6001_v31 = vpop.f32.mrf.mxu1 }
 0x228   :  { %v6003_v56 = vpop.f32.mrf.mxu0 }
 0x229   :  { %v6005_v2 = vpop.f32.mrf.mxu1 }
 0x22a   :  { %v6007_v49 = vpop.f32.mrf.mxu0 }
 0x22b   :  { %v6009_v48 = vpop.f32.mrf.mxu1 }
 0x22c   :  { %v6011_v7 = vpop.f32.mrf.mxu0 }
 0x22d   :  { %v6013_v40 = vpop.f32.mrf.mxu1 }
 0x22e   :  { %v6015_v18 = vpop.f32.mrf.mxu0 }
 0x22f   :  { %v6017_v44 = vpop.f32.mrf.mxu1 }
 0x230   :  { %v6019_v62 = vpop.f32.mrf.mxu0 }
 0x231   :  { %v6021_v51 = vpop.f32.mrf.mxu1 }
 0x232   :  { %v6023_v0 = vpop.f32.mrf.mxu0 }
 0x233   :  { %v6025_v36 = vpop.f32.mrf.mxu1 }
 0x234   :  { %v6027_v33 = vpop.f32.mrf.mxu0 }
 0x235   :  { %v6029_v21 = vpop.f32.mrf.mxu1 }
 0x236   :  { %v6031_v10 = vpop.f32.mrf.mxu0 }
 0x237   :  { %7019 = vst [vmem:[#allocation86_spill] sm:$0xff] %v6031_v10  ;;  %v6033_v4 = vpop.f32.mrf.mxu1 }
 0x238   :  { %v6035_v16 = vpop.f32.mrf.mxu0 }
 0x239   :  { %7020 = vst [vmem:[#allocation17_spill] sm:$0xff] %v6035_v16  ;;  %v6037_v1 = vpop.f32.mrf.mxu1 }
 0x23a   :  { %7021 = vst [vmem:[#allocation88_spill] sm:$0xff] %v6037_v1  ;;  %v6039_v6 = vpop.f32.mrf.mxu0 }
 0x23b   :  { %7022 = vst [vmem:[#allocation92_spill] sm:$0xff] %v6039_v6  ;;  %v6041_v63 = vpop.f32.mrf.mxu1 }
 0x23c   :  { %7023 = vst [vmem:[#allocation47_spill] sm:$0xff] %v6041_v63  ;;  %v6043_v46 = vpop.f32.mrf.mxu0 }
 0x23d   :  { %7024 = vst [vmem:[#allocation91_spill] sm:$0xff] %v6043_v46  ;;  %v6045_v54 = vpop.f32.mrf.mxu1 }
 0x23e   :  { %7025 = vst [vmem:[#allocation94_spill] sm:$0xff] %v6045_v54  ;;  %v6047_v45 = vpop.f32.mrf.mxu0 }
 0x23f   :  { %7026 = vst [vmem:[#allocation93_spill] sm:$0xff] %v6047_v45  ;;  %v6049_v28 = vpop.f32.mrf.mxu1 }
 0x240   :  { %7027 = vst [vmem:[#allocation95_spill] sm:$0xff] %v6049_v28  ;;  %v6051_v8 = vpop.f32.mrf.mxu0 }
 0x241   :  { %7028 = vst [vmem:[#allocation21_spill] sm:$0xff] %v6051_v8  ;;  %v6053_v17 = vpop.f32.mrf.mxu1 }
 0x242   :  { %7029 = vst [vmem:[#allocation40_spill] sm:$0xff] %v6053_v17  ;;  %v6055_v57 = vpop.f32.mrf.mxu0 }
 0x243   :  { %7030 = vst [vmem:[#allocation45_spill] sm:$0xff] %v6055_v57  ;;  %v6057_v16 = vpop.f32.mrf.mxu1 }
 0x244   :  { %7031 = vst [vmem:[#allocation23_spill] sm:$0xff] %v6057_v16  ;;  %v6059_v9 = vpop.f32.mrf.mxu0 }
 0x245   :  { %7032 = vst [vmem:[#allocation51_spill] sm:$0xff] %v6059_v9  ;;  %v6061_v6 = vpop.f32.mrf.mxu1 }
 0x246   :  { %7033 = vst [vmem:[#allocation43_spill] sm:$0xff] %v6061_v6  ;;  %v6063_v63 = vpop.f32.mrf.mxu0 }
 0x247   :  { %7034 = vst [vmem:[#allocation61_spill] sm:$0xff] %v6063_v63  ;;  %v6065_v46 = vpop.f32.mrf.mxu1 }
 0x248   :  { %7035 = vst [vmem:[#allocation63_spill] sm:$0xff] %v6065_v46  ;;  %v6067_v54 = vpop.f32.mrf.mxu0 }
 0x249   :  { %7036 = vst [vmem:[#allocation48_spill] sm:$0xff] %v6067_v54  ;;  %v6069_v45 = vpop.f32.mrf.mxu1 }
 0x24a   :  { %7037 = vst [vmem:[#allocation102_spill] sm:$0xff] %v6069_v45  ;;  %v6071_v28 = vpop.f32.mrf.mxu0 }
 0x24b   :  { %7038 = vst [vmem:[#allocation67_spill] sm:$0xff] %v6071_v28  ;;  %v6073_v8 = vpop.f32.mrf.mxu1 }
 0x24c   :  { %7039 = vst [vmem:[#allocation49_spill] sm:$0xff] %v6073_v8  ;;  %v6075_v17 = vpop.f32.mrf.mxu0 }
 0x24d   :  { %7040 = vst [vmem:[#allocation103_spill] sm:$0xff] %v6075_v17  ;;  %v6077_v57 = vpop.f32.mrf.mxu1  ;;  %v2599_v17 = vadd.f32 %v5963_v50, %v5905_v39 }
 0x24e   :  { %7041 = vst [vmem:[#allocation71_spill] sm:$0xff] %v6077_v57  ;;  %v6079_v16 = vpop.f32.mrf.mxu0  ;;  %v7049_v57 = vld [vmem:[#allocation73_spill] sm:$0xff] }
 0x24f   :  { %7042 = vst [vmem:[#allocation50_spill] sm:$0xff] %v6079_v16  ;;  %v6081_v9 = vpop.f32.mrf.mxu1  ;;  %v3653_v10 = vsub.s32 2, %v7049_v57 }
 0x250   :  { %7043 = vst [vmem:[#allocation104_spill] sm:$0xff] %v6081_v9  ;;  %v6083_v6 = vpop.f32.mrf.mxu0  ;;  %v3657_v9 = vsub.s32 3, %v7049_v57 }
 0x251   :  { %7044 = vst [vmem:[#allocation75_spill] sm:$0xff] %v6083_v6  ;;  %v6085_v63 = vpop.f32.mrf.mxu1  ;;  %v2601_v6 = vadd.f32 %v5967_v3, %v5907_v13  ;;  %v6108_v1 = vrot.slane %v5706_v61, %v3653_v10  ;;  %v2609_v13 = vadd.f32 %v5975_v11, %v5911_v26 }
 0x252   :  { %7045 = vst [vmem:[#allocation57_spill] sm:$0xff] %v6085_v63  ;;  %v6087_v46 = vpop.f32.mrf.mxu0  ;;  %v6111_v57 = vrot.slane %v5706_v61, %v3657_v9  ;;  %v2617_v9 = vadd.f32 %v5983_v37, %v5915_v41 }
 0x253   :  { %7046 = vst [vmem:[#allocation105_spill] sm:$0xff] %v6087_v46  ;;  %v6089_v54 = vpop.f32.mrf.mxu1  ;;  %v2825_v46 = vadd.f32 %v5977_v34, %v2599_v17  ;;  %v2827_v39 = vadd.f32 %v5981_v52, %v2601_v6 }
 0x254   :  { %7047 = vst [vmem:[#allocation79_spill] sm:$0xff] %v6089_v54  ;;  %v3127_v45 = vpop.f32.mrf.mxu0 }
 0x255   :  { %v6091_v28 = vpop.f32.mrf.mxu1  ;;  %v3128_v50 = vadd.f32 %v3127_v45, %v2825_v46  ;;  %v2836_v46 = vadd.f32 %v5989_v35, %v2609_v13 }
 0x256   :  { %7048 = vst [vmem:[#allocation58_spill] sm:$0xff] %v6091_v28  ;;  %v3129_v8 = vpop.f32.mrf.mxu0  ;;  %v2607_v28 = vadd.f32 %v5971_v55, %v5909_v47  ;;  %v2615_v47 = vadd.f32 %v5979_v20, %v5913_v59  ;;  %v2623_v20 = vadd.f32 %v5987_v23, %v5917_v15 }
 0x257   :  { %v6096_v16 = vpop.f32.mrf.mxu1  ;;  %v3130_v3 = vadd.f32 %v3129_v8, %v2827_v39 }
 0x258   :  { %7050 = vst [vmem:[#allocation27_spill] sm:$0xff] %v6096_v16  ;;  %v3134_v63 = vpop.f32.mrf.mxu0  ;;  %v2834_v17 = vadd.f32 %v5985_v5, %v2607_v28  ;;  %v2843_v28 = vadd.f32 %v5993_v58, %v2615_v47  ;;  %v2852_v58 = vadd.f32 %v6001_v31, %v2623_v20  ;;  %v2633_v31 = vadd.f32 %v5999_v53, %v5923_v29 }
 0x259   :  { %v6102_v54 = vpop.f32.mrf.mxu1 }
 0x25a   :  { %7051 = vst [vmem:[#allocation83_spill] sm:$0xff] %v6102_v54  ;;  %v3136_v25 = vpop.f32.mrf.mxu0  ;;  %v3135_v6 = vadd.f32 %v3134_v63, %v2834_v17 }
 0x25b   :  { %v3336_v16 = vpop.f32.mrf.mxu1  ;;  %v3137_v8 = vadd.f32 %v3136_v25, %v2836_v46  ;;  %v2625_v25 = vadd.f32 %v5991_v38, %v5919_v42 }
 0x25c   :  { %v3141_v34 = vpop.f32.mrf.mxu0  ;;  %v3337_v54 = vadd.f32 %v3336_v16, %v3128_v50 }
 0x25d   :  { %v3338_v45 = vpop.f32.mrf.mxu1  ;;  %v3142_v52 = vadd.f32 %v3141_v34, %v2843_v28  ;;  %v2854_v17 = vadd.f32 %v6005_v2, %v2625_v25  ;;  %v2639_v2 = vadd.f32 %v6003_v56, %v5925_v43 }
 0x25e   :  { %v3665_v55 = vadd.f32 %v6108_v1, %v3337_v54  ;;  %v3143_v10 = vpop.f32.mrf.mxu0  ;;  %v3339_v61 = vadd.f32 %v3338_v45, %v3130_v3  ;;  %v2845_v54 = vadd.f32 %v5997_v14, %v2617_v9  ;;  %v2631_v14 = vadd.f32 %v5995_v30, %v5921_v27 }
 0x25f   :  { %v3343_v26 = vpop.f32.mrf.mxu1  ;;  %v2870_v28 = vadd.f32 %v6017_v44, %v2639_v2  ;;  %v2649_v44 = vadd.f32 %v6015_v18, %v5931_v22 }
 0x260   :  { %3729 = vst [vmem:[#allocation9 + $0x10] sm:$0xff] %v3665_v55  ;;  %v3666_v16 = vadd.f32 %v6111_v57, %v3339_v61  ;;  %v3148_v11 = vpop.f32.mrf.mxu0  ;;  %v3344_v59 = vadd.f32 %v3343_v26, %v3135_v6  ;;  %v3144_v39 = vadd.f32 %v3143_v10, %v2845_v54  ;;  %v2861_v45 = vadd.f32 %v6009_v48, %v2631_v14 }
 0x261   :  { %v3345_v63 = vpop.f32.mrf.mxu1  ;;  %v3149_v3 = vadd.f32 %v3148_v11, %v2852_v58  ;;  %v2863_v10 = vadd.f32 %v6013_v40, %v2633_v31  ;;  %v2641_v48 = vadd.f32 %v6007_v49, %v5927_v32  ;;  %v2647_v40 = vadd.f32 %v6011_v7, %v5929_v24 }
 0x262   :  { %3730 = vst [vmem:[#allocation9 + $0x18] sm:$0xff] %v3666_v16  ;;  %v3669_v5 = vadd.f32 %v6108_v1, %v3344_v59  ;;  %v3150_v41 = vpop.f32.mrf.mxu0  ;;  %v3346_v37 = vadd.f32 %v3345_v63, %v3137_v8  ;;  %v2881_v25 = vadd.f32 %v6029_v21, %v2649_v44  ;;  %v2663_v21 = vadd.f32 %v6027_v33, %v5937_v12 }
 0x263   :  { %v3350_v35 = vpop.f32.mrf.mxu1  ;;  %v3151_v46 = vadd.f32 %v3150_v41, %v2854_v17  ;;  %v2872_v59 = vadd.f32 %v6021_v51, %v2641_v48  ;;  %v2655_v51 = vadd.f32 %v6019_v62, %v5933_v19 }
 0x264   :  { %3733 = vst [vmem:[#allocation9 + $0x30] sm:$0xff] %v3669_v5  ;;  %v3670_v50 = vadd.f32 %v6111_v57, %v3346_v37  ;;  %v3155_v15 = vpop.f32.mrf.mxu0  ;;  %v3351_v23 = vadd.f32 %v3350_v35, %v3142_v52  ;;  %v2879_v52 = vadd.f32 %v6025_v36, %v2647_v40  ;;  %v2657_v36 = vadd.f32 %v6023_v0, %v5935_v60 }
 0x265   :  { %v3352_v13 = vpop.f32.mrf.mxu1  ;;  %v3156_v61 = vadd.f32 %v3155_v15, %v2861_v45 }
 0x266   :  { %3734 = vst [vmem:[#allocation9 + $0x38] sm:$0xff] %v3670_v50  ;;  %v3673_v34 = vadd.f32 %v6108_v1, %v3351_v23  ;;  %v3157_v42 = vpop.f32.mrf.mxu0  ;;  %v3353_v38 = vadd.f32 %v3352_v13, %v3144_v39  ;;  %v2888_v50 = vadd.f32 %v6033_v4, %v2655_v51  ;;  %v7052_v13 = vld [vmem:[#allocation88_spill] sm:$0xff]  ;;  %v7054_v4 = vld [vmem:[#allocation86_spill] sm:$0xff] }
 0x267   :  { %v3357_v47 = vpop.f32.mrf.mxu1  ;;  %v3158_v8 = vadd.f32 %v3157_v42, %v2863_v10  ;;  %v2890_v17 = vadd.f32 %v7052_v13, %v2657_v36  ;;  %v7053_v42 = vld [vmem:[#allocation15_spill] sm:$0xff]  ;;  %v7058_v10 = vld [vmem:[#allocation94_spill] sm:$0xff]  ;;  %v7065_v51 = vld [vmem:[#allocation32_spill] sm:$0xff] }
 0x268   :  { %3737 = vst [vmem:[#allocation9 + $0x50] sm:$0xff] %v3673_v34  ;;  %v3674_v6 = vadd.f32 %v6111_v57, %v3353_v38  ;;  %v3162_v27 = vpop.f32.mrf.mxu0  ;;  %v3358_v30 = vadd.f32 %v3357_v47, %v3149_v3  ;;  %v2665_v38 = vadd.f32 %v7054_v4, %v7053_v42  ;;  %v7055_v47 = vld [vmem:[#allocation47_spill] sm:$0xff] }
 0x269   :  { %v3359_v55 = vpop.f32.mrf.mxu1  ;;  %v3163_v20 = vadd.f32 %v3162_v27, %v2870_v28  ;;  %v2897_v45 = vadd.f32 %v7055_v47, %v2663_v21  ;;  %v7056_v27 = vld [vmem:[#allocation74_spill] sm:$0xff]  ;;  %v7060_v28 = vld [vmem:[#allocation92_spill] sm:$0xff]  ;;  %v7070_v21 = vld [vmem:[#allocation43_spill] sm:$0xff] }
 0x26a   :  { %3738 = vst [vmem:[#allocation9 + $0x58] sm:$0xff] %v3674_v6  ;;  %v3677_v9 = vadd.f32 %v6108_v1, %v3358_v30  ;;  %v3164_v29 = vpop.f32.mrf.mxu0  ;;  %v3360_v53 = vadd.f32 %v3359_v55, %v3151_v46  ;;  %v7057_v30 = vld [vmem:[#allocation17_spill] sm:$0xff] }
 0x26b   :  { %v3364_v26 = vpop.f32.mrf.mxu1  ;;  %v3165_v5 = vadd.f32 %v3164_v29, %v2872_v59  ;;  %v2671_v2 = vadd.f32 %v7057_v30, %v7056_v27 }
 0x26c   :  { %3741 = vst [vmem:[#allocation9 + $0x70] sm:$0xff] %v3677_v9  ;;  %v3678_v16 = vadd.f32 %v6111_v57, %v3360_v53  ;;  %v3169_v43 = vpop.f32.mrf.mxu0  ;;  %v3365_v56 = vadd.f32 %v3364_v26, %v3156_v61  ;;  %v2899_v61 = vadd.f32 %v7058_v10, %v2665_v38  ;;  %v7059_v26 = vld [vmem:[#allocation33_spill] sm:$0xff]  ;;  %v7073_v38 = vld [vmem:[#allocation63_spill] sm:$0xff] }
 0x26d   :  { %v3366_v11 = vpop.f32.mrf.mxu1  ;;  %v3170_v35 = vadd.f32 %v3169_v43, %v2879_v52  ;;  %v7061_v43 = vld [vmem:[#allocation95_spill] sm:$0xff] }
 0x26e   :  { %3742 = vst [vmem:[#allocation9 + $0x78] sm:$0xff] %v3678_v16  ;;  %v3681_v63 = vadd.f32 %v6108_v1, %v3365_v56  ;;  %v3171_v32 = vpop.f32.mrf.mxu0  ;;  %v3367_v49 = vadd.f32 %v3366_v11, %v3158_v8  ;;  %v2673_v8 = vadd.f32 %v7060_v28, %v7059_v26  ;;  %v2906_v56 = vadd.f32 %v7061_v43, %v2671_v2  ;;  %v7076_v2 = vld [vmem:[#allocation102_spill] sm:$0xff] }
 0x26f   :  { %v3371_v54 = vpop.f32.mrf.mxu1  ;;  %v3172_v15 = vadd.f32 %v3171_v32, %v2881_v25  ;;  %v7063_v32 = vld [vmem:[#allocation91_spill] sm:$0xff] }
 0x270   :  { %3745 = vst [vmem:[#allocation9 + $0x90] sm:$0xff] %v3681_v63  ;;  %v3682_v41 = vadd.f32 %v6111_v57, %v3367_v49  ;;  %v3176_v24 = vpop.f32.mrf.mxu0  ;;  %v3372_v7 = vadd.f32 %v3371_v54, %v3163_v20  ;;  %v7062_v63 = vld [vmem:[#allocation13_spill] sm:$0xff]  ;;  %v7064_v54 = vld [vmem:[#allocation40_spill] sm:$0xff] }
 0x271   :  { %v3373_v37 = vpop.f32.mrf.mxu1  ;;  %v3177_v3 = vadd.f32 %v3176_v24, %v2888_v50  ;;  %v2679_v49 = vadd.f32 %v7063_v32, %v7062_v63  ;;  %v2908_v52 = vadd.f32 %v7064_v54, %v2673_v8  ;;  %v7079_v8 = vld [vmem:[#allocation49_spill] sm:$0xff] }
 0x272   :  { %3746 = vst [vmem:[#allocation9 + $0x98] sm:$0xff] %v3682_v41  ;;  %v3685_v58 = vadd.f32 %v6108_v1, %v3372_v7  ;;  %v3178_v22 = vpop.f32.mrf.mxu0  ;;  %v3374_v18 = vadd.f32 %v3373_v37, %v3165_v5  ;;  %v7066_v37 = vld [vmem:[#allocation93_spill] sm:$0xff] }
 0x273   :  { %v3378_v39 = vpop.f32.mrf.mxu1  ;;  %v3179_v46 = vadd.f32 %v3178_v22, %v2890_v17  ;;  %v2681_v25 = vadd.f32 %v7066_v37, %v7065_v51 }
 0x274   :  { %3749 = vst [vmem:[#allocation9 + $0xb0] sm:$0xff] %v3685_v58  ;;  %v3686_v23 = vadd.f32 %v6111_v57, %v3374_v18  ;;  %v3183_v19 = vpop.f32.mrf.mxu0  ;;  %v3379_v62 = vadd.f32 %v3378_v39, %v3170_v35  ;;  %v7067_v58 = vld [vmem:[#allocation23_spill] sm:$0xff] }
 0x275   :  { %v3380_v14 = vpop.f32.mrf.mxu1  ;;  %v3184_v9 = vadd.f32 %v3183_v19, %v2897_v45  ;;  %v2915_v22 = vadd.f32 %v7067_v58, %v2679_v49  ;;  %v7082_v49 = vld [vmem:[#allocation71_spill] sm:$0xff] }
 0x276   :  { %3750 = vst [vmem:[#allocation9 + $0xb8] sm:$0xff] %v3686_v23  ;;  %v3689_v34 = vadd.f32 %v6108_v1, %v3379_v62  ;;  %v3185_v60 = vpop.f32.mrf.mxu0  ;;  %v3381_v0 = vadd.f32 %v3380_v14, %v3172_v15  ;;  %v7068_v15 = vld [vmem:[#allocation76_spill] sm:$0xff]  ;;  %v7069_v23 = vld [vmem:[#allocation21_spill] sm:$0xff]  ;;  %v2917_v14 = vadd.f32 %v7070_v21, %v2681_v25 }
 0x277   :  { %v3385_v31 = vpop.f32.mrf.mxu1  ;;  %v3186_v40 = vadd.f32 %v3185_v60, %v2899_v61  ;;  %v2687_v19 = vadd.f32 %v7069_v23, %v7068_v15  ;;  %v7071_v60 = vld [vmem:[#allocation36_spill] sm:$0xff] }
 0x278   :  { %3753 = vst [vmem:[#allocation9 + $0xd0] sm:$0xff] %v3689_v34  ;;  %v3690_v6 = vadd.f32 %v6111_v57, %v3381_v0  ;;  %v3190_v12 = vpop.f32.mrf.mxu0  ;;  %v3386_v33 = vadd.f32 %v3385_v31, %v3177_v3  ;;  %v7072_v0 = vld [vmem:[#allocation45_spill] sm:$0xff]  ;;  %v7085_v25 = vld [vmem:[#allocation104_spill] sm:$0xff] }
 0x279   :  { %v3387_v55 = vpop.f32.mrf.mxu1  ;;  %v3191_v5 = vadd.f32 %v3190_v12, %v2906_v56  ;;  %v2689_v42 = vadd.f32 %v7072_v0, %v7071_v60  ;;  %v2924_v31 = vadd.f32 %v7073_v38, %v2687_v19  ;;  %v7074_v12 = vld [vmem:[#allocation81_spill] sm:$0xff] }
 0x27a   :  { %3754 = vst [vmem:[#allocation9 + $0xd8] sm:$0xff] %v3690_v6  ;;  %v3693_v29 = vadd.f32 %v6108_v1, %v3386_v33  ;;  %v3192_v53 = vpop.f32.mrf.mxu0  ;;  %v3388_v48 = vadd.f32 %v3387_v55, %v3179_v46  ;;  %v7075_v33 = vld [vmem:[#allocation51_spill] sm:$0xff]  ;;  %v7088_v19 = vld [vmem:[#allocation57_spill] sm:$0xff] }
 0x27b   :  { %v3392_v16 = vpop.f32.mrf.mxu1  ;;  %v3193_v18 = vadd.f32 %v3192_v53, %v2908_v52  ;;  %v2695_v27 = vadd.f32 %v7075_v33, %v7074_v12  ;;  %v2926_v55 = vadd.f32 %v7076_v2, %v2689_v42  ;;  %v7077_v53 = vld [vmem:[#allocation38_spill] sm:$0xff]  ;;  %v7091_v42 = vld [vmem:[#allocation79_spill] sm:$0xff] }
 0x27c   :  { %3757 = vst [vmem:[#allocation9 + $0xf0] sm:$0xff] %v3693_v29  ;;  %v3694_v11 = vadd.f32 %v6111_v57, %v3388_v48  ;;  %v3197_v59 = vpop.f32.mrf.mxu0  ;;  %v3393_v20 = vadd.f32 %v3392_v16, %v3184_v9  ;;  %v7078_v48 = vld [vmem:[#allocation61_spill] sm:$0xff] }
 0x27d   :  { %v3394_v44 = vpop.f32.mrf.mxu1  ;;  %v3198_v13 = vadd.f32 %v3197_v59, %v2915_v22  ;;  %v2697_v26 = vadd.f32 %v7078_v48, %v7077_v53  ;;  %v2933_v16 = vadd.f32 %v7079_v8, %v2695_v27  ;;  %v7080_v59 = vld [vmem:[#allocation35_spill] sm:$0xff]  ;;  %v7094_v27 = vld [vmem:[#allocation58_spill] sm:$0xff] }
 0x27e   :  { %3758 = vst [vmem:[#allocation9 + $0xf8] sm:$0xff] %v3694_v11  ;;  %v3697_v41 = vadd.f32 %v6108_v1, %v3393_v20  ;;  %v3199_v24 = vpop.f32.mrf.mxu0  ;;  %v3395_v7 = vadd.f32 %v3394_v44, %v3186_v40  ;;  %v7081_v20 = vld [vmem:[#allocation48_spill] sm:$0xff]  ;;  %v7097_v48 = vld [vmem:[#allocation27_spill] sm:$0xff] }
 0x27f   :  { %v3399_v35 = vpop.f32.mrf.mxu1  ;;  %v3200_v47 = vadd.f32 %v3199_v24, %v2917_v14  ;;  %v2703_v63 = vadd.f32 %v7081_v20, %v7080_v59  ;;  %v2935_v44 = vadd.f32 %v7082_v49, %v2697_v26  ;;  %v7083_v24 = vld [vmem:[#allocation80_spill] sm:$0xff] }
 0x280   :  { %3761 = vst [vmem:[#allocation9 + $0x110] sm:$0xff] %v3697_v41  ;;  %v3698_v36 = vadd.f32 %v6111_v57, %v3395_v7  ;;  %v3204_v39 = vpop.f32.mrf.mxu0  ;;  %v3400_v50 = vadd.f32 %v3399_v35, %v3191_v5  ;;  %v7084_v7 = vld [vmem:[#allocation67_spill] sm:$0xff] }
 0x281   :  { %v3401_v62 = vpop.f32.mrf.mxu1  ;;  %v3205_v10 = vadd.f32 %v3204_v39, %v2924_v31  ;;  %v2705_v51 = vadd.f32 %v7084_v7, %v7083_v24  ;;  %v2942_v35 = vadd.f32 %v7085_v25, %v2703_v63  ;;  %v7086_v39 = vld [vmem:[#allocation96_spill] sm:$0xff] }
 0x282   :  { %3762 = vst [vmem:[#allocation9 + $0x118] sm:$0xff] %v3698_v36  ;;  %v3701_v17 = vadd.f32 %v6108_v1, %v3400_v50  ;;  %v3206_v3 = vpop.f32.mrf.mxu0  ;;  %v3402_v34 = vadd.f32 %v3401_v62, %v3193_v18  ;;  %v7087_v50 = vld [vmem:[#allocation103_spill] sm:$0xff] }
 0x283   :  { %v3406_v4 = vpop.f32.mrf.mxu1  ;;  %v3207_v43 = vadd.f32 %v3206_v3, %v2926_v55  ;;  %v2711_v15 = vadd.f32 %v7087_v50, %v7086_v39  ;;  %v2944_v62 = vadd.f32 %v7088_v19, %v2705_v51  ;;  %v7089_v3 = vld [vmem:[#allocation85_spill] sm:$0xff] }
 0x284   :  { %3765 = vst [vmem:[#allocation9 + $0x130] sm:$0xff] %v3701_v17  ;;  %v3702_v45 = vadd.f32 %v6111_v57, %v3402_v34  ;;  %v3211_v46 = vpop.f32.mrf.mxu0  ;;  %v3407_v6 = vadd.f32 %v3406_v4, %v3198_v13  ;;  %v7090_v34 = vld [vmem:[#allocation50_spill] sm:$0xff] }
 0x285   :  { %v3408_v30 = vpop.f32.mrf.mxu1  ;;  %v3212_v54 = vadd.f32 %v3211_v46, %v2933_v16  ;;  %v2713_v60 = vadd.f32 %v7090_v34, %v7089_v3  ;;  %v2951_v4 = vadd.f32 %v7091_v42, %v2711_v15  ;;  %v7093_v46 = vld [vmem:[#allocation75_spill] sm:$0xff] }
 0x286   :  { %3766 = vst [vmem:[#allocation9 + $0x138] sm:$0xff] %v3702_v45  ;;  %v3705_v61 = vadd.f32 %v6108_v1, %v3407_v6  ;;  %v3213_v9 = vpop.f32.mrf.mxu0  ;;  %v3409_v29 = vadd.f32 %v3408_v30, %v3200_v47  ;;  %v7092_v45 = vld [vmem:[#allocation28_spill] sm:$0xff] }
 0x287   :  { %v3413_v28 = vpop.f32.mrf.mxu1  ;;  %v3214_v58 = vadd.f32 %v3213_v9, %v2935_v44  ;;  %v2719_v6 = vadd.f32 %v7093_v46, %v7092_v45  ;;  %v2953_v30 = vadd.f32 %v7094_v27, %v2713_v60  ;;  %v7096_v9 = vld [vmem:[#allocation105_spill] sm:$0xff] }
 0x288   :  { %3769 = vst [vmem:[#allocation9 + $0x150] sm:$0xff] %v3705_v61  ;;  %v3706_v56 = vadd.f32 %v6111_v57, %v3409_v29  ;;  %v3218_v40 = vpop.f32.mrf.mxu0  ;;  %v3414_v11 = vadd.f32 %v3413_v28, %v3205_v10  ;;  %v7095_v61 = vld [vmem:[#allocation84_spill] sm:$0xff] }
 0x289   :  { %v3415_v32 = vpop.f32.mrf.mxu1  ;;  %v3219_v21 = vadd.f32 %v3218_v40, %v2942_v35  ;;  %v2721_v29 = vadd.f32 %v7096_v9, %v7095_v61  ;;  %v2960_v26 = vadd.f32 %v7097_v48, %v2719_v6  ;;  %v7098_v40 = vld [vmem:[#allocation83_spill] sm:$0xff] }
 0x28a   :  { %3770 = vst [vmem:[#allocation9 + $0x158] sm:$0xff] %v3706_v56  ;;  %v3709_v52 = vadd.f32 %v6108_v1, %v3414_v11  ;;  %v3220_v5 = vpop.f32.mrf.mxu0  ;;  %v3416_v41 = vadd.f32 %v3415_v32, %v3207_v43 }
 0x28b   :  { %v3420_v37 = vpop.f32.mrf.mxu1  ;;  %v3221_v38 = vadd.f32 %v3220_v5, %v2944_v62  ;;  %v2962_v11 = vadd.f32 %v7098_v40, %v2721_v29 }
 0x28c   :  { %3773 = vst [vmem:[#allocation9 + $0x170] sm:$0xff] %v3709_v52  ;;  %v3710_v22 = vadd.f32 %v6111_v57, %v3416_v41  ;;  %v3225_v18 = vpop.f32.mrf.mxu0  ;;  %v3421_v36 = vadd.f32 %v3420_v37, %v3212_v54 }
 0x28d   :  { %v3422_v23 = vpop.f32.mrf.mxu1  ;;  %v3226_v2 = vadd.f32 %v3225_v18, %v2951_v4 }
 0x28e   :  { %3774 = vst [vmem:[#allocation9 + $0x178] sm:$0xff] %v3710_v22  ;;  %v3713_v14 = vadd.f32 %v6108_v1, %v3421_v36  ;;  %v3227_v13 = vpop.f32.mrf.mxu0  ;;  %v3423_v17 = vadd.f32 %v3422_v23, %v3214_v58 }
 0x28f   :  { %v3427_v0 = vpop.f32.mrf.mxu1  ;;  %v3228_v28 = vadd.f32 %v3227_v13, %v2953_v30 }
 0x290   :  { %3777 = vst [vmem:[#allocation9 + $0x190] sm:$0xff] %v3713_v14  ;;  %v3714_v31 = vadd.f32 %v6111_v57, %v3423_v17  ;;  %v3428_v47 = vadd.f32 %v3427_v0, %v3219_v21  ;;  %v3232_v12 = vpop.f32.mrf.mxu0 }
 0x291   :  { %v3429_v33 = vpop.f32.mrf.mxu1  ;;  %v3233_v59 = vadd.f32 %v3232_v12, %v2960_v26 }
 0x292   :  { %3778 = vst [vmem:[#allocation9 + $0x198] sm:$0xff] %v3714_v31  ;;  %v3717_v55 = vadd.f32 %v6108_v1, %v3428_v47  ;;  %v3430_v10 = vadd.f32 %v3429_v33, %v3221_v38  ;;  %v3234_v43 = vpop.f32.mrf.mxu0 }
 0x293   :  { %v3434_v53 = vpop.f32.mrf.mxu1  ;;  %v3235_v49 = vadd.f32 %v3234_v43, %v2962_v11 }
 0x294   :  { %3781 = vst [vmem:[#allocation9 + $0x1b0] sm:$0xff] %v3717_v55  ;;  %v3718_v8 = vadd.f32 %v6111_v57, %v3430_v10  ;;  %v3435_v16 = vadd.f32 %v3434_v53, %v3226_v2 }
 0x295   :  { %v3436_v56 = vpop.f32.mrf.mxu1 }
 0x296   :  { %3782 = vst [vmem:[#allocation9 + $0x1b8] sm:$0xff] %v3718_v8  ;;  %v3721_v20 = vadd.f32 %v6108_v1, %v3435_v16  ;;  %v3437_v63 = vadd.f32 %v3436_v56, %v3228_v28 }
 0x297   :  { %v3441_v32 = vpop.f32.mrf.mxu1 }
 0x298   :  { %3785 = vst [vmem:[#allocation9 + $0x1d0] sm:$0xff] %v3721_v20  ;;  %v3722_v44 = vadd.f32 %v6111_v57, %v3437_v63  ;;  %v3442_v54 = vadd.f32 %v3441_v32, %v3233_v59 }
 0x299   :  { %v3443_v52 = vpop.f32.mrf.mxu1 }
 0x29a   :  { %3786 = vst [vmem:[#allocation9 + $0x1d8] sm:$0xff] %v3722_v44  ;;  %v3725_v5 = vadd.f32 %v6108_v1, %v3442_v54  ;;  %v3444_v41 = vadd.f32 %v3443_v52, %v3235_v49 }
 0x29c   :  { %3789 = vst [vmem:[#allocation9 + $0x1f0] sm:$0xff] %v3725_v5  ;;  %v3726_v24 = vadd.f32 %v6111_v57, %v3444_v41 }
 0x29e   :  { %3790 = vst [vmem:[#allocation9 + $0x1f8] sm:$0xff] %v3726_v24 }
 0x29f   :  { %3889 = shalt.err (!%p3886_p5)
}
 0x2a0   :  { %3802 = dma.vmem_to_hbm [thread:$0]  %s3797_s2, 8192, %s6242_s3, [#allocation5], %s3905_s15, %s3905_s15, %s3906_s16  }
 0x2a1   :  { %3902 = dma.done.wait [#allocation5], 8192  }
 0x2a2   :  { %3903 = vsyncadd [#allocation5], 4294959104 }
 0x2a3   :  { %3806 = vsyncpa [#allocation4], 1 }
 0x2a4   :  { %3807 = vsyncpa [#allocation7], 1 }
 0x2a5   :  { %3808 = vsyncpa [#allocation5], 1 }

</bundles_post_ra>
